<compile_context>
chip_gen: v7x
topology: tpu7x:2x2x1
jax: 0.10.0
libtpu: 0.0.40
codegen_flags: <defaults>
</compile_context>

<pallas_src>
import functools
import math

import jax
import jax.numpy as jnp
import numpy as np
from jax.experimental import pallas as pl
from jax.experimental.pallas import tpu as pltpu

_BN_EPS = 1e-5
_VMEM = pl.BlockSpec(memory_space=pltpu.MemorySpace.VMEM)
_COMPILER_PARAMS = pltpu.CompilerParams(vmem_limit_bytes=32 * 1024 * 1024)


# ----------------------------------------------------------------------------- kernels
def _fused_conv_kernel(*refs, n, kh, stride, ho, wo, cout, relu, has_ds, has_res, has_avg):
    """Fused conv+BN (+fused 1x1 downsample) (+residual) (+ReLU) (+global avg pool).

    x_ref : (stride, N, H2, Wp*Cin) bf16  row-phase-split zero-padded input
    w_ref : (kh, Wp*Cin, Wo*Cout)   bf16  block-Toeplitz weights (kw taps, W-stride, BN scale folded)
    b_ref : (1, Wo*Cout)            f32   folded BN bias
    [wd_ref (Wp*Cin, Wo*Cds) bf16, bd_ref (1, Wo*Cds) f32]   fused 1x1 downsample
    [r_ref  (N, ho, Wo*Cout) bf16]                            residual
    o_ref  : (N, ho, Wo*Cout) bf16,  [od_ref (N, ho, Wo*Cds) bf16],  [oa_ref (N, Cout) f32]
    """
    it = iter(refs)
    x_ref = next(it)
    w_ref = next(it)
    b_ref = next(it)
    wd_ref = next(it) if has_ds else None
    bd_ref = next(it) if has_ds else None
    r_ref = next(it) if has_res else None
    o_ref = next(it)
    od_ref = next(it) if has_ds else None
    oa_ref = next(it) if has_avg else None

    ctr = (kh - 1) // 2                       # centre-row tap (used by the fused downsample)
    inv_hw = 1.0 / float(ho * wo)
    for b in range(n):
        acc = None
        for ki in range(kh):                  # one MXU matmul per kernel row (in-VMEM "im2col")
            rows = x_ref[ki % stride, b, (ki // stride):(ki // stride) + ho, :]
            d = jnp.dot(rows, w_ref[ki], preferred_element_type=jnp.float32)
            acc = d if acc is None else acc + d
        acc = acc + b_ref[...]
        if has_res:
            acc = acc + r_ref[b].astype(jnp.float32)
        if relu:
            acc = jnp.maximum(acc, 0.0)
        o_ref[b] = acc.astype(o_ref.dtype)
        if has_ds:                            # fused 1x1/stride-s downsample (centre row only)
            rows_c = x_ref[ctr % stride, b, (ctr // stride):(ctr // stride) + ho, :]
            dsv = jnp.dot(rows_c, wd_ref[...], preferred_element_type=jnp.float32) + bd_ref[...]
            od_ref[b] = dsv.astype(od_ref.dtype)
        if has_avg:                           # fused global average pool of the post-ReLU output
            srow = jnp.sum(acc, axis=0, keepdims=True)          # (1, Wo*Cout)
            csum = None
            for ow in range(wo):
                blk = srow[:, ow * cout:(ow + 1) * cout]
                csum = blk if csum is None else csum + blk
            oa_ref[pl.ds(b, 1), :] = (csum * inv_hw).astype(oa_ref.dtype)


def _maxpool_kernel(x_ref, o_ref, *, ho, wo, c):
    """3x3 / stride-2 / pad-1 max pool.  x_ref: (2, 2, N, H2, W2*C), phase-split, -inf padded."""
    r = None
    for ki in range(3):
        for kj in range(3):
            win = x_ref[ki % 2, kj % 2, :,
                        (ki // 2):(ki // 2) + ho,
                        (kj // 2) * c:((kj // 2) + wo) * c]
            r = win if r is None else jnp.maximum(r, win)
    o_ref[...] = r


# ----------------------------------------------------------------------------- pallas wrappers
def _cost(inputs, out_shapes, flops):
    nbytes = sum(int(a.size) * np.dtype(a.dtype).itemsize for a in inputs)
    nbytes += sum(int(np.prod(s.shape)) * np.dtype(s.dtype).itemsize for s in out_shapes)
    return pl.CostEstimate(flops=int(flops), transcendentals=0, bytes_accessed=int(nbytes))


def _conv_call(xf, n, p, *, relu=True, residual=None, ds=None, fuse_avg=False):
    """xf: (N, H, W*Cin) bf16 -> [conv_out, (ds_out), (avg_out)]."""
    h, w, cin, cout = p["h"], p["w"], p["cin"], p["cout"]
    stride, pad, kh = p["stride"], p["pad"], p["kh"]
    hp, wp, ho, wo, h2 = p["hp"], p["wp"], p["ho"], p["wo"], p["h2"]
    K, D = wp * cin, wo * cout

    x4 = xf.reshape(n, h, w, cin)
    if stride == 1:
        xp = jnp.pad(x4, ((0, 0), (pad, pad), (pad, pad), (0, 0)))
        xk = xp.reshape(1, n, h2, K)
    else:  # stride 2: split rows into even/odd phases so the kernel slices with unit stride
        xp = jnp.pad(x4, ((0, 0), (pad, 2 * h2 - h - pad), (pad, pad), (0, 0)))
        xk = xp.reshape(n, h2, 2, K).transpose(2, 0, 1, 3)

    inputs = [xk, p["T"], p["b"]]
    flops = 2.0 * n * kh * ho * K * D
    if ds is not None:
        inputs += [ds["T"], ds["b"]]
        flops += 2.0 * n * ho * K * ds["dout"]
    if residual is not None:
        inputs.append(residual)

    out_shapes = [jax.ShapeDtypeStruct((n, ho, D), jnp.bfloat16)]
    if ds is not None:
        out_shapes.append(jax.ShapeDtypeStruct((n, ho, ds["dout"]), jnp.bfloat16))
    if fuse_avg:
        out_shapes.append(jax.ShapeDtypeStruct((n, cout), jnp.float32))

    kern = functools.partial(
        _fused_conv_kernel, n=n, kh=kh, stride=stride, ho=ho, wo=wo, cout=cout,
        relu=relu, has_ds=ds is not None, has_res=residual is not None, has_avg=fuse_avg)
    return pl.pallas_call(
        kern,
        out_shape=out_shapes,
        in_specs=[_VMEM] * len(inputs),
        out_specs=[_VMEM] * len(out_shapes),
        compiler_params=_COMPILER_PARAMS,
        cost_estimate=_cost(inputs, out_shapes, flops),
    )(*inputs)


def _maxpool_call(xf, n, pp):
    h, w, c, ho, wo = pp["h"], pp["w"], pp["c"], pp["ho"], pp["wo"]
    h2, w2 = ho + 1, wo + 1
    x4 = xf.reshape(n, h, w, c)
    xp = jnp.pad(x4, ((0, 0), (1, 2 * h2 - h - 1), (1, 2 * w2 - w - 1), (0, 0)),
                 constant_values=-jnp.inf)
    xk = xp.reshape(n, h2, 2, w2, 2, c).transpose(2, 4, 0, 1, 3, 5).reshape(2, 2, n, h2, w2 * c)
    out_shapes = [jax.ShapeDtypeStruct((n, ho, wo * c), xf.dtype)]
    return pl.pallas_call(
        functools.partial(_maxpool_kernel, ho=ho, wo=wo, c=c),
        out_shape=out_shapes,
        in_specs=[_VMEM],
        out_specs=[_VMEM],
        compiler_params=_COMPILER_PARAMS,
        cost_estimate=_cost([xk], out_shapes, 9 * n * ho * wo * c),
    )(xk)[0]


# ----------------------------------------------------------------------------- parameters
def _conv_bn_init(key, cin, cout, k):
    # Conv2d: kaiming_normal_, mode='fan_out', nonlinearity='relu' -> std = sqrt(2/fan_out)
    fan_out = cout * k * k
    std = math.sqrt(2.0 / fan_out)
    w = std * jax.random.normal(key, (cout, cin, k, k), jnp.float32)     # PyTorch OIHW
    gamma = jnp.ones((cout,), jnp.float32)
    beta = jnp.zeros((cout,), jnp.float32)
    rmean = jnp.zeros((cout,), jnp.float32)
    rvar = jnp.ones((cout,), jnp.float32)
    scale = gamma / jnp.sqrt(rvar + _BN_EPS)
    bias = beta - rmean * scale
    return {"w": w, "scale": scale, "bias": bias}


def init_resnet_params(key, num_channels=3, width_per_group=8, widen=1, layers=(1, 1, 1, 1)):
    keys = iter(jax.random.split(key, 64))
    inplanes = width_per_group * widen
    params = {"conv1": _conv_bn_init(next(keys), num_channels, inplanes, 7)}
    layer_params = []
    planes = width_per_group * widen
    for li, nblocks in enumerate(layers):
        if li > 0:
            planes *= 2
        layer_stride = 1 if li == 0 else 2
        blks = []
        for bi in range(nblocks):
            s = layer_stride if bi == 0 else 1
            need_ds = (s != 1) or (inplanes != planes)      # BasicBlock.expansion == 1
            blk = {
                "conv1": _conv_bn_init(next(keys), inplanes, planes, 3),
                "conv2": _conv_bn_init(next(keys), planes, planes, 3),
                "downsample": _conv_bn_init(next(keys), inplanes, planes, 1) if need_ds else None,
                "stride": s,
            }
            inplanes = planes
            blks.append(blk)
        layer_params.append(blks)
    params["layers"] = layer_params
    return params


# ----------------------------------------------------------------------------- plan (folded weights)
def _plan_conv(centry, h, w, stride, pad):
    """BN scale folded into the weight; build the per-kernel-row block-Toeplitz GEMM weight
    T[ki, wv*Cin+ci, ow*Cout+co] = scale[co]*w[co, ci, ki, wv - stride*ow] (0 outside the tap)."""
    w_oihw = np.asarray(centry["w"], np.float32)
    scale = np.asarray(centry["scale"], np.float32)
    bias = np.asarray(centry["bias"], np.float32)
    cout, cin, kh, kw = w_oihw.shape
    hp, wp = h + 2 * pad, w + 2 * pad
    ho = (hp - kh) // stride + 1
    wo = (wp - kw) // stride + 1
    wt = np.transpose(w_oihw * scale[:, None, None, None], (2, 3, 1, 0))   # (kh, kw, cin, cout)
    T = np.zeros((kh, wp, cin, wo, cout), np.float32)
    for kj in range(kw):
        for ow in range(wo):
            T[:, stride * ow + kj, :, ow, :] = wt[:, kj]
    h2 = hp if stride == 1 else (kh - 1) // 2 + ho
    return {
        "T": jnp.asarray(T.reshape(kh, wp * cin, wo * cout), jnp.bfloat16),
        "b": jnp.asarray(np.tile(bias, wo).reshape(1, wo * cout), jnp.float32),
        "kh": kh, "stride": stride, "pad": pad, "h": h, "w": w, "cin": cin, "cout": cout,
        "hp": hp, "wp": wp, "ho": ho, "wo": wo, "h2": h2,
    }


def _plan_ds(dentry, p1):
    """1x1/stride-s downsample folded onto the centre-row tap of the block's pad-1 3x3 conv."""
    w_oihw = np.asarray(dentry["w"], np.float32)       # (cds, cin, 1, 1)
    scale = np.asarray(dentry["scale"], np.float32)
    bias = np.asarray(dentry["bias"], np.float32)
    cds, cin = w_oihw.shape[0], w_oihw.shape[1]
    stride, wp, wo = p1["stride"], p1["wp"], p1["wo"]
    w2d = (w_oihw[:, :, 0, 0] * scale[:, None]).T      # (cin, cds)
    Td = np.zeros((wp, cin, wo, cds), np.float32)
    for ow in range(wo):
        Td[stride * ow + 1, :, ow, :] = w2d            # +1: centre column in padded coordinates
    return {
        "T": jnp.asarray(Td.reshape(wp * cin, wo * cds), jnp.bfloat16),
        "b": jnp.asarray(np.tile(bias, wo).reshape(1, wo * cds), jnp.float32),
        "dout": wo * cds,
    }


def build_resnet_plan(params, image_hw):
    """Precompute folded/Toeplitz weights + static shape metadata for a given input (H, W)."""
    h, w = image_hw
    # ConstantPad2d(1) followed by conv1(k=7, s=2, p=2) == one zero pad of 3.
    plan = {"conv1": _plan_conv(params["conv1"], h, w, stride=2, pad=3)}
    h, w, c = plan["conv1"]["ho"], plan["conv1"]["wo"], plan["conv1"]["cout"]
    plan["pool"] = {"h": h, "w": w, "c": c, "ho": (h - 1) // 2 + 1, "wo": (w - 1) // 2 + 1}
    h, w = plan["pool"]["ho"], plan["pool"]["wo"]
    layer_plans = []
    for blocks in params["layers"]:
        blk_plans = []
        for blk in blocks:
            p1 = _plan_conv(blk["conv1"], h, w, stride=blk["stride"], pad=1)
            dsp = _plan_ds(blk["downsample"], p1) if blk["downsample"] is not None else None
            h, w = p1["ho"], p1["wo"]
            p2 = _plan_conv(blk["conv2"], h, w, stride=1, pad=1)
            blk_plans.append({"conv1": p1, "ds": dsp, "conv2": p2})
        layer_plans.append(blk_plans)
    plan["layers"] = layer_plans
    return plan


# ----------------------------------------------------------------------------- forward
def _basic_block(xf, n, blk, fuse_avg):
    p1, p2, dsp = blk["conv1"], blk["conv2"], blk["ds"]
    if dsp is not None:
        o1 = _conv_call(xf, n, p1, relu=True, ds=dsp)     # conv3x3+bn+relu, fused 1x1 downsample
        out1, identity = o1[0], o1[1]
    else:
        out1 = _conv_call(xf, n, p1, relu=True)[0]
        identity = xf
    # conv3x3 -> bn -> (+= identity) -> relu (-> avgpool), fully fused in one pallas_call
    o2 = _conv_call(out1, n, p2, relu=True, residual=identity, fuse_avg=fuse_avg)
    return o2[0], (o2[1] if fuse_avg else None)


def resnet_forward(plan, x_nchw, return_layer=4, chan_avg=False):
    assert return_layer in (1, 2, 3, 4)
    n = x_nchw.shape[0]
    x = jnp.transpose(x_nchw, (0, 2, 3, 1)).astype(jnp.bfloat16)   # NCHW -> NHWC bf16
    h, w, c = x.shape[1], x.shape[2], x.shape[3]
    xf = x.reshape(n, h, w * c)                                    # lane dim = W*C (lane-dense)

    xf = _conv_call(xf, n, plan["conv1"], relu=True)[0]
    xf = _maxpool_call(xf, n, plan["pool"])
    h, w, c = plan["pool"]["ho"], plan["pool"]["wo"], plan["pool"]["c"]

    avg = None
    for li, blocks in enumerate(plan["layers"]):
        for bi, blk in enumerate(blocks):
            fuse_avg = chan_avg and (return_layer == li + 1) and (bi == len(blocks) - 1)
            xf, avg_b = _basic_block(xf, n, blk, fuse_avg)
            h, w, c = blk["conv2"]["ho"], blk["conv2"]["wo"], blk["conv2"]["cout"]
            if avg_b is not None:
                avg = avg_b
        if return_layer == li + 1:
            break

    if chan_avg:
        return avg.astype(jnp.float32)                             # (N, C) == flatten(avgpool)
    return jnp.transpose(xf.reshape(n, h, w, c), (0, 3, 1, 2)).astype(jnp.float32)   # NCHW


# ----------------------------------------------------------------------------- demo
if __name__ == "__main__":
    key = jax.random.PRNGKey(0)
    pkey, xkey = jax.random.split(key)
    params = init_resnet_params(pkey, num_channels=3, width_per_group=8, widen=1,
                                layers=(1, 1, 1, 1))
    x = jax.random.normal(xkey, (2, 3, 32, 32), jnp.float32)       # NCHW input
    plan = build_resnet_plan(params, (32, 32))

    feats = jax.jit(lambda a: resnet_forward(plan, a, return_layer=4, chan_avg=False))(x)
    emb = jax.jit(lambda a: resnet_forward(plan, a, return_layer=4, chan_avg=True))(x)
    feats2 = jax.jit(lambda a: resnet_forward(plan, a, return_layer=2, chan_avg=False))(x)
    emb2 = jax.jit(lambda a: resnet_forward(plan, a, return_layer=2, chan_avg=True))(x)
    jax.block_until_ready((feats, emb, feats2, emb2))

    assert feats.shape == (2, 64, 1, 1), feats.shape               # NCHW feature map
    assert emb.shape == (2, 64), emb.shape                         # flattened embedding
    assert feats2.shape == (2, 16, 4, 4), feats2.shape
    assert emb2.shape == (2, 16), emb2.shape
    for t in (feats, emb, feats2, emb2):
        assert bool(jnp.all(jnp.isfinite(t)))
    # The fused global-average-pool epilogue must match averaging the returned feature map.
    ref2 = feats2.mean(axis=(2, 3))
    assert bool(jnp.allclose(emb2, ref2, atol=0.1, rtol=0.1))
    print("KERNEL_OK")
</pallas_src>

<mosaic_0001>
module attributes {stable_mosaic.version = 11 : i64} {
  func.func @_fused_conv_kernel(%arg0: memref<2x2x19x114xbf16, #tpu.memory_space<vmem>>, %arg1: memref<7x114x128xbf16, #tpu.memory_space<vmem>>, %arg2: memref<1x128xf32, #tpu.memory_space<vmem>>, %arg3: memref<2x16x128xbf16, #tpu.memory_space<vmem>>) attributes {dimension_semantics = [], scalar_prefetch = 0 : i64, scratch_operands = 0 : i64, tpu.core_type = #tpu.core_type<tc>} {
    %c0 = arith.constant 0 : index
    %c0_0 = arith.constant 0 : index
    %c0_1 = arith.constant 0 : index
    %c0_2 = arith.constant 0 : index
    %0 = vector.load %arg0[%c0, %c0_0, %c0_1, %c0_2] : memref<2x2x19x114xbf16, #tpu.memory_space<vmem>>, vector<1x1x16x114xbf16>
    %1 = vector.shape_cast %0 : vector<1x1x16x114xbf16> to vector<16x114xbf16>
    %c0_3 = arith.constant 0 : index
    %c0_4 = arith.constant 0 : index
    %c0_5 = arith.constant 0 : index
    %2 = vector.load %arg1[%c0_3, %c0_4, %c0_5] : memref<7x114x128xbf16, #tpu.memory_space<vmem>>, vector<1x114x128xbf16>
    %3 = vector.shape_cast %2 : vector<1x114x128xbf16> to vector<114x128xbf16>
    %cst = arith.constant dense<0.000000e+00> : vector<16x128xf32>
    %4 = tpu.matmul %1, %3, %cst {dimension_numbers = #tpu.dot_dimension_numbers<[1], [0], [0], [1], [0, 0, 1, 1], [], []>} : vector<16x114xbf16>, vector<114x128xbf16>, vector<16x128xf32> -> vector<16x128xf32>
    %c1 = arith.constant 1 : index
    %c0_6 = arith.constant 0 : index
    %c0_7 = arith.constant 0 : index
    %c0_8 = arith.constant 0 : index
    %5 = vector.load %arg0[%c1, %c0_6, %c0_7, %c0_8] : memref<2x2x19x114xbf16, #tpu.memory_space<vmem>>, vector<1x1x16x114xbf16>
    %6 = vector.shape_cast %5 : vector<1x1x16x114xbf16> to vector<16x114xbf16>
    %c1_9 = arith.constant 1 : index
    %c0_10 = arith.constant 0 : index
    %c0_11 = arith.constant 0 : index
    %7 = vector.load %arg1[%c1_9, %c0_10, %c0_11] : memref<7x114x128xbf16, #tpu.memory_space<vmem>>, vector<1x114x128xbf16>
    %8 = vector.shape_cast %7 : vector<1x114x128xbf16> to vector<114x128xbf16>
    %cst_12 = arith.constant dense<0.000000e+00> : vector<16x128xf32>
    %9 = tpu.matmul %6, %8, %cst_12 {dimension_numbers = #tpu.dot_dimension_numbers<[1], [0], [0], [1], [0, 0, 1, 1], [], []>} : vector<16x114xbf16>, vector<114x128xbf16>, vector<16x128xf32> -> vector<16x128xf32>
    %10 = arith.addf %4, %9 : vector<16x128xf32>
    %c0_13 = arith.constant 0 : index
    %c0_14 = arith.constant 0 : index
    %c1_15 = arith.constant 1 : index
    %c0_16 = arith.constant 0 : index
    %11 = vector.load %arg0[%c0_13, %c0_14, %c1_15, %c0_16] : memref<2x2x19x114xbf16, #tpu.memory_space<vmem>>, vector<1x1x16x114xbf16>
    %12 = vector.shape_cast %11 : vector<1x1x16x114xbf16> to vector<16x114xbf16>
    %c2 = arith.constant 2 : index
    %c0_17 = arith.constant 0 : index
    %c0_18 = arith.constant 0 : index
    %13 = vector.load %arg1[%c2, %c0_17, %c0_18] : memref<7x114x128xbf16, #tpu.memory_space<vmem>>, vector<1x114x128xbf16>
    %14 = vector.shape_cast %13 : vector<1x114x128xbf16> to vector<114x128xbf16>
    %cst_19 = arith.constant dense<0.000000e+00> : vector<16x128xf32>
    %15 = tpu.matmul %12, %14, %cst_19 {dimension_numbers = #tpu.dot_dimension_numbers<[1], [0], [0], [1], [0, 0, 1, 1], [], []>} : vector<16x114xbf16>, vector<114x128xbf16>, vector<16x128xf32> -> vector<16x128xf32>
    %16 = arith.addf %10, %15 : vector<16x128xf32>
    %c1_20 = arith.constant 1 : index
    %c0_21 = arith.constant 0 : index
    %c1_22 = arith.constant 1 : index
    %c0_23 = arith.constant 0 : index
    %17 = vector.load %arg0[%c1_20, %c0_21, %c1_22, %c0_23] : memref<2x2x19x114xbf16, #tpu.memory_space<vmem>>, vector<1x1x16x114xbf16>
    %18 = vector.shape_cast %17 : vector<1x1x16x114xbf16> to vector<16x114xbf16>
    %c3 = arith.constant 3 : index
    %c0_24 = arith.constant 0 : index
    %c0_25 = arith.constant 0 : index
    %19 = vector.load %arg1[%c3, %c0_24, %c0_25] : memref<7x114x128xbf16, #tpu.memory_space<vmem>>, vector<1x114x128xbf16>
    %20 = vector.shape_cast %19 : vector<1x114x128xbf16> to vector<114x128xbf16>
    %cst_26 = arith.constant dense<0.000000e+00> : vector<16x128xf32>
    %21 = tpu.matmul %18, %20, %cst_26 {dimension_numbers = #tpu.dot_dimension_numbers<[1], [0], [0], [1], [0, 0, 1, 1], [], []>} : vector<16x114xbf16>, vector<114x128xbf16>, vector<16x128xf32> -> vector<16x128xf32>
    %22 = arith.addf %16, %21 : vector<16x128xf32>
    %c0_27 = arith.constant 0 : index
    %c0_28 = arith.constant 0 : index
    %c2_29 = arith.constant 2 : index
    %c0_30 = arith.constant 0 : index
    %23 = vector.load %arg0[%c0_27, %c0_28, %c2_29, %c0_30] : memref<2x2x19x114xbf16, #tpu.memory_space<vmem>>, vector<1x1x16x114xbf16>
    %24 = vector.shape_cast %23 : vector<1x1x16x114xbf16> to vector<16x114xbf16>
    %c4 = arith.constant 4 : index
    %c0_31 = arith.constant 0 : index
    %c0_32 = arith.constant 0 : index
    %25 = vector.load %arg1[%c4, %c0_31, %c0_32] : memref<7x114x128xbf16, #tpu.memory_space<vmem>>, vector<1x114x128xbf16>
    %26 = vector.shape_cast %25 : vector<1x114x128xbf16> to vector<114x128xbf16>
    %cst_33 = arith.constant dense<0.000000e+00> : vector<16x128xf32>
    %27 = tpu.matmul %24, %26, %cst_33 {dimension_numbers = #tpu.dot_dimension_numbers<[1], [0], [0], [1], [0, 0, 1, 1], [], []>} : vector<16x114xbf16>, vector<114x128xbf16>, vector<16x128xf32> -> vector<16x128xf32>
    %28 = arith.addf %22, %27 : vector<16x128xf32>
    %c1_34 = arith.constant 1 : index
    %c0_35 = arith.constant 0 : index
    %c2_36 = arith.constant 2 : index
    %c0_37 = arith.constant 0 : index
    %29 = vector.load %arg0[%c1_34, %c0_35, %c2_36, %c0_37] : memref<2x2x19x114xbf16, #tpu.memory_space<vmem>>, vector<1x1x16x114xbf16>
    %30 = vector.shape_cast %29 : vector<1x1x16x114xbf16> to vector<16x114xbf16>
    %c5 = arith.constant 5 : index
    %c0_38 = arith.constant 0 : index
    %c0_39 = arith.constant 0 : index
    %31 = vector.load %arg1[%c5, %c0_38, %c0_39] : memref<7x114x128xbf16, #tpu.memory_space<vmem>>, vector<1x114x128xbf16>
    %32 = vector.shape_cast %31 : vector<1x114x128xbf16> to vector<114x128xbf16>
    %cst_40 = arith.constant dense<0.000000e+00> : vector<16x128xf32>
    %33 = tpu.matmul %30, %32, %cst_40 {dimension_numbers = #tpu.dot_dimension_numbers<[1], [0], [0], [1], [0, 0, 1, 1], [], []>} : vector<16x114xbf16>, vector<114x128xbf16>, vector<16x128xf32> -> vector<16x128xf32>
    %34 = arith.addf %28, %33 : vector<16x128xf32>
    %c0_41 = arith.constant 0 : index
    %c0_42 = arith.constant 0 : index
    %c3_43 = arith.constant 3 : index
    %c0_44 = arith.constant 0 : index
    %35 = vector.load %arg0[%c0_41, %c0_42, %c3_43, %c0_44] : memref<2x2x19x114xbf16, #tpu.memory_space<vmem>>, vector<1x1x16x114xbf16>
    %36 = vector.shape_cast %35 : vector<1x1x16x114xbf16> to vector<16x114xbf16>
    %c6 = arith.constant 6 : index
    %c0_45 = arith.constant 0 : index
    %c0_46 = arith.constant 0 : index
    %37 = vector.load %arg1[%c6, %c0_45, %c0_46] : memref<7x114x128xbf16, #tpu.memory_space<vmem>>, vector<1x114x128xbf16>
    %38 = vector.shape_cast %37 : vector<1x114x128xbf16> to vector<114x128xbf16>
    %cst_47 = arith.constant dense<0.000000e+00> : vector<16x128xf32>
    %39 = tpu.matmul %36, %38, %cst_47 {dimension_numbers = #tpu.dot_dimension_numbers<[1], [0], [0], [1], [0, 0, 1, 1], [], []>} : vector<16x114xbf16>, vector<114x128xbf16>, vector<16x128xf32> -> vector<16x128xf32>
    %40 = arith.addf %34, %39 : vector<16x128xf32>
    %c0_48 = arith.constant 0 : index
    %c0_49 = arith.constant 0 : index
    %41 = vector.load %arg2[%c0_48, %c0_49] : memref<1x128xf32, #tpu.memory_space<vmem>>, vector<1x128xf32>
    %42 = vector.broadcast %41 : vector<1x128xf32> to vector<16x128xf32>
    %43 = arith.addf %40, %42 : vector<16x128xf32>
    %cst_50 = arith.constant 0.000000e+00 : f32
    %44 = vector.broadcast %cst_50 : f32 to vector<16x128xf32>
    %45 = arith.maximumf %43, %44 : vector<16x128xf32>
    %46 = arith.truncf %45 : vector<16x128xf32> to vector<16x128xbf16>
    %c0_51 = arith.constant 0 : index
    %c0_52 = arith.constant 0 : index
    %c0_53 = arith.constant 0 : index
    %47 = vector.load %arg3[%c0_51, %c0_52, %c0_53] : memref<2x16x128xbf16, #tpu.memory_space<vmem>>, vector<1x16x128xbf16>
    %48 = vector.shape_cast %47 : vector<1x16x128xbf16> to vector<16x128xbf16>
    %49 = vector.shape_cast %46 : vector<16x128xbf16> to vector<1x16x128xbf16>
    tpu.vector_store %arg3[%c0_51, %c0_52, %c0_53], %49 {strides = array<i32>} : memref<2x16x128xbf16, #tpu.memory_space<vmem>>, vector<1x16x128xbf16>,
    %c0_54 = arith.constant 0 : index
    %c1_55 = arith.constant 1 : index
    %c0_56 = arith.constant 0 : index
    %c0_57 = arith.constant 0 : index
    %50 = vector.load %arg0[%c0_54, %c1_55, %c0_56, %c0_57] : memref<2x2x19x114xbf16, #tpu.memory_space<vmem>>, vector<1x1x16x114xbf16>
    %51 = vector.shape_cast %50 : vector<1x1x16x114xbf16> to vector<16x114xbf16>
    %c0_58 = arith.constant 0 : index
    %c0_59 = arith.constant 0 : index
    %c0_60 = arith.constant 0 : index
    %52 = vector.load %arg1[%c0_58, %c0_59, %c0_60] : memref<7x114x128xbf16, #tpu.memory_space<vmem>>, vector<1x114x128xbf16>
    %53 = vector.shape_cast %52 : vector<1x114x128xbf16> to vector<114x128xbf16>
    %cst_61 = arith.constant dense<0.000000e+00> : vector<16x128xf32>
    %54 = tpu.matmul %51, %53, %cst_61 {dimension_numbers = #tpu.dot_dimension_numbers<[1], [0], [0], [1], [0, 0, 1, 1], [], []>} : vector<16x114xbf16>, vector<114x128xbf16>, vector<16x128xf32> -> vector<16x128xf32>
    %c1_62 = arith.constant 1 : index
    %c1_63 = arith.constant 1 : index
    %c0_64 = arith.constant 0 : index
    %c0_65 = arith.constant 0 : index
    %55 = vector.load %arg0[%c1_62, %c1_63, %c0_64, %c0_65] : memref<2x2x19x114xbf16, #tpu.memory_space<vmem>>, vector<1x1x16x114xbf16>
    %56 = vector.shape_cast %55 : vector<1x1x16x114xbf16> to vector<16x114xbf16>
    %c1_66 = arith.constant 1 : index
    %c0_67 = arith.constant 0 : index
    %c0_68 = arith.constant 0 : index
    %57 = vector.load %arg1[%c1_66, %c0_67, %c0_68] : memref<7x114x128xbf16, #tpu.memory_space<vmem>>, vector<1x114x128xbf16>
    %58 = vector.shape_cast %57 : vector<1x114x128xbf16> to vector<114x128xbf16>
    %cst_69 = arith.constant dense<0.000000e+00> : vector<16x128xf32>
    %59 = tpu.matmul %56, %58, %cst_69 {dimension_numbers = #tpu.dot_dimension_numbers<[1], [0], [0], [1], [0, 0, 1, 1], [], []>} : vector<16x114xbf16>, vector<114x128xbf16>, vector<16x128xf32> -> vector<16x128xf32>
    %60 = arith.addf %54, %59 : vector<16x128xf32>
    %c0_70 = arith.constant 0 : index
    %c1_71 = arith.constant 1 : index
    %c1_72 = arith.constant 1 : index
    %c0_73 = arith.constant 0 : index
    %61 = vector.load %arg0[%c0_70, %c1_71, %c1_72, %c0_73] : memref<2x2x19x114xbf16, #tpu.memory_space<vmem>>, vector<1x1x16x114xbf16>
    %62 = vector.shape_cast %61 : vector<1x1x16x114xbf16> to vector<16x114xbf16>
    %c2_74 = arith.constant 2 : index
    %c0_75 = arith.constant 0 : index
    %c0_76 = arith.constant 0 : index
    %63 = vector.load %arg1[%c2_74, %c0_75, %c0_76] : memref<7x114x128xbf16, #tpu.memory_space<vmem>>, vector<1x114x128xbf16>
    %64 = vector.shape_cast %63 : vector<1x114x128xbf16> to vector<114x128xbf16>
    %cst_77 = arith.constant dense<0.000000e+00> : vector<16x128xf32>
    %65 = tpu.matmul %62, %64, %cst_77 {dimension_numbers = #tpu.dot_dimension_numbers<[1], [0], [0], [1], [0, 0, 1, 1], [], []>} : vector<16x114xbf16>, vector<114x128xbf16>, vector<16x128xf32> -> vector<16x128xf32>
    %66 = arith.addf %60, %65 : vector<16x128xf32>
    %c1_78 = arith.constant 1 : index
    %c1_79 = arith.constant 1 : index
    %c1_80 = arith.constant 1 : index
    %c0_81 = arith.constant 0 : index
    %67 = vector.load %arg0[%c1_78, %c1_79, %c1_80, %c0_81] : memref<2x2x19x114xbf16, #tpu.memory_space<vmem>>, vector<1x1x16x114xbf16>
    %68 = vector.shape_cast %67 : vector<1x1x16x114xbf16> to vector<16x114xbf16>
    %c3_82 = arith.constant 3 : index
    %c0_83 = arith.constant 0 : index
    %c0_84 = arith.constant 0 : index
    %69 = vector.load %arg1[%c3_82, %c0_83, %c0_84] : memref<7x114x128xbf16, #tpu.memory_space<vmem>>, vector<1x114x128xbf16>
    %70 = vector.shape_cast %69 : vector<1x114x128xbf16> to vector<114x128xbf16>
    %cst_85 = arith.constant dense<0.000000e+00> : vector<16x128xf32>
    %71 = tpu.matmul %68, %70, %cst_85 {dimension_numbers = #tpu.dot_dimension_numbers<[1], [0], [0], [1], [0, 0, 1, 1], [], []>} : vector<16x114xbf16>, vector<114x128xbf16>, vector<16x128xf32> -> vector<16x128xf32>
    %72 = arith.addf %66, %71 : vector<16x128xf32>
    %c0_86 = arith.constant 0 : index
    %c1_87 = arith.constant 1 : index
    %c2_88 = arith.constant 2 : index
    %c0_89 = arith.constant 0 : index
    %73 = vector.load %arg0[%c0_86, %c1_87, %c2_88, %c0_89] : memref<2x2x19x114xbf16, #tpu.memory_space<vmem>>, vector<1x1x16x114xbf16>
    %74 = vector.shape_cast %73 : vector<1x1x16x114xbf16> to vector<16x114xbf16>
    %c4_90 = arith.constant 4 : index
    %c0_91 = arith.constant 0 : index
    %c0_92 = arith.constant 0 : index
    %75 = vector.load %arg1[%c4_90, %c0_91, %c0_92] : memref<7x114x128xbf16, #tpu.memory_space<vmem>>, vector<1x114x128xbf16>
    %76 = vector.shape_cast %75 : vector<1x114x128xbf16> to vector<114x128xbf16>
    %cst_93 = arith.constant dense<0.000000e+00> : vector<16x128xf32>
    %77 = tpu.matmul %74, %76, %cst_93 {dimension_numbers = #tpu.dot_dimension_numbers<[1], [0], [0], [1], [0, 0, 1, 1], [], []>} : vector<16x114xbf16>, vector<114x128xbf16>, vector<16x128xf32> -> vector<16x128xf32>
    %78 = arith.addf %72, %77 : vector<16x128xf32>
    %c1_94 = arith.constant 1 : index
    %c1_95 = arith.constant 1 : index
    %c2_96 = arith.constant 2 : index
    %c0_97 = arith.constant 0 : index
    %79 = vector.load %arg0[%c1_94, %c1_95, %c2_96, %c0_97] : memref<2x2x19x114xbf16, #tpu.memory_space<vmem>>, vector<1x1x16x114xbf16>
    %80 = vector.shape_cast %79 : vector<1x1x16x114xbf16> to vector<16x114xbf16>
    %c5_98 = arith.constant 5 : index
    %c0_99 = arith.constant 0 : index
    %c0_100 = arith.constant 0 : index
    %81 = vector.load %arg1[%c5_98, %c0_99, %c0_100] : memref<7x114x128xbf16, #tpu.memory_space<vmem>>, vector<1x114x128xbf16>
    %82 = vector.shape_cast %81 : vector<1x114x128xbf16> to vector<114x128xbf16>
    %cst_101 = arith.constant dense<0.000000e+00> : vector<16x128xf32>
    %83 = tpu.matmul %80, %82, %cst_101 {dimension_numbers = #tpu.dot_dimension_numbers<[1], [0], [0], [1], [0, 0, 1, 1], [], []>} : vector<16x114xbf16>, vector<114x128xbf16>, vector<16x128xf32> -> vector<16x128xf32>
    %84 = arith.addf %78, %83 : vector<16x128xf32>
    %c0_102 = arith.constant 0 : index
    %c1_103 = arith.constant 1 : index
    %c3_104 = arith.constant 3 : index
    %c0_105 = arith.constant 0 : index
    %85 = vector.load %arg0[%c0_102, %c1_103, %c3_104, %c0_105] : memref<2x2x19x114xbf16, #tpu.memory_space<vmem>>, vector<1x1x16x114xbf16>
    %86 = vector.shape_cast %85 : vector<1x1x16x114xbf16> to vector<16x114xbf16>
    %c6_106 = arith.constant 6 : index
    %c0_107 = arith.constant 0 : index
    %c0_108 = arith.constant 0 : index
    %87 = vector.load %arg1[%c6_106, %c0_107, %c0_108] : memref<7x114x128xbf16, #tpu.memory_space<vmem>>, vector<1x114x128xbf16>
    %88 = vector.shape_cast %87 : vector<1x114x128xbf16> to vector<114x128xbf16>
    %cst_109 = arith.constant dense<0.000000e+00> : vector<16x128xf32>
    %89 = tpu.matmul %86, %88, %cst_109 {dimension_numbers = #tpu.dot_dimension_numbers<[1], [0], [0], [1], [0, 0, 1, 1], [], []>} : vector<16x114xbf16>, vector<114x128xbf16>, vector<16x128xf32> -> vector<16x128xf32>
    %90 = arith.addf %84, %89 : vector<16x128xf32>
    %c0_110 = arith.constant 0 : index
    %c0_111 = arith.constant 0 : index
    %91 = vector.load %arg2[%c0_110, %c0_111] : memref<1x128xf32, #tpu.memory_space<vmem>>, vector<1x128xf32>
    %92 = vector.broadcast %91 : vector<1x128xf32> to vector<16x128xf32>
    %93 = arith.addf %90, %92 : vector<16x128xf32>
    %cst_112 = arith.constant 0.000000e+00 : f32
    %94 = vector.broadcast %cst_112 : f32 to vector<16x128xf32>
    %95 = arith.maximumf %93, %94 : vector<16x128xf32>
    %96 = arith.truncf %95 : vector<16x128xf32> to vector<16x128xbf16>
    %c1_113 = arith.constant 1 : index
    %c0_114 = arith.constant 0 : index
    %c0_115 = arith.constant 0 : index
    %97 = vector.load %arg3[%c1_113, %c0_114, %c0_115] : memref<2x16x128xbf16, #tpu.memory_space<vmem>>, vector<1x16x128xbf16>
    %98 = vector.shape_cast %97 : vector<1x16x128xbf16> to vector<16x128xbf16>
    %99 = vector.shape_cast %96 : vector<16x128xbf16> to vector<1x16x128xbf16>
    tpu.vector_store %arg3[%c1_113, %c0_114, %c0_115], %99 {strides = array<i32>} : memref<2x16x128xbf16, #tpu.memory_space<vmem>>, vector<1x16x128xbf16>,
    return
  }
}

module attributes {stable_mosaic.version = 11 : i64} {
  func.func @_maxpool_kernel(%arg0: memref<2x2x2x9x72xbf16, #tpu.memory_space<vmem>>, %arg1: memref<2x8x64xbf16, #tpu.memory_space<vmem>>) attributes {dimension_semantics = [], scalar_prefetch = 0 : i64, scratch_operands = 0 : i64, tpu.core_type = #tpu.core_type<tc>} {
    %c0 = arith.constant 0 : index
    %c0_0 = arith.constant 0 : index
    %c0_1 = arith.constant 0 : index
    %c0_2 = arith.constant 0 : index
    %c0_3 = arith.constant 0 : index
    %0 = vector.load %arg0[%c0, %c0_0, %c0_1, %c0_2, %c0_3] : memref<2x2x2x9x72xbf16, #tpu.memory_space<vmem>>, vector<1x1x2x8x64xbf16>
    %1 = vector.shape_cast %0 : vector<1x1x2x8x64xbf16> to vector<2x8x64xbf16>
    %c0_4 = arith.constant 0 : index
    %c1 = arith.constant 1 : index
    %c0_5 = arith.constant 0 : index
    %c0_6 = arith.constant 0 : index
    %c0_7 = arith.constant 0 : index
    %2 = vector.load %arg0[%c0_4, %c1, %c0_5, %c0_6, %c0_7] : memref<2x2x2x9x72xbf16, #tpu.memory_space<vmem>>, vector<1x1x2x8x64xbf16>
    %3 = vector.shape_cast %2 : vector<1x1x2x8x64xbf16> to vector<2x8x64xbf16>
    %4 = arith.maximumf %1, %3 : vector<2x8x64xbf16>
    %c0_8 = arith.constant 0 : index
    %c0_9 = arith.constant 0 : index
    %c0_10 = arith.constant 0 : index
    %c0_11 = arith.constant 0 : index
    %c8 = arith.constant 8 : index
    %5 = vector.load %arg0[%c0_8, %c0_9, %c0_10, %c0_11, %c8] : memref<2x2x2x9x72xbf16, #tpu.memory_space<vmem>>, vector<1x1x2x8x64xbf16>
    %6 = vector.shape_cast %5 : vector<1x1x2x8x64xbf16> to vector<2x8x64xbf16>
    %7 = arith.maximumf %4, %6 : vector<2x8x64xbf16>
    %c1_12 = arith.constant 1 : index
    %c0_13 = arith.constant 0 : index
    %c0_14 = arith.constant 0 : index
    %c0_15 = arith.constant 0 : index
    %c0_16 = arith.constant 0 : index
    %8 = vector.load %arg0[%c1_12, %c0_13, %c0_14, %c0_15, %c0_16] : memref<2x2x2x9x72xbf16, #tpu.memory_space<vmem>>, vector<1x1x2x8x64xbf16>
    %9 = vector.shape_cast %8 : vector<1x1x2x8x64xbf16> to vector<2x8x64xbf16>
    %10 = arith.maximumf %7, %9 : vector<2x8x64xbf16>
    %c1_17 = arith.constant 1 : index
    %c1_18 = arith.constant 1 : index
    %c0_19 = arith.constant 0 : index
    %c0_20 = arith.constant 0 : index
    %c0_21 = arith.constant 0 : index
    %11 = vector.load %arg0[%c1_17, %c1_18, %c0_19, %c0_20, %c0_21] : memref<2x2x2x9x72xbf16, #tpu.memory_space<vmem>>, vector<1x1x2x8x64xbf16>
    %12 = vector.shape_cast %11 : vector<1x1x2x8x64xbf16> to vector<2x8x64xbf16>
    %13 = arith.maximumf %10, %12 : vector<2x8x64xbf16>
    %c1_22 = arith.constant 1 : index
    %c0_23 = arith.constant 0 : index
    %c0_24 = arith.constant 0 : index
    %c0_25 = arith.constant 0 : index
    %c8_26 = arith.constant 8 : index
    %14 = vector.load %arg0[%c1_22, %c0_23, %c0_24, %c0_25, %c8_26] : memref<2x2x2x9x72xbf16, #tpu.memory_space<vmem>>, vector<1x1x2x8x64xbf16>
    %15 = vector.shape_cast %14 : vector<1x1x2x8x64xbf16> to vector<2x8x64xbf16>
    %16 = arith.maximumf %13, %15 : vector<2x8x64xbf16>
    %c0_27 = arith.constant 0 : index
    %c0_28 = arith.constant 0 : index
    %c0_29 = arith.constant 0 : index
    %c1_30 = arith.constant 1 : index
    %c0_31 = arith.constant 0 : index
    %17 = vector.load %arg0[%c0_27, %c0_28, %c0_29, %c1_30, %c0_31] : memref<2x2x2x9x72xbf16, #tpu.memory_space<vmem>>, vector<1x1x2x8x64xbf16>
    %18 = vector.shape_cast %17 : vector<1x1x2x8x64xbf16> to vector<2x8x64xbf16>
    %19 = arith.maximumf %16, %18 : vector<2x8x64xbf16>
    %c0_32 = arith.constant 0 : index
    %c1_33 = arith.constant 1 : index
    %c0_34 = arith.constant 0 : index
    %c1_35 = arith.constant 1 : index
    %c0_36 = arith.constant 0 : index
    %20 = vector.load %arg0[%c0_32, %c1_33, %c0_34, %c1_35, %c0_36] : memref<2x2x2x9x72xbf16, #tpu.memory_space<vmem>>, vector<1x1x2x8x64xbf16>
    %21 = vector.shape_cast %20 : vector<1x1x2x8x64xbf16> to vector<2x8x64xbf16>
    %22 = arith.maximumf %19, %21 : vector<2x8x64xbf16>
    %c0_37 = arith.constant 0 : index
    %c0_38 = arith.constant 0 : index
    %c0_39 = arith.constant 0 : index
    %c1_40 = arith.constant 1 : index
    %c8_41 = arith.constant 8 : index
    %23 = vector.load %arg0[%c0_37, %c0_38, %c0_39, %c1_40, %c8_41] : memref<2x2x2x9x72xbf16, #tpu.memory_space<vmem>>, vector<1x1x2x8x64xbf16>
    %24 = vector.shape_cast %23 : vector<1x1x2x8x64xbf16> to vector<2x8x64xbf16>
    %25 = arith.maximumf %22, %24 : vector<2x8x64xbf16>
    %c0_42 = arith.constant 0 : index
    %c0_43 = arith.constant 0 : index
    %c0_44 = arith.constant 0 : index
    %26 = vector.load %arg1[%c0_42, %c0_43, %c0_44] : memref<2x8x64xbf16, #tpu.memory_space<vmem>>, vector<2x8x64xbf16>
    tpu.vector_store %arg1[%c0_42, %c0_43, %c0_44], %25 {strides = array<i32>} : memref<2x8x64xbf16, #tpu.memory_space<vmem>>, vector<2x8x64xbf16>,
    return
  }
}

module attributes {stable_mosaic.version = 11 : i64} {
  func.func @_fused_conv_kernel(%arg0: memref<1x2x10x80xbf16, #tpu.memory_space<vmem>>, %arg1: memref<3x80x64xbf16, #tpu.memory_space<vmem>>, %arg2: memref<1x64xf32, #tpu.memory_space<vmem>>, %arg3: memref<2x8x64xbf16, #tpu.memory_space<vmem>>) attributes {dimension_semantics = [], scalar_prefetch = 0 : i64, scratch_operands = 0 : i64, tpu.core_type = #tpu.core_type<tc>} {
    %c0 = arith.constant 0 : index
    %c0_0 = arith.constant 0 : index
    %c0_1 = arith.constant 0 : index
    %c0_2 = arith.constant 0 : index
    %0 = vector.load %arg0[%c0, %c0_0, %c0_1, %c0_2] : memref<1x2x10x80xbf16, #tpu.memory_space<vmem>>, vector<1x1x8x80xbf16>
    %1 = vector.shape_cast %0 : vector<1x1x8x80xbf16> to vector<8x80xbf16>
    %c0_3 = arith.constant 0 : index
    %c0_4 = arith.constant 0 : index
    %c0_5 = arith.constant 0 : index
    %2 = vector.load %arg1[%c0_3, %c0_4, %c0_5] : memref<3x80x64xbf16, #tpu.memory_space<vmem>>, vector<1x80x64xbf16>
    %3 = vector.shape_cast %2 : vector<1x80x64xbf16> to vector<80x64xbf16>
    %cst = arith.constant dense<0.000000e+00> : vector<8x64xf32>
    %4 = tpu.matmul %1, %3, %cst {dimension_numbers = #tpu.dot_dimension_numbers<[1], [0], [0], [1], [0, 0, 1, 1], [], []>} : vector<8x80xbf16>, vector<80x64xbf16>, vector<8x64xf32> -> vector<8x64xf32>
    %c0_6 = arith.constant 0 : index
    %c0_7 = arith.constant 0 : index
    %c1 = arith.constant 1 : index
    %c0_8 = arith.constant 0 : index
    %5 = vector.load %arg0[%c0_6, %c0_7, %c1, %c0_8] : memref<1x2x10x80xbf16, #tpu.memory_space<vmem>>, vector<1x1x8x80xbf16>
    %6 = vector.shape_cast %5 : vector<1x1x8x80xbf16> to vector<8x80xbf16>
    %c1_9 = arith.constant 1 : index
    %c0_10 = arith.constant 0 : index
    %c0_11 = arith.constant 0 : index
    %7 = vector.load %arg1[%c1_9, %c0_10, %c0_11] : memref<3x80x64xbf16, #tpu.memory_space<vmem>>, vector<1x80x64xbf16>
    %8 = vector.shape_cast %7 : vector<1x80x64xbf16> to vector<80x64xbf16>
    %cst_12 = arith.constant dense<0.000000e+00> : vector<8x64xf32>
    %9 = tpu.matmul %6, %8, %cst_12 {dimension_numbers = #tpu.dot_dimension_numbers<[1], [0], [0], [1], [0, 0, 1, 1], [], []>} : vector<8x80xbf16>, vector<80x64xbf16>, vector<8x64xf32> -> vector<8x64xf32>
    %10 = arith.addf %4, %9 : vector<8x64xf32>
    %c0_13 = arith.constant 0 : index
    %c0_14 = arith.constant 0 : index
    %c2 = arith.constant 2 : index
    %c0_15 = arith.constant 0 : index
    %11 = vector.load %arg0[%c0_13, %c0_14, %c2, %c0_15] : memref<1x2x10x80xbf16, #tpu.memory_space<vmem>>, vector<1x1x8x80xbf16>
    %12 = vector.shape_cast %11 : vector<1x1x8x80xbf16> to vector<8x80xbf16>
    %c2_16 = arith.constant 2 : index
    %c0_17 = arith.constant 0 : index
    %c0_18 = arith.constant 0 : index
    %13 = vector.load %arg1[%c2_16, %c0_17, %c0_18] : memref<3x80x64xbf16, #tpu.memory_space<vmem>>, vector<1x80x64xbf16>
    %14 = vector.shape_cast %13 : vector<1x80x64xbf16> to vector<80x64xbf16>
    %cst_19 = arith.constant dense<0.000000e+00> : vector<8x64xf32>
    %15 = tpu.matmul %12, %14, %cst_19 {dimension_numbers = #tpu.dot_dimension_numbers<[1], [0], [0], [1], [0, 0, 1, 1], [], []>} : vector<8x80xbf16>, vector<80x64xbf16>, vector<8x64xf32> -> vector<8x64xf32>
    %16 = arith.addf %10, %15 : vector<8x64xf32>
    %c0_20 = arith.constant 0 : index
    %c0_21 = arith.constant 0 : index
    %17 = vector.load %arg2[%c0_20, %c0_21] : memref<1x64xf32, #tpu.memory_space<vmem>>, vector<1x64xf32>
    %18 = vector.broadcast %17 : vector<1x64xf32> to vector<8x64xf32>
    %19 = arith.addf %16, %18 : vector<8x64xf32>
    %cst_22 = arith.constant 0.000000e+00 : f32
    %20 = vector.broadcast %cst_22 : f32 to vector<8x64xf32>
    %21 = arith.maximumf %19, %20 : vector<8x64xf32>
    %22 = arith.truncf %21 : vector<8x64xf32> to vector<8x64xbf16>
    %c0_23 = arith.constant 0 : index
    %c0_24 = arith.constant 0 : index
    %c0_25 = arith.constant 0 : index
    %23 = vector.load %arg3[%c0_23, %c0_24, %c0_25] : memref<2x8x64xbf16, #tpu.memory_space<vmem>>, vector<1x8x64xbf16>
    %24 = vector.shape_cast %23 : vector<1x8x64xbf16> to vector<8x64xbf16>
    %25 = vector.shape_cast %22 : vector<8x64xbf16> to vector<1x8x64xbf16>
    tpu.vector_store %arg3[%c0_23, %c0_24, %c0_25], %25 {strides = array<i32>} : memref<2x8x64xbf16, #tpu.memory_space<vmem>>, vector<1x8x64xbf16>,
    %c0_26 = arith.constant 0 : index
    %c1_27 = arith.constant 1 : index
    %c0_28 = arith.constant 0 : index
    %c0_29 = arith.constant 0 : index
    %26 = vector.load %arg0[%c0_26, %c1_27, %c0_28, %c0_29] : memref<1x2x10x80xbf16, #tpu.memory_space<vmem>>, vector<1x1x8x80xbf16>
    %27 = vector.shape_cast %26 : vector<1x1x8x80xbf16> to vector<8x80xbf16>
    %c0_30 = arith.constant 0 : index
    %c0_31 = arith.constant 0 : index
    %c0_32 = arith.constant 0 : index
    %28 = vector.load %arg1[%c0_30, %c0_31, %c0_32] : memref<3x80x64xbf16, #tpu.memory_space<vmem>>, vector<1x80x64xbf16>
    %29 = vector.shape_cast %28 : vector<1x80x64xbf16> to vector<80x64xbf16>
    %cst_33 = arith.constant dense<0.000000e+00> : vector<8x64xf32>
    %30 = tpu.matmul %27, %29, %cst_33 {dimension_numbers = #tpu.dot_dimension_numbers<[1], [0], [0], [1], [0, 0, 1, 1], [], []>} : vector<8x80xbf16>, vector<80x64xbf16>, vector<8x64xf32> -> vector<8x64xf32>
    %c0_34 = arith.constant 0 : index
    %c1_35 = arith.constant 1 : index
    %c1_36 = arith.constant 1 : index
    %c0_37 = arith.constant 0 : index
    %31 = vector.load %arg0[%c0_34, %c1_35, %c1_36, %c0_37] : memref<1x2x10x80xbf16, #tpu.memory_space<vmem>>, vector<1x1x8x80xbf16>
    %32 = vector.shape_cast %31 : vector<1x1x8x80xbf16> to vector<8x80xbf16>
    %c1_38 = arith.constant 1 : index
    %c0_39 = arith.constant 0 : index
    %c0_40 = arith.constant 0 : index
    %33 = vector.load %arg1[%c1_38, %c0_39, %c0_40] : memref<3x80x64xbf16, #tpu.memory_space<vmem>>, vector<1x80x64xbf16>
    %34 = vector.shape_cast %33 : vector<1x80x64xbf16> to vector<80x64xbf16>
    %cst_41 = arith.constant dense<0.000000e+00> : vector<8x64xf32>
    %35 = tpu.matmul %32, %34, %cst_41 {dimension_numbers = #tpu.dot_dimension_numbers<[1], [0], [0], [1], [0, 0, 1, 1], [], []>} : vector<8x80xbf16>, vector<80x64xbf16>, vector<8x64xf32> -> vector<8x64xf32>
    %36 = arith.addf %30, %35 : vector<8x64xf32>
    %c0_42 = arith.constant 0 : index
    %c1_43 = arith.constant 1 : index
    %c2_44 = arith.constant 2 : index
    %c0_45 = arith.constant 0 : index
    %37 = vector.load %arg0[%c0_42, %c1_43, %c2_44, %c0_45] : memref<1x2x10x80xbf16, #tpu.memory_space<vmem>>, vector<1x1x8x80xbf16>
    %38 = vector.shape_cast %37 : vector<1x1x8x80xbf16> to vector<8x80xbf16>
    %c2_46 = arith.constant 2 : index
    %c0_47 = arith.constant 0 : index
    %c0_48 = arith.constant 0 : index
    %39 = vector.load %arg1[%c2_46, %c0_47, %c0_48] : memref<3x80x64xbf16, #tpu.memory_space<vmem>>, vector<1x80x64xbf16>
    %40 = vector.shape_cast %39 : vector<1x80x64xbf16> to vector<80x64xbf16>
    %cst_49 = arith.constant dense<0.000000e+00> : vector<8x64xf32>
    %41 = tpu.matmul %38, %40, %cst_49 {dimension_numbers = #tpu.dot_dimension_numbers<[1], [0], [0], [1], [0, 0, 1, 1], [], []>} : vector<8x80xbf16>, vector<80x64xbf16>, vector<8x64xf32> -> vector<8x64xf32>
    %42 = arith.addf %36, %41 : vector<8x64xf32>
    %c0_50 = arith.constant 0 : index
    %c0_51 = arith.constant 0 : index
    %43 = vector.load %arg2[%c0_50, %c0_51] : memref<1x64xf32, #tpu.memory_space<vmem>>, vector<1x64xf32>
    %44 = vector.broadcast %43 : vector<1x64xf32> to vector<8x64xf32>
    %45 = arith.addf %42, %44 : vector<8x64xf32>
    %cst_52 = arith.constant 0.000000e+00 : f32
    %46 = vector.broadcast %cst_52 : f32 to vector<8x64xf32>
    %47 = arith.maximumf %45, %46 : vector<8x64xf32>
    %48 = arith.truncf %47 : vector<8x64xf32> to vector<8x64xbf16>
    %c1_53 = arith.constant 1 : index
    %c0_54 = arith.constant 0 : index
    %c0_55 = arith.constant 0 : index
    %49 = vector.load %arg3[%c1_53, %c0_54, %c0_55] : memref<2x8x64xbf16, #tpu.memory_space<vmem>>, vector<1x8x64xbf16>
    %50 = vector.shape_cast %49 : vector<1x8x64xbf16> to vector<8x64xbf16>
    %51 = vector.shape_cast %48 : vector<8x64xbf16> to vector<1x8x64xbf16>
    tpu.vector_store %arg3[%c1_53, %c0_54, %c0_55], %51 {strides = array<i32>} : memref<2x8x64xbf16, #tpu.memory_space<vmem>>, vector<1x8x64xbf16>,
    return
  }
}

module attributes {stable_mosaic.version = 11 : i64} {
  func.func @_fused_conv_kernel(%arg0: memref<1x2x10x80xbf16, #tpu.memory_space<vmem>>, %arg1: memref<3x80x64xbf16, #tpu.memory_space<vmem>>, %arg2: memref<1x64xf32, #tpu.memory_space<vmem>>, %arg3: memref<2x8x64xbf16, #tpu.memory_space<vmem>>, %arg4: memref<2x8x64xbf16, #tpu.memory_space<vmem>>) attributes {dimension_semantics = [], scalar_prefetch = 0 : i64, scratch_operands = 0 : i64, tpu.core_type = #tpu.core_type<tc>} {
    %c0 = arith.constant 0 : index
    %c0_0 = arith.constant 0 : index
    %c0_1 = arith.constant 0 : index
    %c0_2 = arith.constant 0 : index
    %0 = vector.load %arg0[%c0, %c0_0, %c0_1, %c0_2] : memref<1x2x10x80xbf16, #tpu.memory_space<vmem>>, vector<1x1x8x80xbf16>
    %1 = vector.shape_cast %0 : vector<1x1x8x80xbf16> to vector<8x80xbf16>
    %c0_3 = arith.constant 0 : index
    %c0_4 = arith.constant 0 : index
    %c0_5 = arith.constant 0 : index
    %2 = vector.load %arg1[%c0_3, %c0_4, %c0_5] : memref<3x80x64xbf16, #tpu.memory_space<vmem>>, vector<1x80x64xbf16>
    %3 = vector.shape_cast %2 : vector<1x80x64xbf16> to vector<80x64xbf16>
    %cst = arith.constant dense<0.000000e+00> : vector<8x64xf32>
    %4 = tpu.matmul %1, %3, %cst {dimension_numbers = #tpu.dot_dimension_numbers<[1], [0], [0], [1], [0, 0, 1, 1], [], []>} : vector<8x80xbf16>, vector<80x64xbf16>, vector<8x64xf32> -> vector<8x64xf32>
    %c0_6 = arith.constant 0 : index
    %c0_7 = arith.constant 0 : index
    %c1 = arith.constant 1 : index
    %c0_8 = arith.constant 0 : index
    %5 = vector.load %arg0[%c0_6, %c0_7, %c1, %c0_8] : memref<1x2x10x80xbf16, #tpu.memory_space<vmem>>, vector<1x1x8x80xbf16>
    %6 = vector.shape_cast %5 : vector<1x1x8x80xbf16> to vector<8x80xbf16>
    %c1_9 = arith.constant 1 : index
    %c0_10 = arith.constant 0 : index
    %c0_11 = arith.constant 0 : index
    %7 = vector.load %arg1[%c1_9, %c0_10, %c0_11] : memref<3x80x64xbf16, #tpu.memory_space<vmem>>, vector<1x80x64xbf16>
    %8 = vector.shape_cast %7 : vector<1x80x64xbf16> to vector<80x64xbf16>
    %cst_12 = arith.constant dense<0.000000e+00> : vector<8x64xf32>
    %9 = tpu.matmul %6, %8, %cst_12 {dimension_numbers = #tpu.dot_dimension_numbers<[1], [0], [0], [1], [0, 0, 1, 1], [], []>} : vector<8x80xbf16>, vector<80x64xbf16>, vector<8x64xf32> -> vector<8x64xf32>
    %10 = arith.addf %4, %9 : vector<8x64xf32>
    %c0_13 = arith.constant 0 : index
    %c0_14 = arith.constant 0 : index
    %c2 = arith.constant 2 : index
    %c0_15 = arith.constant 0 : index
    %11 = vector.load %arg0[%c0_13, %c0_14, %c2, %c0_15] : memref<1x2x10x80xbf16, #tpu.memory_space<vmem>>, vector<1x1x8x80xbf16>
    %12 = vector.shape_cast %11 : vector<1x1x8x80xbf16> to vector<8x80xbf16>
    %c2_16 = arith.constant 2 : index
    %c0_17 = arith.constant 0 : index
    %c0_18 = arith.constant 0 : index
    %13 = vector.load %arg1[%c2_16, %c0_17, %c0_18] : memref<3x80x64xbf16, #tpu.memory_space<vmem>>, vector<1x80x64xbf16>
    %14 = vector.shape_cast %13 : vector<1x80x64xbf16> to vector<80x64xbf16>
    %cst_19 = arith.constant dense<0.000000e+00> : vector<8x64xf32>
    %15 = tpu.matmul %12, %14, %cst_19 {dimension_numbers = #tpu.dot_dimension_numbers<[1], [0], [0], [1], [0, 0, 1, 1], [], []>} : vector<8x80xbf16>, vector<80x64xbf16>, vector<8x64xf32> -> vector<8x64xf32>
    %16 = arith.addf %10, %15 : vector<8x64xf32>
    %c0_20 = arith.constant 0 : index
    %c0_21 = arith.constant 0 : index
    %17 = vector.load %arg2[%c0_20, %c0_21] : memref<1x64xf32, #tpu.memory_space<vmem>>, vector<1x64xf32>
    %18 = vector.broadcast %17 : vector<1x64xf32> to vector<8x64xf32>
    %19 = arith.addf %16, %18 : vector<8x64xf32>
    %c0_22 = arith.constant 0 : index
    %c0_23 = arith.constant 0 : index
    %c0_24 = arith.constant 0 : index
    %20 = vector.load %arg3[%c0_22, %c0_23, %c0_24] : memref<2x8x64xbf16, #tpu.memory_space<vmem>>, vector<1x8x64xbf16>
    %21 = vector.shape_cast %20 : vector<1x8x64xbf16> to vector<8x64xbf16>
    %22 = arith.extf %21 : vector<8x64xbf16> to vector<8x64xf32>
    %23 = arith.addf %19, %22 : vector<8x64xf32>
    %cst_25 = arith.constant 0.000000e+00 : f32
    %24 = vector.broadcast %cst_25 : f32 to vector<8x64xf32>
    %25 = arith.maximumf %23, %24 : vector<8x64xf32>
    %26 = arith.truncf %25 : vector<8x64xf32> to vector<8x64xbf16>
    %c0_26 = arith.constant 0 : index
    %c0_27 = arith.constant 0 : index
    %c0_28 = arith.constant 0 : index
    %27 = vector.load %arg4[%c0_26, %c0_27, %c0_28] : memref<2x8x64xbf16, #tpu.memory_space<vmem>>, vector<1x8x64xbf16>
    %28 = vector.shape_cast %27 : vector<1x8x64xbf16> to vector<8x64xbf16>
    %29 = vector.shape_cast %26 : vector<8x64xbf16> to vector<1x8x64xbf16>
    tpu.vector_store %arg4[%c0_26, %c0_27, %c0_28], %29 {strides = array<i32>} : memref<2x8x64xbf16, #tpu.memory_space<vmem>>, vector<1x8x64xbf16>,
    %c0_29 = arith.constant 0 : index
    %c1_30 = arith.constant 1 : index
    %c0_31 = arith.constant 0 : index
    %c0_32 = arith.constant 0 : index
    %30 = vector.load %arg0[%c0_29, %c1_30, %c0_31, %c0_32] : memref<1x2x10x80xbf16, #tpu.memory_space<vmem>>, vector<1x1x8x80xbf16>
    %31 = vector.shape_cast %30 : vector<1x1x8x80xbf16> to vector<8x80xbf16>
    %c0_33 = arith.constant 0 : index
    %c0_34 = arith.constant 0 : index
    %c0_35 = arith.constant 0 : index
    %32 = vector.load %arg1[%c0_33, %c0_34, %c0_35] : memref<3x80x64xbf16, #tpu.memory_space<vmem>>, vector<1x80x64xbf16>
    %33 = vector.shape_cast %32 : vector<1x80x64xbf16> to vector<80x64xbf16>
    %cst_36 = arith.constant dense<0.000000e+00> : vector<8x64xf32>
    %34 = tpu.matmul %31, %33, %cst_36 {dimension_numbers = #tpu.dot_dimension_numbers<[1], [0], [0], [1], [0, 0, 1, 1], [], []>} : vector<8x80xbf16>, vector<80x64xbf16>, vector<8x64xf32> -> vector<8x64xf32>
    %c0_37 = arith.constant 0 : index
    %c1_38 = arith.constant 1 : index
    %c1_39 = arith.constant 1 : index
    %c0_40 = arith.constant 0 : index
    %35 = vector.load %arg0[%c0_37, %c1_38, %c1_39, %c0_40] : memref<1x2x10x80xbf16, #tpu.memory_space<vmem>>, vector<1x1x8x80xbf16>
    %36 = vector.shape_cast %35 : vector<1x1x8x80xbf16> to vector<8x80xbf16>
    %c1_41 = arith.constant 1 : index
    %c0_42 = arith.constant 0 : index
    %c0_43 = arith.constant 0 : index
    %37 = vector.load %arg1[%c1_41, %c0_42, %c0_43] : memref<3x80x64xbf16, #tpu.memory_space<vmem>>, vector<1x80x64xbf16>
    %38 = vector.shape_cast %37 : vector<1x80x64xbf16> to vector<80x64xbf16>
    %cst_44 = arith.constant dense<0.000000e+00> : vector<8x64xf32>
    %39 = tpu.matmul %36, %38, %cst_44 {dimension_numbers = #tpu.dot_dimension_numbers<[1], [0], [0], [1], [0, 0, 1, 1], [], []>} : vector<8x80xbf16>, vector<80x64xbf16>, vector<8x64xf32> -> vector<8x64xf32>
    %40 = arith.addf %34, %39 : vector<8x64xf32>
    %c0_45 = arith.constant 0 : index
    %c1_46 = arith.constant 1 : index
    %c2_47 = arith.constant 2 : index
    %c0_48 = arith.constant 0 : index
    %41 = vector.load %arg0[%c0_45, %c1_46, %c2_47, %c0_48] : memref<1x2x10x80xbf16, #tpu.memory_space<vmem>>, vector<1x1x8x80xbf16>
    %42 = vector.shape_cast %41 : vector<1x1x8x80xbf16> to vector<8x80xbf16>
    %c2_49 = arith.constant 2 : index
    %c0_50 = arith.constant 0 : index
    %c0_51 = arith.constant 0 : index
    %43 = vector.load %arg1[%c2_49, %c0_50, %c0_51] : memref<3x80x64xbf16, #tpu.memory_space<vmem>>, vector<1x80x64xbf16>
    %44 = vector.shape_cast %43 : vector<1x80x64xbf16> to vector<80x64xbf16>
    %cst_52 = arith.constant dense<0.000000e+00> : vector<8x64xf32>
    %45 = tpu.matmul %42, %44, %cst_52 {dimension_numbers = #tpu.dot_dimension_numbers<[1], [0], [0], [1], [0, 0, 1, 1], [], []>} : vector<8x80xbf16>, vector<80x64xbf16>, vector<8x64xf32> -> vector<8x64xf32>
    %46 = arith.addf %40, %45 : vector<8x64xf32>
    %c0_53 = arith.constant 0 : index
    %c0_54 = arith.constant 0 : index
    %47 = vector.load %arg2[%c0_53, %c0_54] : memref<1x64xf32, #tpu.memory_space<vmem>>, vector<1x64xf32>
    %48 = vector.broadcast %47 : vector<1x64xf32> to vector<8x64xf32>
    %49 = arith.addf %46, %48 : vector<8x64xf32>
    %c1_55 = arith.constant 1 : index
    %c0_56 = arith.constant 0 : index
    %c0_57 = arith.constant 0 : index
    %50 = vector.load %arg3[%c1_55, %c0_56, %c0_57] : memref<2x8x64xbf16, #tpu.memory_space<vmem>>, vector<1x8x64xbf16>
    %51 = vector.shape_cast %50 : vector<1x8x64xbf16> to vector<8x64xbf16>
    %52 = arith.extf %51 : vector<8x64xbf16> to vector<8x64xf32>
    %53 = arith.addf %49, %52 : vector<8x64xf32>
    %cst_58 = arith.constant 0.000000e+00 : f32
    %54 = vector.broadcast %cst_58 : f32 to vector<8x64xf32>
    %55 = arith.maximumf %53, %54 : vector<8x64xf32>
    %56 = arith.truncf %55 : vector<8x64xf32> to vector<8x64xbf16>
    %c1_59 = arith.constant 1 : index
    %c0_60 = arith.constant 0 : index
    %c0_61 = arith.constant 0 : index
    %57 = vector.load %arg4[%c1_59, %c0_60, %c0_61] : memref<2x8x64xbf16, #tpu.memory_space<vmem>>, vector<1x8x64xbf16>
    %58 = vector.shape_cast %57 : vector<1x8x64xbf16> to vector<8x64xbf16>
    %59 = vector.shape_cast %56 : vector<8x64xbf16> to vector<1x8x64xbf16>
    tpu.vector_store %arg4[%c1_59, %c0_60, %c0_61], %59 {strides = array<i32>} : memref<2x8x64xbf16, #tpu.memory_space<vmem>>, vector<1x8x64xbf16>,
    return
  }
}

module attributes {stable_mosaic.version = 11 : i64} {
  func.func @_fused_conv_kernel(%arg0: memref<2x2x5x80xbf16, #tpu.memory_space<vmem>>, %arg1: memref<3x80x64xbf16, #tpu.memory_space<vmem>>, %arg2: memref<1x64xf32, #tpu.memory_space<vmem>>, %arg3: memref<80x64xbf16, #tpu.memory_space<vmem>>, %arg4: memref<1x64xf32, #tpu.memory_space<vmem>>, %arg5: memref<2x4x64xbf16, #tpu.memory_space<vmem>>, %arg6: memref<2x4x64xbf16, #tpu.memory_space<vmem>>) attributes {dimension_semantics = [], scalar_prefetch = 0 : i64, scratch_operands = 0 : i64, tpu.core_type = #tpu.core_type<tc>} {
    %c0 = arith.constant 0 : index
    %c0_0 = arith.constant 0 : index
    %c0_1 = arith.constant 0 : index
    %c0_2 = arith.constant 0 : index
    %0 = vector.load %arg0[%c0, %c0_0, %c0_1, %c0_2] : memref<2x2x5x80xbf16, #tpu.memory_space<vmem>>, vector<1x1x4x80xbf16>
    %1 = vector.shape_cast %0 : vector<1x1x4x80xbf16> to vector<4x80xbf16>
    %c0_3 = arith.constant 0 : index
    %c0_4 = arith.constant 0 : index
    %c0_5 = arith.constant 0 : index
    %2 = vector.load %arg1[%c0_3, %c0_4, %c0_5] : memref<3x80x64xbf16, #tpu.memory_space<vmem>>, vector<1x80x64xbf16>
    %3 = vector.shape_cast %2 : vector<1x80x64xbf16> to vector<80x64xbf16>
    %cst = arith.constant dense<0.000000e+00> : vector<4x64xf32>
    %4 = tpu.matmul %1, %3, %cst {dimension_numbers = #tpu.dot_dimension_numbers<[1], [0], [0], [1], [0, 0, 1, 1], [], []>} : vector<4x80xbf16>, vector<80x64xbf16>, vector<4x64xf32> -> vector<4x64xf32>
    %c1 = arith.constant 1 : index
    %c0_6 = arith.constant 0 : index
    %c0_7 = arith.constant 0 : index
    %c0_8 = arith.constant 0 : index
    %5 = vector.load %arg0[%c1, %c0_6, %c0_7, %c0_8] : memref<2x2x5x80xbf16, #tpu.memory_space<vmem>>, vector<1x1x4x80xbf16>
    %6 = vector.shape_cast %5 : vector<1x1x4x80xbf16> to vector<4x80xbf16>
    %c1_9 = arith.constant 1 : index
    %c0_10 = arith.constant 0 : index
    %c0_11 = arith.constant 0 : index
    %7 = vector.load %arg1[%c1_9, %c0_10, %c0_11] : memref<3x80x64xbf16, #tpu.memory_space<vmem>>, vector<1x80x64xbf16>
    %8 = vector.shape_cast %7 : vector<1x80x64xbf16> to vector<80x64xbf16>
    %cst_12 = arith.constant dense<0.000000e+00> : vector<4x64xf32>
    %9 = tpu.matmul %6, %8, %cst_12 {dimension_numbers = #tpu.dot_dimension_numbers<[1], [0], [0], [1], [0, 0, 1, 1], [], []>} : vector<4x80xbf16>, vector<80x64xbf16>, vector<4x64xf32> -> vector<4x64xf32>
    %10 = arith.addf %4, %9 : vector<4x64xf32>
    %c0_13 = arith.constant 0 : index
    %c0_14 = arith.constant 0 : index
    %c1_15 = arith.constant 1 : index
    %c0_16 = arith.constant 0 : index
    %11 = vector.load %arg0[%c0_13, %c0_14, %c1_15, %c0_16] : memref<2x2x5x80xbf16, #tpu.memory_space<vmem>>, vector<1x1x4x80xbf16>
    %12 = vector.shape_cast %11 : vector<1x1x4x80xbf16> to vector<4x80xbf16>
    %c2 = arith.constant 2 : index
    %c0_17 = arith.constant 0 : index
    %c0_18 = arith.constant 0 : index
    %13 = vector.load %arg1[%c2, %c0_17, %c0_18] : memref<3x80x64xbf16, #tpu.memory_space<vmem>>, vector<1x80x64xbf16>
    %14 = vector.shape_cast %13 : vector<1x80x64xbf16> to vector<80x64xbf16>
    %cst_19 = arith.constant dense<0.000000e+00> : vector<4x64xf32>
    %15 = tpu.matmul %12, %14, %cst_19 {dimension_numbers = #tpu.dot_dimension_numbers<[1], [0], [0], [1], [0, 0, 1, 1], [], []>} : vector<4x80xbf16>, vector<80x64xbf16>, vector<4x64xf32> -> vector<4x64xf32>
    %16 = arith.addf %10, %15 : vector<4x64xf32>
    %c0_20 = arith.constant 0 : index
    %c0_21 = arith.constant 0 : index
    %17 = vector.load %arg2[%c0_20, %c0_21] : memref<1x64xf32, #tpu.memory_space<vmem>>, vector<1x64xf32>
    %18 = vector.broadcast %17 : vector<1x64xf32> to vector<4x64xf32>
    %19 = arith.addf %16, %18 : vector<4x64xf32>
    %cst_22 = arith.constant 0.000000e+00 : f32
    %20 = vector.broadcast %cst_22 : f32 to vector<4x64xf32>
    %21 = arith.maximumf %19, %20 : vector<4x64xf32>
    %22 = arith.truncf %21 : vector<4x64xf32> to vector<4x64xbf16>
    %c0_23 = arith.constant 0 : index
    %c0_24 = arith.constant 0 : index
    %c0_25 = arith.constant 0 : index
    %23 = vector.load %arg5[%c0_23, %c0_24, %c0_25] : memref<2x4x64xbf16, #tpu.memory_space<vmem>>, vector<1x4x64xbf16>
    %24 = vector.shape_cast %23 : vector<1x4x64xbf16> to vector<4x64xbf16>
    %25 = vector.shape_cast %22 : vector<4x64xbf16> to vector<1x4x64xbf16>
    tpu.vector_store %arg5[%c0_23, %c0_24, %c0_25], %25 {strides = array<i32>} : memref<2x4x64xbf16, #tpu.memory_space<vmem>>, vector<1x4x64xbf16>,
    %c1_26 = arith.constant 1 : index
    %c0_27 = arith.constant 0 : index
    %c0_28 = arith.constant 0 : index
    %c0_29 = arith.constant 0 : index
    %26 = vector.load %arg0[%c1_26, %c0_27, %c0_28, %c0_29] : memref<2x2x5x80xbf16, #tpu.memory_space<vmem>>, vector<1x1x4x80xbf16>
    %27 = vector.shape_cast %26 : vector<1x1x4x80xbf16> to vector<4x80xbf16>
    %c0_30 = arith.constant 0 : index
    %c0_31 = arith.constant 0 : index
    %28 = vector.load %arg3[%c0_30, %c0_31] : memref<80x64xbf16, #tpu.memory_space<vmem>>, vector<80x64xbf16>
    %cst_32 = arith.constant dense<0.000000e+00> : vector<4x64xf32>
    %29 = tpu.matmul %27, %28, %cst_32 {dimension_numbers = #tpu.dot_dimension_numbers<[1], [0], [0], [1], [0, 0, 1, 1], [], []>} : vector<4x80xbf16>, vector<80x64xbf16>, vector<4x64xf32> -> vector<4x64xf32>
    %c0_33 = arith.constant 0 : index
    %c0_34 = arith.constant 0 : index
    %30 = vector.load %arg4[%c0_33, %c0_34] : memref<1x64xf32, #tpu.memory_space<vmem>>, vector<1x64xf32>
    %31 = vector.broadcast %30 : vector<1x64xf32> to vector<4x64xf32>
    %32 = arith.addf %29, %31 : vector<4x64xf32>
    %33 = arith.truncf %32 : vector<4x64xf32> to vector<4x64xbf16>
    %c0_35 = arith.constant 0 : index
    %c0_36 = arith.constant 0 : index
    %c0_37 = arith.constant 0 : index
    %34 = vector.load %arg6[%c0_35, %c0_36, %c0_37] : memref<2x4x64xbf16, #tpu.memory_space<vmem>>, vector<1x4x64xbf16>
    %35 = vector.shape_cast %34 : vector<1x4x64xbf16> to vector<4x64xbf16>
    %36 = vector.shape_cast %33 : vector<4x64xbf16> to vector<1x4x64xbf16>
    tpu.vector_store %arg6[%c0_35, %c0_36, %c0_37], %36 {strides = array<i32>} : memref<2x4x64xbf16, #tpu.memory_space<vmem>>, vector<1x4x64xbf16>,
    %c0_38 = arith.constant 0 : index
    %c1_39 = arith.constant 1 : index
    %c0_40 = arith.constant 0 : index
    %c0_41 = arith.constant 0 : index
    %37 = vector.load %arg0[%c0_38, %c1_39, %c0_40, %c0_41] : memref<2x2x5x80xbf16, #tpu.memory_space<vmem>>, vector<1x1x4x80xbf16>
    %38 = vector.shape_cast %37 : vector<1x1x4x80xbf16> to vector<4x80xbf16>
    %c0_42 = arith.constant 0 : index
    %c0_43 = arith.constant 0 : index
    %c0_44 = arith.constant 0 : index
    %39 = vector.load %arg1[%c0_42, %c0_43, %c0_44] : memref<3x80x64xbf16, #tpu.memory_space<vmem>>, vector<1x80x64xbf16>
    %40 = vector.shape_cast %39 : vector<1x80x64xbf16> to vector<80x64xbf16>
    %cst_45 = arith.constant dense<0.000000e+00> : vector<4x64xf32>
    %41 = tpu.matmul %38, %40, %cst_45 {dimension_numbers = #tpu.dot_dimension_numbers<[1], [0], [0], [1], [0, 0, 1, 1], [], []>} : vector<4x80xbf16>, vector<80x64xbf16>, vector<4x64xf32> -> vector<4x64xf32>
    %c1_46 = arith.constant 1 : index
    %c1_47 = arith.constant 1 : index
    %c0_48 = arith.constant 0 : index
    %c0_49 = arith.constant 0 : index
    %42 = vector.load %arg0[%c1_46, %c1_47, %c0_48, %c0_49] : memref<2x2x5x80xbf16, #tpu.memory_space<vmem>>, vector<1x1x4x80xbf16>
    %43 = vector.shape_cast %42 : vector<1x1x4x80xbf16> to vector<4x80xbf16>
    %c1_50 = arith.constant 1 : index
    %c0_51 = arith.constant 0 : index
    %c0_52 = arith.constant 0 : index
    %44 = vector.load %arg1[%c1_50, %c0_51, %c0_52] : memref<3x80x64xbf16, #tpu.memory_space<vmem>>, vector<1x80x64xbf16>
    %45 = vector.shape_cast %44 : vector<1x80x64xbf16> to vector<80x64xbf16>
    %cst_53 = arith.constant dense<0.000000e+00> : vector<4x64xf32>
    %46 = tpu.matmul %43, %45, %cst_53 {dimension_numbers = #tpu.dot_dimension_numbers<[1], [0], [0], [1], [0, 0, 1, 1], [], []>} : vector<4x80xbf16>, vector<80x64xbf16>, vector<4x64xf32> -> vector<4x64xf32>
    %47 = arith.addf %41, %46 : vector<4x64xf32>
    %c0_54 = arith.constant 0 : index
    %c1_55 = arith.constant 1 : index
    %c1_56 = arith.constant 1 : index
    %c0_57 = arith.constant 0 : index
    %48 = vector.load %arg0[%c0_54, %c1_55, %c1_56, %c0_57] : memref<2x2x5x80xbf16, #tpu.memory_space<vmem>>, vector<1x1x4x80xbf16>
    %49 = vector.shape_cast %48 : vector<1x1x4x80xbf16> to vector<4x80xbf16>
    %c2_58 = arith.constant 2 : index
    %c0_59 = arith.constant 0 : index
    %c0_60 = arith.constant 0 : index
    %50 = vector.load %arg1[%c2_58, %c0_59, %c0_60] : memref<3x80x64xbf16, #tpu.memory_space<vmem>>, vector<1x80x64xbf16>
    %51 = vector.shape_cast %50 : vector<1x80x64xbf16> to vector<80x64xbf16>
    %cst_61 = arith.constant dense<0.000000e+00> : vector<4x64xf32>
    %52 = tpu.matmul %49, %51, %cst_61 {dimension_numbers = #tpu.dot_dimension_numbers<[1], [0], [0], [1], [0, 0, 1, 1], [], []>} : vector<4x80xbf16>, vector<80x64xbf16>, vector<4x64xf32> -> vector<4x64xf32>
    %53 = arith.addf %47, %52 : vector<4x64xf32>
    %c0_62 = arith.constant 0 : index
    %c0_63 = arith.constant 0 : index
    %54 = vector.load %arg2[%c0_62, %c0_63] : memref<1x64xf32, #tpu.memory_space<vmem>>, vector<1x64xf32>
    %55 = vector.broadcast %54 : vector<1x64xf32> to vector<4x64xf32>
    %56 = arith.addf %53, %55 : vector<4x64xf32>
    %cst_64 = arith.constant 0.000000e+00 : f32
    %57 = vector.broadcast %cst_64 : f32 to vector<4x64xf32>
    %58 = arith.maximumf %56, %57 : vector<4x64xf32>
    %59 = arith.truncf %58 : vector<4x64xf32> to vector<4x64xbf16>
    %c1_65 = arith.constant 1 : index
    %c0_66 = arith.constant 0 : index
    %c0_67 = arith.constant 0 : index
    %60 = vector.load %arg5[%c1_65, %c0_66, %c0_67] : memref<2x4x64xbf16, #tpu.memory_space<vmem>>, vector<1x4x64xbf16>
    %61 = vector.shape_cast %60 : vector<1x4x64xbf16> to vector<4x64xbf16>
    %62 = vector.shape_cast %59 : vector<4x64xbf16> to vector<1x4x64xbf16>
    tpu.vector_store %arg5[%c1_65, %c0_66, %c0_67], %62 {strides = array<i32>} : memref<2x4x64xbf16, #tpu.memory_space<vmem>>, vector<1x4x64xbf16>,
    %c1_68 = arith.constant 1 : index
    %c1_69 = arith.constant 1 : index
    %c0_70 = arith.constant 0 : index
    %c0_71 = arith.constant 0 : index
    %63 = vector.load %arg0[%c1_68, %c1_69, %c0_70, %c0_71] : memref<2x2x5x80xbf16, #tpu.memory_space<vmem>>, vector<1x1x4x80xbf16>
    %64 = vector.shape_cast %63 : vector<1x1x4x80xbf16> to vector<4x80xbf16>
    %c0_72 = arith.constant 0 : index
    %c0_73 = arith.constant 0 : index
    %65 = vector.load %arg3[%c0_72, %c0_73] : memref<80x64xbf16, #tpu.memory_space<vmem>>, vector<80x64xbf16>
    %cst_74 = arith.constant dense<0.000000e+00> : vector<4x64xf32>
    %66 = tpu.matmul %64, %65, %cst_74 {dimension_numbers = #tpu.dot_dimension_numbers<[1], [0], [0], [1], [0, 0, 1, 1], [], []>} : vector<4x80xbf16>, vector<80x64xbf16>, vector<4x64xf32> -> vector<4x64xf32>
    %c0_75 = arith.constant 0 : index
    %c0_76 = arith.constant 0 : index
    %67 = vector.load %arg4[%c0_75, %c0_76] : memref<1x64xf32, #tpu.memory_space<vmem>>, vector<1x64xf32>
    %68 = vector.broadcast %67 : vector<1x64xf32> to vector<4x64xf32>
    %69 = arith.addf %66, %68 : vector<4x64xf32>
    %70 = arith.truncf %69 : vector<4x64xf32> to vector<4x64xbf16>
    %c1_77 = arith.constant 1 : index
    %c0_78 = arith.constant 0 : index
    %c0_79 = arith.constant 0 : index
    %71 = vector.load %arg6[%c1_77, %c0_78, %c0_79] : memref<2x4x64xbf16, #tpu.memory_space<vmem>>, vector<1x4x64xbf16>
    %72 = vector.shape_cast %71 : vector<1x4x64xbf16> to vector<4x64xbf16>
    %73 = vector.shape_cast %70 : vector<4x64xbf16> to vector<1x4x64xbf16>
    tpu.vector_store %arg6[%c1_77, %c0_78, %c0_79], %73 {strides = array<i32>} : memref<2x4x64xbf16, #tpu.memory_space<vmem>>, vector<1x4x64xbf16>,
    return
  }
}

module attributes {stable_mosaic.version = 11 : i64} {
  func.func @_fused_conv_kernel(%arg0: memref<1x2x6x96xbf16, #tpu.memory_space<vmem>>, %arg1: memref<3x96x64xbf16, #tpu.memory_space<vmem>>, %arg2: memref<1x64xf32, #tpu.memory_space<vmem>>, %arg3: memref<2x4x64xbf16, #tpu.memory_space<vmem>>, %arg4: memref<2x4x64xbf16, #tpu.memory_space<vmem>>) attributes {dimension_semantics = [], scalar_prefetch = 0 : i64, scratch_operands = 0 : i64, tpu.core_type = #tpu.core_type<tc>} {
    %c0 = arith.constant 0 : index
    %c0_0 = arith.constant 0 : index
    %c0_1 = arith.constant 0 : index
    %c0_2 = arith.constant 0 : index
    %0 = vector.load %arg0[%c0, %c0_0, %c0_1, %c0_2] : memref<1x2x6x96xbf16, #tpu.memory_space<vmem>>, vector<1x1x4x96xbf16>
    %1 = vector.shape_cast %0 : vector<1x1x4x96xbf16> to vector<4x96xbf16>
    %c0_3 = arith.constant 0 : index
    %c0_4 = arith.constant 0 : index
    %c0_5 = arith.constant 0 : index
    %2 = vector.load %arg1[%c0_3, %c0_4, %c0_5] : memref<3x96x64xbf16, #tpu.memory_space<vmem>>, vector<1x96x64xbf16>
    %3 = vector.shape_cast %2 : vector<1x96x64xbf16> to vector<96x64xbf16>
    %cst = arith.constant dense<0.000000e+00> : vector<4x64xf32>
    %4 = tpu.matmul %1, %3, %cst {dimension_numbers = #tpu.dot_dimension_numbers<[1], [0], [0], [1], [0, 0, 1, 1], [], []>} : vector<4x96xbf16>, vector<96x64xbf16>, vector<4x64xf32> -> vector<4x64xf32>
    %c0_6 = arith.constant 0 : index
    %c0_7 = arith.constant 0 : index
    %c1 = arith.constant 1 : index
    %c0_8 = arith.constant 0 : index
    %5 = vector.load %arg0[%c0_6, %c0_7, %c1, %c0_8] : memref<1x2x6x96xbf16, #tpu.memory_space<vmem>>, vector<1x1x4x96xbf16>
    %6 = vector.shape_cast %5 : vector<1x1x4x96xbf16> to vector<4x96xbf16>
    %c1_9 = arith.constant 1 : index
    %c0_10 = arith.constant 0 : index
    %c0_11 = arith.constant 0 : index
    %7 = vector.load %arg1[%c1_9, %c0_10, %c0_11] : memref<3x96x64xbf16, #tpu.memory_space<vmem>>, vector<1x96x64xbf16>
    %8 = vector.shape_cast %7 : vector<1x96x64xbf16> to vector<96x64xbf16>
    %cst_12 = arith.constant dense<0.000000e+00> : vector<4x64xf32>
    %9 = tpu.matmul %6, %8, %cst_12 {dimension_numbers = #tpu.dot_dimension_numbers<[1], [0], [0], [1], [0, 0, 1, 1], [], []>} : vector<4x96xbf16>, vector<96x64xbf16>, vector<4x64xf32> -> vector<4x64xf32>
    %10 = arith.addf %4, %9 : vector<4x64xf32>
    %c0_13 = arith.constant 0 : index
    %c0_14 = arith.constant 0 : index
    %c2 = arith.constant 2 : index
    %c0_15 = arith.constant 0 : index
    %11 = vector.load %arg0[%c0_13, %c0_14, %c2, %c0_15] : memref<1x2x6x96xbf16, #tpu.memory_space<vmem>>, vector<1x1x4x96xbf16>
    %12 = vector.shape_cast %11 : vector<1x1x4x96xbf16> to vector<4x96xbf16>
    %c2_16 = arith.constant 2 : index
    %c0_17 = arith.constant 0 : index
    %c0_18 = arith.constant 0 : index
    %13 = vector.load %arg1[%c2_16, %c0_17, %c0_18] : memref<3x96x64xbf16, #tpu.memory_space<vmem>>, vector<1x96x64xbf16>
    %14 = vector.shape_cast %13 : vector<1x96x64xbf16> to vector<96x64xbf16>
    %cst_19 = arith.constant dense<0.000000e+00> : vector<4x64xf32>
    %15 = tpu.matmul %12, %14, %cst_19 {dimension_numbers = #tpu.dot_dimension_numbers<[1], [0], [0], [1], [0, 0, 1, 1], [], []>} : vector<4x96xbf16>, vector<96x64xbf16>, vector<4x64xf32> -> vector<4x64xf32>
    %16 = arith.addf %10, %15 : vector<4x64xf32>
    %c0_20 = arith.constant 0 : index
    %c0_21 = arith.constant 0 : index
    %17 = vector.load %arg2[%c0_20, %c0_21] : memref<1x64xf32, #tpu.memory_space<vmem>>, vector<1x64xf32>
    %18 = vector.broadcast %17 : vector<1x64xf32> to vector<4x64xf32>
    %19 = arith.addf %16, %18 : vector<4x64xf32>
    %c0_22 = arith.constant 0 : index
    %c0_23 = arith.constant 0 : index
    %c0_24 = arith.constant 0 : index
    %20 = vector.load %arg3[%c0_22, %c0_23, %c0_24] : memref<2x4x64xbf16, #tpu.memory_space<vmem>>, vector<1x4x64xbf16>
    %21 = vector.shape_cast %20 : vector<1x4x64xbf16> to vector<4x64xbf16>
    %22 = arith.extf %21 : vector<4x64xbf16> to vector<4x64xf32>
    %23 = arith.addf %19, %22 : vector<4x64xf32>
    %cst_25 = arith.constant 0.000000e+00 : f32
    %24 = vector.broadcast %cst_25 : f32 to vector<4x64xf32>
    %25 = arith.maximumf %23, %24 : vector<4x64xf32>
    %26 = arith.truncf %25 : vector<4x64xf32> to vector<4x64xbf16>
    %c0_26 = arith.constant 0 : index
    %c0_27 = arith.constant 0 : index
    %c0_28 = arith.constant 0 : index
    %27 = vector.load %arg4[%c0_26, %c0_27, %c0_28] : memref<2x4x64xbf16, #tpu.memory_space<vmem>>, vector<1x4x64xbf16>
    %28 = vector.shape_cast %27 : vector<1x4x64xbf16> to vector<4x64xbf16>
    %29 = vector.shape_cast %26 : vector<4x64xbf16> to vector<1x4x64xbf16>
    tpu.vector_store %arg4[%c0_26, %c0_27, %c0_28], %29 {strides = array<i32>} : memref<2x4x64xbf16, #tpu.memory_space<vmem>>, vector<1x4x64xbf16>,
    %c0_29 = arith.constant 0 : index
    %c1_30 = arith.constant 1 : index
    %c0_31 = arith.constant 0 : index
    %c0_32 = arith.constant 0 : index
    %30 = vector.load %arg0[%c0_29, %c1_30, %c0_31, %c0_32] : memref<1x2x6x96xbf16, #tpu.memory_space<vmem>>, vector<1x1x4x96xbf16>
    %31 = vector.shape_cast %30 : vector<1x1x4x96xbf16> to vector<4x96xbf16>
    %c0_33 = arith.constant 0 : index
    %c0_34 = arith.constant 0 : index
    %c0_35 = arith.constant 0 : index
    %32 = vector.load %arg1[%c0_33, %c0_34, %c0_35] : memref<3x96x64xbf16, #tpu.memory_space<vmem>>, vector<1x96x64xbf16>
    %33 = vector.shape_cast %32 : vector<1x96x64xbf16> to vector<96x64xbf16>
    %cst_36 = arith.constant dense<0.000000e+00> : vector<4x64xf32>
    %34 = tpu.matmul %31, %33, %cst_36 {dimension_numbers = #tpu.dot_dimension_numbers<[1], [0], [0], [1], [0, 0, 1, 1], [], []>} : vector<4x96xbf16>, vector<96x64xbf16>, vector<4x64xf32> -> vector<4x64xf32>
    %c0_37 = arith.constant 0 : index
    %c1_38 = arith.constant 1 : index
    %c1_39 = arith.constant 1 : index
    %c0_40 = arith.constant 0 : index
    %35 = vector.load %arg0[%c0_37, %c1_38, %c1_39, %c0_40] : memref<1x2x6x96xbf16, #tpu.memory_space<vmem>>, vector<1x1x4x96xbf16>
    %36 = vector.shape_cast %35 : vector<1x1x4x96xbf16> to vector<4x96xbf16>
    %c1_41 = arith.constant 1 : index
    %c0_42 = arith.constant 0 : index
    %c0_43 = arith.constant 0 : index
    %37 = vector.load %arg1[%c1_41, %c0_42, %c0_43] : memref<3x96x64xbf16, #tpu.memory_space<vmem>>, vector<1x96x64xbf16>
    %38 = vector.shape_cast %37 : vector<1x96x64xbf16> to vector<96x64xbf16>
    %cst_44 = arith.constant dense<0.000000e+00> : vector<4x64xf32>
    %39 = tpu.matmul %36, %38, %cst_44 {dimension_numbers = #tpu.dot_dimension_numbers<[1], [0], [0], [1], [0, 0, 1, 1], [], []>} : vector<4x96xbf16>, vector<96x64xbf16>, vector<4x64xf32> -> vector<4x64xf32>
    %40 = arith.addf %34, %39 : vector<4x64xf32>
    %c0_45 = arith.constant 0 : index
    %c1_46 = arith.constant 1 : index
    %c2_47 = arith.constant 2 : index
    %c0_48 = arith.constant 0 : index
    %41 = vector.load %arg0[%c0_45, %c1_46, %c2_47, %c0_48] : memref<1x2x6x96xbf16, #tpu.memory_space<vmem>>, vector<1x1x4x96xbf16>
    %42 = vector.shape_cast %41 : vector<1x1x4x96xbf16> to vector<4x96xbf16>
    %c2_49 = arith.constant 2 : index
    %c0_50 = arith.constant 0 : index
    %c0_51 = arith.constant 0 : index
    %43 = vector.load %arg1[%c2_49, %c0_50, %c0_51] : memref<3x96x64xbf16, #tpu.memory_space<vmem>>, vector<1x96x64xbf16>
    %44 = vector.shape_cast %43 : vector<1x96x64xbf16> to vector<96x64xbf16>
    %cst_52 = arith.constant dense<0.000000e+00> : vector<4x64xf32>
    %45 = tpu.matmul %42, %44, %cst_52 {dimension_numbers = #tpu.dot_dimension_numbers<[1], [0], [0], [1], [0, 0, 1, 1], [], []>} : vector<4x96xbf16>, vector<96x64xbf16>, vector<4x64xf32> -> vector<4x64xf32>
    %46 = arith.addf %40, %45 : vector<4x64xf32>
    %c0_53 = arith.constant 0 : index
    %c0_54 = arith.constant 0 : index
    %47 = vector.load %arg2[%c0_53, %c0_54] : memref<1x64xf32, #tpu.memory_space<vmem>>, vector<1x64xf32>
    %48 = vector.broadcast %47 : vector<1x64xf32> to vector<4x64xf32>
    %49 = arith.addf %46, %48 : vector<4x64xf32>
    %c1_55 = arith.constant 1 : index
    %c0_56 = arith.constant 0 : index
    %c0_57 = arith.constant 0 : index
    %50 = vector.load %arg3[%c1_55, %c0_56, %c0_57] : memref<2x4x64xbf16, #tpu.memory_space<vmem>>, vector<1x4x64xbf16>
    %51 = vector.shape_cast %50 : vector<1x4x64xbf16> to vector<4x64xbf16>
    %52 = arith.extf %51 : vector<4x64xbf16> to vector<4x64xf32>
    %53 = arith.addf %49, %52 : vector<4x64xf32>
    %cst_58 = arith.constant 0.000000e+00 : f32
    %54 = vector.broadcast %cst_58 : f32 to vector<4x64xf32>
    %55 = arith.maximumf %53, %54 : vector<4x64xf32>
    %56 = arith.truncf %55 : vector<4x64xf32> to vector<4x64xbf16>
    %c1_59 = arith.constant 1 : index
    %c0_60 = arith.constant 0 : index
    %c0_61 = arith.constant 0 : index
    %57 = vector.load %arg4[%c1_59, %c0_60, %c0_61] : memref<2x4x64xbf16, #tpu.memory_space<vmem>>, vector<1x4x64xbf16>
    %58 = vector.shape_cast %57 : vector<1x4x64xbf16> to vector<4x64xbf16>
    %59 = vector.shape_cast %56 : vector<4x64xbf16> to vector<1x4x64xbf16>
    tpu.vector_store %arg4[%c1_59, %c0_60, %c0_61], %59 {strides = array<i32>} : memref<2x4x64xbf16, #tpu.memory_space<vmem>>, vector<1x4x64xbf16>,
    return
  }
}

module attributes {stable_mosaic.version = 11 : i64} {
  func.func @_fused_conv_kernel(%arg0: memref<2x2x3x96xbf16, #tpu.memory_space<vmem>>, %arg1: memref<3x96x64xbf16, #tpu.memory_space<vmem>>, %arg2: memref<1x64xf32, #tpu.memory_space<vmem>>, %arg3: memref<96x64xbf16, #tpu.memory_space<vmem>>, %arg4: memref<1x64xf32, #tpu.memory_space<vmem>>, %arg5: memref<2x2x64xbf16, #tpu.memory_space<vmem>>, %arg6: memref<2x2x64xbf16, #tpu.memory_space<vmem>>) attributes {dimension_semantics = [], scalar_prefetch = 0 : i64, scratch_operands = 0 : i64, tpu.core_type = #tpu.core_type<tc>} {
    %c0 = arith.constant 0 : index
    %c0_0 = arith.constant 0 : index
    %c0_1 = arith.constant 0 : index
    %c0_2 = arith.constant 0 : index
    %0 = vector.load %arg0[%c0, %c0_0, %c0_1, %c0_2] : memref<2x2x3x96xbf16, #tpu.memory_space<vmem>>, vector<1x1x2x96xbf16>
    %1 = vector.shape_cast %0 : vector<1x1x2x96xbf16> to vector<2x96xbf16>
    %c0_3 = arith.constant 0 : index
    %c0_4 = arith.constant 0 : index
    %c0_5 = arith.constant 0 : index
    %2 = vector.load %arg1[%c0_3, %c0_4, %c0_5] : memref<3x96x64xbf16, #tpu.memory_space<vmem>>, vector<1x96x64xbf16>
    %3 = vector.shape_cast %2 : vector<1x96x64xbf16> to vector<96x64xbf16>
    %cst = arith.constant dense<0.000000e+00> : vector<2x64xf32>
    %4 = tpu.matmul %1, %3, %cst {dimension_numbers = #tpu.dot_dimension_numbers<[1], [0], [0], [1], [0, 0, 1, 1], [], []>} : vector<2x96xbf16>, vector<96x64xbf16>, vector<2x64xf32> -> vector<2x64xf32>
    %c1 = arith.constant 1 : index
    %c0_6 = arith.constant 0 : index
    %c0_7 = arith.constant 0 : index
    %c0_8 = arith.constant 0 : index
    %5 = vector.load %arg0[%c1, %c0_6, %c0_7, %c0_8] : memref<2x2x3x96xbf16, #tpu.memory_space<vmem>>, vector<1x1x2x96xbf16>
    %6 = vector.shape_cast %5 : vector<1x1x2x96xbf16> to vector<2x96xbf16>
    %c1_9 = arith.constant 1 : index
    %c0_10 = arith.constant 0 : index
    %c0_11 = arith.constant 0 : index
    %7 = vector.load %arg1[%c1_9, %c0_10, %c0_11] : memref<3x96x64xbf16, #tpu.memory_space<vmem>>, vector<1x96x64xbf16>
    %8 = vector.shape_cast %7 : vector<1x96x64xbf16> to vector<96x64xbf16>
    %cst_12 = arith.constant dense<0.000000e+00> : vector<2x64xf32>
    %9 = tpu.matmul %6, %8, %cst_12 {dimension_numbers = #tpu.dot_dimension_numbers<[1], [0], [0], [1], [0, 0, 1, 1], [], []>} : vector<2x96xbf16>, vector<96x64xbf16>, vector<2x64xf32> -> vector<2x64xf32>
    %10 = arith.addf %4, %9 : vector<2x64xf32>
    %c0_13 = arith.constant 0 : index
    %c0_14 = arith.constant 0 : index
    %c1_15 = arith.constant 1 : index
    %c0_16 = arith.constant 0 : index
    %11 = vector.load %arg0[%c0_13, %c0_14, %c1_15, %c0_16] : memref<2x2x3x96xbf16, #tpu.memory_space<vmem>>, vector<1x1x2x96xbf16>
    %12 = vector.shape_cast %11 : vector<1x1x2x96xbf16> to vector<2x96xbf16>
    %c2 = arith.constant 2 : index
    %c0_17 = arith.constant 0 : index
    %c0_18 = arith.constant 0 : index
    %13 = vector.load %arg1[%c2, %c0_17, %c0_18] : memref<3x96x64xbf16, #tpu.memory_space<vmem>>, vector<1x96x64xbf16>
    %14 = vector.shape_cast %13 : vector<1x96x64xbf16> to vector<96x64xbf16>
    %cst_19 = arith.constant dense<0.000000e+00> : vector<2x64xf32>
    %15 = tpu.matmul %12, %14, %cst_19 {dimension_numbers = #tpu.dot_dimension_numbers<[1], [0], [0], [1], [0, 0, 1, 1], [], []>} : vector<2x96xbf16>, vector<96x64xbf16>, vector<2x64xf32> -> vector<2x64xf32>
    %16 = arith.addf %10, %15 : vector<2x64xf32>
    %c0_20 = arith.constant 0 : index
    %c0_21 = arith.constant 0 : index
    %17 = vector.load %arg2[%c0_20, %c0_21] : memref<1x64xf32, #tpu.memory_space<vmem>>, vector<1x64xf32>
    %18 = vector.broadcast %17 : vector<1x64xf32> to vector<2x64xf32>
    %19 = arith.addf %16, %18 : vector<2x64xf32>
    %cst_22 = arith.constant 0.000000e+00 : f32
    %20 = vector.broadcast %cst_22 : f32 to vector<2x64xf32>
    %21 = arith.maximumf %19, %20 : vector<2x64xf32>
    %22 = arith.truncf %21 : vector<2x64xf32> to vector<2x64xbf16>
    %c0_23 = arith.constant 0 : index
    %c0_24 = arith.constant 0 : index
    %c0_25 = arith.constant 0 : index
    %23 = vector.load %arg5[%c0_23, %c0_24, %c0_25] : memref<2x2x64xbf16, #tpu.memory_space<vmem>>, vector<1x2x64xbf16>
    %24 = vector.shape_cast %23 : vector<1x2x64xbf16> to vector<2x64xbf16>
    %25 = vector.shape_cast %22 : vector<2x64xbf16> to vector<1x2x64xbf16>
    tpu.vector_store %arg5[%c0_23, %c0_24, %c0_25], %25 {strides = array<i32>} : memref<2x2x64xbf16, #tpu.memory_space<vmem>>, vector<1x2x64xbf16>,
    %c1_26 = arith.constant 1 : index
    %c0_27 = arith.constant 0 : index
    %c0_28 = arith.constant 0 : index
    %c0_29 = arith.constant 0 : index
    %26 = vector.load %arg0[%c1_26, %c0_27, %c0_28, %c0_29] : memref<2x2x3x96xbf16, #tpu.memory_space<vmem>>, vector<1x1x2x96xbf16>
    %27 = vector.shape_cast %26 : vector<1x1x2x96xbf16> to vector<2x96xbf16>
    %c0_30 = arith.constant 0 : index
    %c0_31 = arith.constant 0 : index
    %28 = vector.load %arg3[%c0_30, %c0_31] : memref<96x64xbf16, #tpu.memory_space<vmem>>, vector<96x64xbf16>
    %cst_32 = arith.constant dense<0.000000e+00> : vector<2x64xf32>
    %29 = tpu.matmul %27, %28, %cst_32 {dimension_numbers = #tpu.dot_dimension_numbers<[1], [0], [0], [1], [0, 0, 1, 1], [], []>} : vector<2x96xbf16>, vector<96x64xbf16>, vector<2x64xf32> -> vector<2x64xf32>
    %c0_33 = arith.constant 0 : index
    %c0_34 = arith.constant 0 : index
    %30 = vector.load %arg4[%c0_33, %c0_34] : memref<1x64xf32, #tpu.memory_space<vmem>>, vector<1x64xf32>
    %31 = vector.broadcast %30 : vector<1x64xf32> to vector<2x64xf32>
    %32 = arith.addf %29, %31 : vector<2x64xf32>
    %33 = arith.truncf %32 : vector<2x64xf32> to vector<2x64xbf16>
    %c0_35 = arith.constant 0 : index
    %c0_36 = arith.constant 0 : index
    %c0_37 = arith.constant 0 : index
    %34 = vector.load %arg6[%c0_35, %c0_36, %c0_37] : memref<2x2x64xbf16, #tpu.memory_space<vmem>>, vector<1x2x64xbf16>
    %35 = vector.shape_cast %34 : vector<1x2x64xbf16> to vector<2x64xbf16>
    %36 = vector.shape_cast %33 : vector<2x64xbf16> to vector<1x2x64xbf16>
    tpu.vector_store %arg6[%c0_35, %c0_36, %c0_37], %36 {strides = array<i32>} : memref<2x2x64xbf16, #tpu.memory_space<vmem>>, vector<1x2x64xbf16>,
    %c0_38 = arith.constant 0 : index
    %c1_39 = arith.constant 1 : index
    %c0_40 = arith.constant 0 : index
    %c0_41 = arith.constant 0 : index
    %37 = vector.load %arg0[%c0_38, %c1_39, %c0_40, %c0_41] : memref<2x2x3x96xbf16, #tpu.memory_space<vmem>>, vector<1x1x2x96xbf16>
    %38 = vector.shape_cast %37 : vector<1x1x2x96xbf16> to vector<2x96xbf16>
    %c0_42 = arith.constant 0 : index
    %c0_43 = arith.constant 0 : index
    %c0_44 = arith.constant 0 : index
    %39 = vector.load %arg1[%c0_42, %c0_43, %c0_44] : memref<3x96x64xbf16, #tpu.memory_space<vmem>>, vector<1x96x64xbf16>
    %40 = vector.shape_cast %39 : vector<1x96x64xbf16> to vector<96x64xbf16>
    %cst_45 = arith.constant dense<0.000000e+00> : vector<2x64xf32>
    %41 = tpu.matmul %38, %40, %cst_45 {dimension_numbers = #tpu.dot_dimension_numbers<[1], [0], [0], [1], [0, 0, 1, 1], [], []>} : vector<2x96xbf16>, vector<96x64xbf16>, vector<2x64xf32> -> vector<2x64xf32>
    %c1_46 = arith.constant 1 : index
    %c1_47 = arith.constant 1 : index
    %c0_48 = arith.constant 0 : index
    %c0_49 = arith.constant 0 : index
    %42 = vector.load %arg0[%c1_46, %c1_47, %c0_48, %c0_49] : memref<2x2x3x96xbf16, #tpu.memory_space<vmem>>, vector<1x1x2x96xbf16>
    %43 = vector.shape_cast %42 : vector<1x1x2x96xbf16> to vector<2x96xbf16>
    %c1_50 = arith.constant 1 : index
    %c0_51 = arith.constant 0 : index
    %c0_52 = arith.constant 0 : index
    %44 = vector.load %arg1[%c1_50, %c0_51, %c0_52] : memref<3x96x64xbf16, #tpu.memory_space<vmem>>, vector<1x96x64xbf16>
    %45 = vector.shape_cast %44 : vector<1x96x64xbf16> to vector<96x64xbf16>
    %cst_53 = arith.constant dense<0.000000e+00> : vector<2x64xf32>
    %46 = tpu.matmul %43, %45, %cst_53 {dimension_numbers = #tpu.dot_dimension_numbers<[1], [0], [0], [1], [0, 0, 1, 1], [], []>} : vector<2x96xbf16>, vector<96x64xbf16>, vector<2x64xf32> -> vector<2x64xf32>
    %47 = arith.addf %41, %46 : vector<2x64xf32>
    %c0_54 = arith.constant 0 : index
    %c1_55 = arith.constant 1 : index
    %c1_56 = arith.constant 1 : index
    %c0_57 = arith.constant 0 : index
    %48 = vector.load %arg0[%c0_54, %c1_55, %c1_56, %c0_57] : memref<2x2x3x96xbf16, #tpu.memory_space<vmem>>, vector<1x1x2x96xbf16>
    %49 = vector.shape_cast %48 : vector<1x1x2x96xbf16> to vector<2x96xbf16>
    %c2_58 = arith.constant 2 : index
    %c0_59 = arith.constant 0 : index
    %c0_60 = arith.constant 0 : index
    %50 = vector.load %arg1[%c2_58, %c0_59, %c0_60] : memref<3x96x64xbf16, #tpu.memory_space<vmem>>, vector<1x96x64xbf16>
    %51 = vector.shape_cast %50 : vector<1x96x64xbf16> to vector<96x64xbf16>
    %cst_61 = arith.constant dense<0.000000e+00> : vector<2x64xf32>
    %52 = tpu.matmul %49, %51, %cst_61 {dimension_numbers = #tpu.dot_dimension_numbers<[1], [0], [0], [1], [0, 0, 1, 1], [], []>} : vector<2x96xbf16>, vector<96x64xbf16>, vector<2x64xf32> -> vector<2x64xf32>
    %53 = arith.addf %47, %52 : vector<2x64xf32>
    %c0_62 = arith.constant 0 : index
    %c0_63 = arith.constant 0 : index
    %54 = vector.load %arg2[%c0_62, %c0_63] : memref<1x64xf32, #tpu.memory_space<vmem>>, vector<1x64xf32>
    %55 = vector.broadcast %54 : vector<1x64xf32> to vector<2x64xf32>
    %56 = arith.addf %53, %55 : vector<2x64xf32>
    %cst_64 = arith.constant 0.000000e+00 : f32
    %57 = vector.broadcast %cst_64 : f32 to vector<2x64xf32>
    %58 = arith.maximumf %56, %57 : vector<2x64xf32>
    %59 = arith.truncf %58 : vector<2x64xf32> to vector<2x64xbf16>
    %c1_65 = arith.constant 1 : index
    %c0_66 = arith.constant 0 : index
    %c0_67 = arith.constant 0 : index
    %60 = vector.load %arg5[%c1_65, %c0_66, %c0_67] : memref<2x2x64xbf16, #tpu.memory_space<vmem>>, vector<1x2x64xbf16>
    %61 = vector.shape_cast %60 : vector<1x2x64xbf16> to vector<2x64xbf16>
    %62 = vector.shape_cast %59 : vector<2x64xbf16> to vector<1x2x64xbf16>
    tpu.vector_store %arg5[%c1_65, %c0_66, %c0_67], %62 {strides = array<i32>} : memref<2x2x64xbf16, #tpu.memory_space<vmem>>, vector<1x2x64xbf16>,
    %c1_68 = arith.constant 1 : index
    %c1_69 = arith.constant 1 : index
    %c0_70 = arith.constant 0 : index
    %c0_71 = arith.constant 0 : index
    %63 = vector.load %arg0[%c1_68, %c1_69, %c0_70, %c0_71] : memref<2x2x3x96xbf16, #tpu.memory_space<vmem>>, vector<1x1x2x96xbf16>
    %64 = vector.shape_cast %63 : vector<1x1x2x96xbf16> to vector<2x96xbf16>
    %c0_72 = arith.constant 0 : index
    %c0_73 = arith.constant 0 : index
    %65 = vector.load %arg3[%c0_72, %c0_73] : memref<96x64xbf16, #tpu.memory_space<vmem>>, vector<96x64xbf16>
    %cst_74 = arith.constant dense<0.000000e+00> : vector<2x64xf32>
    %66 = tpu.matmul %64, %65, %cst_74 {dimension_numbers = #tpu.dot_dimension_numbers<[1], [0], [0], [1], [0, 0, 1, 1], [], []>} : vector<2x96xbf16>, vector<96x64xbf16>, vector<2x64xf32> -> vector<2x64xf32>
    %c0_75 = arith.constant 0 : index
    %c0_76 = arith.constant 0 : index
    %67 = vector.load %arg4[%c0_75, %c0_76] : memref<1x64xf32, #tpu.memory_space<vmem>>, vector<1x64xf32>
    %68 = vector.broadcast %67 : vector<1x64xf32> to vector<2x64xf32>
    %69 = arith.addf %66, %68 : vector<2x64xf32>
    %70 = arith.truncf %69 : vector<2x64xf32> to vector<2x64xbf16>
    %c1_77 = arith.constant 1 : index
    %c0_78 = arith.constant 0 : index
    %c0_79 = arith.constant 0 : index
    %71 = vector.load %arg6[%c1_77, %c0_78, %c0_79] : memref<2x2x64xbf16, #tpu.memory_space<vmem>>, vector<1x2x64xbf16>
    %72 = vector.shape_cast %71 : vector<1x2x64xbf16> to vector<2x64xbf16>
    %73 = vector.shape_cast %70 : vector<2x64xbf16> to vector<1x2x64xbf16>
    tpu.vector_store %arg6[%c1_77, %c0_78, %c0_79], %73 {strides = array<i32>} : memref<2x2x64xbf16, #tpu.memory_space<vmem>>, vector<1x2x64xbf16>,
    return
  }
}

module attributes {stable_mosaic.version = 11 : i64} {
  func.func @_fused_conv_kernel(%arg0: memref<1x2x4x128xbf16, #tpu.memory_space<vmem>>, %arg1: memref<3x128x64xbf16, #tpu.memory_space<vmem>>, %arg2: memref<1x64xf32, #tpu.memory_space<vmem>>, %arg3: memref<2x2x64xbf16, #tpu.memory_space<vmem>>, %arg4: memref<2x2x64xbf16, #tpu.memory_space<vmem>>) attributes {dimension_semantics = [], scalar_prefetch = 0 : i64, scratch_operands = 0 : i64, tpu.core_type = #tpu.core_type<tc>} {
    %c0 = arith.constant 0 : index
    %c0_0 = arith.constant 0 : index
    %c0_1 = arith.constant 0 : index
    %c0_2 = arith.constant 0 : index
    %0 = vector.load %arg0[%c0, %c0_0, %c0_1, %c0_2] : memref<1x2x4x128xbf16, #tpu.memory_space<vmem>>, vector<1x1x2x128xbf16>
    %1 = vector.shape_cast %0 : vector<1x1x2x128xbf16> to vector<2x128xbf16>
    %c0_3 = arith.constant 0 : index
    %c0_4 = arith.constant 0 : index
    %c0_5 = arith.constant 0 : index
    %2 = vector.load %arg1[%c0_3, %c0_4, %c0_5] : memref<3x128x64xbf16, #tpu.memory_space<vmem>>, vector<1x128x64xbf16>
    %3 = vector.shape_cast %2 : vector<1x128x64xbf16> to vector<128x64xbf16>
    %cst = arith.constant dense<0.000000e+00> : vector<2x64xf32>
    %4 = tpu.matmul %1, %3, %cst {dimension_numbers = #tpu.dot_dimension_numbers<[1], [0], [0], [1], [0, 0, 1, 1], [], []>} : vector<2x128xbf16>, vector<128x64xbf16>, vector<2x64xf32> -> vector<2x64xf32>
    %c0_6 = arith.constant 0 : index
    %c0_7 = arith.constant 0 : index
    %c1 = arith.constant 1 : index
    %c0_8 = arith.constant 0 : index
    %5 = vector.load %arg0[%c0_6, %c0_7, %c1, %c0_8] : memref<1x2x4x128xbf16, #tpu.memory_space<vmem>>, vector<1x1x2x128xbf16>
    %6 = vector.shape_cast %5 : vector<1x1x2x128xbf16> to vector<2x128xbf16>
    %c1_9 = arith.constant 1 : index
    %c0_10 = arith.constant 0 : index
    %c0_11 = arith.constant 0 : index
    %7 = vector.load %arg1[%c1_9, %c0_10, %c0_11] : memref<3x128x64xbf16, #tpu.memory_space<vmem>>, vector<1x128x64xbf16>
    %8 = vector.shape_cast %7 : vector<1x128x64xbf16> to vector<128x64xbf16>
    %cst_12 = arith.constant dense<0.000000e+00> : vector<2x64xf32>
    %9 = tpu.matmul %6, %8, %cst_12 {dimension_numbers = #tpu.dot_dimension_numbers<[1], [0], [0], [1], [0, 0, 1, 1], [], []>} : vector<2x128xbf16>, vector<128x64xbf16>, vector<2x64xf32> -> vector<2x64xf32>
    %10 = arith.addf %4, %9 : vector<2x64xf32>
    %c0_13 = arith.constant 0 : index
    %c0_14 = arith.constant 0 : index
    %c2 = arith.constant 2 : index
    %c0_15 = arith.constant 0 : index
    %11 = vector.load %arg0[%c0_13, %c0_14, %c2, %c0_15] : memref<1x2x4x128xbf16, #tpu.memory_space<vmem>>, vector<1x1x2x128xbf16>
    %12 = vector.shape_cast %11 : vector<1x1x2x128xbf16> to vector<2x128xbf16>
    %c2_16 = arith.constant 2 : index
    %c0_17 = arith.constant 0 : index
    %c0_18 = arith.constant 0 : index
    %13 = vector.load %arg1[%c2_16, %c0_17, %c0_18] : memref<3x128x64xbf16, #tpu.memory_space<vmem>>, vector<1x128x64xbf16>
    %14 = vector.shape_cast %13 : vector<1x128x64xbf16> to vector<128x64xbf16>
    %cst_19 = arith.constant dense<0.000000e+00> : vector<2x64xf32>
    %15 = tpu.matmul %12, %14, %cst_19 {dimension_numbers = #tpu.dot_dimension_numbers<[1], [0], [0], [1], [0, 0, 1, 1], [], []>} : vector<2x128xbf16>, vector<128x64xbf16>, vector<2x64xf32> -> vector<2x64xf32>
    %16 = arith.addf %10, %15 : vector<2x64xf32>
    %c0_20 = arith.constant 0 : index
    %c0_21 = arith.constant 0 : index
    %17 = vector.load %arg2[%c0_20, %c0_21] : memref<1x64xf32, #tpu.memory_space<vmem>>, vector<1x64xf32>
    %18 = vector.broadcast %17 : vector<1x64xf32> to vector<2x64xf32>
    %19 = arith.addf %16, %18 : vector<2x64xf32>
    %c0_22 = arith.constant 0 : index
    %c0_23 = arith.constant 0 : index
    %c0_24 = arith.constant 0 : index
    %20 = vector.load %arg3[%c0_22, %c0_23, %c0_24] : memref<2x2x64xbf16, #tpu.memory_space<vmem>>, vector<1x2x64xbf16>
    %21 = vector.shape_cast %20 : vector<1x2x64xbf16> to vector<2x64xbf16>
    %22 = arith.extf %21 : vector<2x64xbf16> to vector<2x64xf32>
    %23 = arith.addf %19, %22 : vector<2x64xf32>
    %cst_25 = arith.constant 0.000000e+00 : f32
    %24 = vector.broadcast %cst_25 : f32 to vector<2x64xf32>
    %25 = arith.maximumf %23, %24 : vector<2x64xf32>
    %26 = arith.truncf %25 : vector<2x64xf32> to vector<2x64xbf16>
    %c0_26 = arith.constant 0 : index
    %c0_27 = arith.constant 0 : index
    %c0_28 = arith.constant 0 : index
    %27 = vector.load %arg4[%c0_26, %c0_27, %c0_28] : memref<2x2x64xbf16, #tpu.memory_space<vmem>>, vector<1x2x64xbf16>
    %28 = vector.shape_cast %27 : vector<1x2x64xbf16> to vector<2x64xbf16>
    %29 = vector.shape_cast %26 : vector<2x64xbf16> to vector<1x2x64xbf16>
    tpu.vector_store %arg4[%c0_26, %c0_27, %c0_28], %29 {strides = array<i32>} : memref<2x2x64xbf16, #tpu.memory_space<vmem>>, vector<1x2x64xbf16>,
    %c0_29 = arith.constant 0 : index
    %c1_30 = arith.constant 1 : index
    %c0_31 = arith.constant 0 : index
    %c0_32 = arith.constant 0 : index
    %30 = vector.load %arg0[%c0_29, %c1_30, %c0_31, %c0_32] : memref<1x2x4x128xbf16, #tpu.memory_space<vmem>>, vector<1x1x2x128xbf16>
    %31 = vector.shape_cast %30 : vector<1x1x2x128xbf16> to vector<2x128xbf16>
    %c0_33 = arith.constant 0 : index
    %c0_34 = arith.constant 0 : index
    %c0_35 = arith.constant 0 : index
    %32 = vector.load %arg1[%c0_33, %c0_34, %c0_35] : memref<3x128x64xbf16, #tpu.memory_space<vmem>>, vector<1x128x64xbf16>
    %33 = vector.shape_cast %32 : vector<1x128x64xbf16> to vector<128x64xbf16>
    %cst_36 = arith.constant dense<0.000000e+00> : vector<2x64xf32>
    %34 = tpu.matmul %31, %33, %cst_36 {dimension_numbers = #tpu.dot_dimension_numbers<[1], [0], [0], [1], [0, 0, 1, 1], [], []>} : vector<2x128xbf16>, vector<128x64xbf16>, vector<2x64xf32> -> vector<2x64xf32>
    %c0_37 = arith.constant 0 : index
    %c1_38 = arith.constant 1 : index
    %c1_39 = arith.constant 1 : index
    %c0_40 = arith.constant 0 : index
    %35 = vector.load %arg0[%c0_37, %c1_38, %c1_39, %c0_40] : memref<1x2x4x128xbf16, #tpu.memory_space<vmem>>, vector<1x1x2x128xbf16>
    %36 = vector.shape_cast %35 : vector<1x1x2x128xbf16> to vector<2x128xbf16>
    %c1_41 = arith.constant 1 : index
    %c0_42 = arith.constant 0 : index
    %c0_43 = arith.constant 0 : index
    %37 = vector.load %arg1[%c1_41, %c0_42, %c0_43] : memref<3x128x64xbf16, #tpu.memory_space<vmem>>, vector<1x128x64xbf16>
    %38 = vector.shape_cast %37 : vector<1x128x64xbf16> to vector<128x64xbf16>
    %cst_44 = arith.constant dense<0.000000e+00> : vector<2x64xf32>
    %39 = tpu.matmul %36, %38, %cst_44 {dimension_numbers = #tpu.dot_dimension_numbers<[1], [0], [0], [1], [0, 0, 1, 1], [], []>} : vector<2x128xbf16>, vector<128x64xbf16>, vector<2x64xf32> -> vector<2x64xf32>
    %40 = arith.addf %34, %39 : vector<2x64xf32>
    %c0_45 = arith.constant 0 : index
    %c1_46 = arith.constant 1 : index
    %c2_47 = arith.constant 2 : index
    %c0_48 = arith.constant 0 : index
    %41 = vector.load %arg0[%c0_45, %c1_46, %c2_47, %c0_48] : memref<1x2x4x128xbf16, #tpu.memory_space<vmem>>, vector<1x1x2x128xbf16>
    %42 = vector.shape_cast %41 : vector<1x1x2x128xbf16> to vector<2x128xbf16>
    %c2_49 = arith.constant 2 : index
    %c0_50 = arith.constant 0 : index
    %c0_51 = arith.constant 0 : index
    %43 = vector.load %arg1[%c2_49, %c0_50, %c0_51] : memref<3x128x64xbf16, #tpu.memory_space<vmem>>, vector<1x128x64xbf16>
    %44 = vector.shape_cast %43 : vector<1x128x64xbf16> to vector<128x64xbf16>
    %cst_52 = arith.constant dense<0.000000e+00> : vector<2x64xf32>
    %45 = tpu.matmul %42, %44, %cst_52 {dimension_numbers = #tpu.dot_dimension_numbers<[1], [0], [0], [1], [0, 0, 1, 1], [], []>} : vector<2x128xbf16>, vector<128x64xbf16>, vector<2x64xf32> -> vector<2x64xf32>
    %46 = arith.addf %40, %45 : vector<2x64xf32>
    %c0_53 = arith.constant 0 : index
    %c0_54 = arith.constant 0 : index
    %47 = vector.load %arg2[%c0_53, %c0_54] : memref<1x64xf32, #tpu.memory_space<vmem>>, vector<1x64xf32>
    %48 = vector.broadcast %47 : vector<1x64xf32> to vector<2x64xf32>
    %49 = arith.addf %46, %48 : vector<2x64xf32>
    %c1_55 = arith.constant 1 : index
    %c0_56 = arith.constant 0 : index
    %c0_57 = arith.constant 0 : index
    %50 = vector.load %arg3[%c1_55, %c0_56, %c0_57] : memref<2x2x64xbf16, #tpu.memory_space<vmem>>, vector<1x2x64xbf16>
    %51 = vector.shape_cast %50 : vector<1x2x64xbf16> to vector<2x64xbf16>
    %52 = arith.extf %51 : vector<2x64xbf16> to vector<2x64xf32>
    %53 = arith.addf %49, %52 : vector<2x64xf32>
    %cst_58 = arith.constant 0.000000e+00 : f32
    %54 = vector.broadcast %cst_58 : f32 to vector<2x64xf32>
    %55 = arith.maximumf %53, %54 : vector<2x64xf32>
    %56 = arith.truncf %55 : vector<2x64xf32> to vector<2x64xbf16>
    %c1_59 = arith.constant 1 : index
    %c0_60 = arith.constant 0 : index
    %c0_61 = arith.constant 0 : index
    %57 = vector.load %arg4[%c1_59, %c0_60, %c0_61] : memref<2x2x64xbf16, #tpu.memory_space<vmem>>, vector<1x2x64xbf16>
    %58 = vector.shape_cast %57 : vector<1x2x64xbf16> to vector<2x64xbf16>
    %59 = vector.shape_cast %56 : vector<2x64xbf16> to vector<1x2x64xbf16>
    tpu.vector_store %arg4[%c1_59, %c0_60, %c0_61], %59 {strides = array<i32>} : memref<2x2x64xbf16, #tpu.memory_space<vmem>>, vector<1x2x64xbf16>,
    return
  }
}

module attributes {stable_mosaic.version = 11 : i64} {
  func.func @_fused_conv_kernel(%arg0: memref<2x2x2x128xbf16, #tpu.memory_space<vmem>>, %arg1: memref<3x128x64xbf16, #tpu.memory_space<vmem>>, %arg2: memref<1x64xf32, #tpu.memory_space<vmem>>, %arg3: memref<128x64xbf16, #tpu.memory_space<vmem>>, %arg4: memref<1x64xf32, #tpu.memory_space<vmem>>, %arg5: memref<2x1x64xbf16, #tpu.memory_space<vmem>>, %arg6: memref<2x1x64xbf16, #tpu.memory_space<vmem>>) attributes {dimension_semantics = [], scalar_prefetch = 0 : i64, scratch_operands = 0 : i64, tpu.core_type = #tpu.core_type<tc>} {
    %c0 = arith.constant 0 : index
    %c0_0 = arith.constant 0 : index
    %c0_1 = arith.constant 0 : index
    %c0_2 = arith.constant 0 : index
    %0 = vector.load %arg0[%c0, %c0_0, %c0_1, %c0_2] : memref<2x2x2x128xbf16, #tpu.memory_space<vmem>>, vector<1x1x1x128xbf16>
    %1 = vector.shape_cast %0 : vector<1x1x1x128xbf16> to vector<1x128xbf16>
    %c0_3 = arith.constant 0 : index
    %c0_4 = arith.constant 0 : index
    %c0_5 = arith.constant 0 : index
    %2 = vector.load %arg1[%c0_3, %c0_4, %c0_5] : memref<3x128x64xbf16, #tpu.memory_space<vmem>>, vector<1x128x64xbf16>
    %3 = vector.shape_cast %2 : vector<1x128x64xbf16> to vector<128x64xbf16>
    %cst = arith.constant dense<0.000000e+00> : vector<1x64xf32>
    %4 = tpu.matmul %1, %3, %cst {dimension_numbers = #tpu.dot_dimension_numbers<[1], [0], [0], [1], [0, 0, 1, 1], [], []>} : vector<1x128xbf16>, vector<128x64xbf16>, vector<1x64xf32> -> vector<1x64xf32>
    %c1 = arith.constant 1 : index
    %c0_6 = arith.constant 0 : index
    %c0_7 = arith.constant 0 : index
    %c0_8 = arith.constant 0 : index
    %5 = vector.load %arg0[%c1, %c0_6, %c0_7, %c0_8] : memref<2x2x2x128xbf16, #tpu.memory_space<vmem>>, vector<1x1x1x128xbf16>
    %6 = vector.shape_cast %5 : vector<1x1x1x128xbf16> to vector<1x128xbf16>
    %c1_9 = arith.constant 1 : index
    %c0_10 = arith.constant 0 : index
    %c0_11 = arith.constant 0 : index
    %7 = vector.load %arg1[%c1_9, %c0_10, %c0_11] : memref<3x128x64xbf16, #tpu.memory_space<vmem>>, vector<1x128x64xbf16>
    %8 = vector.shape_cast %7 : vector<1x128x64xbf16> to vector<128x64xbf16>
    %cst_12 = arith.constant dense<0.000000e+00> : vector<1x64xf32>
    %9 = tpu.matmul %6, %8, %cst_12 {dimension_numbers = #tpu.dot_dimension_numbers<[1], [0], [0], [1], [0, 0, 1, 1], [], []>} : vector<1x128xbf16>, vector<128x64xbf16>, vector<1x64xf32> -> vector<1x64xf32>
    %10 = arith.addf %4, %9 : vector<1x64xf32>
    %c0_13 = arith.constant 0 : index
    %c0_14 = arith.constant 0 : index
    %c1_15 = arith.constant 1 : index
    %c0_16 = arith.constant 0 : index
    %11 = vector.load %arg0[%c0_13, %c0_14, %c1_15, %c0_16] : memref<2x2x2x128xbf16, #tpu.memory_space<vmem>>, vector<1x1x1x128xbf16>
    %12 = vector.shape_cast %11 : vector<1x1x1x128xbf16> to vector<1x128xbf16>
    %c2 = arith.constant 2 : index
    %c0_17 = arith.constant 0 : index
    %c0_18 = arith.constant 0 : index
    %13 = vector.load %arg1[%c2, %c0_17, %c0_18] : memref<3x128x64xbf16, #tpu.memory_space<vmem>>, vector<1x128x64xbf16>
    %14 = vector.shape_cast %13 : vector<1x128x64xbf16> to vector<128x64xbf16>
    %cst_19 = arith.constant dense<0.000000e+00> : vector<1x64xf32>
    %15 = tpu.matmul %12, %14, %cst_19 {dimension_numbers = #tpu.dot_dimension_numbers<[1], [0], [0], [1], [0, 0, 1, 1], [], []>} : vector<1x128xbf16>, vector<128x64xbf16>, vector<1x64xf32> -> vector<1x64xf32>
    %16 = arith.addf %10, %15 : vector<1x64xf32>
    %c0_20 = arith.constant 0 : index
    %c0_21 = arith.constant 0 : index
    %17 = vector.load %arg2[%c0_20, %c0_21] : memref<1x64xf32, #tpu.memory_space<vmem>>, vector<1x64xf32>
    %18 = arith.addf %16, %17 : vector<1x64xf32>
    %cst_22 = arith.constant 0.000000e+00 : f32
    %19 = vector.broadcast %cst_22 : f32 to vector<1x64xf32>
    %20 = arith.maximumf %18, %19 : vector<1x64xf32>
    %21 = arith.truncf %20 : vector<1x64xf32> to vector<1x64xbf16>
    %c0_23 = arith.constant 0 : index
    %c0_24 = arith.constant 0 : index
    %c0_25 = arith.constant 0 : index
    %22 = vector.load %arg5[%c0_23, %c0_24, %c0_25] : memref<2x1x64xbf16, #tpu.memory_space<vmem>>, vector<1x1x64xbf16>
    %23 = vector.shape_cast %22 : vector<1x1x64xbf16> to vector<1x64xbf16>
    %24 = vector.shape_cast %21 : vector<1x64xbf16> to vector<1x1x64xbf16>
    tpu.vector_store %arg5[%c0_23, %c0_24, %c0_25], %24 {strides = array<i32>} : memref<2x1x64xbf16, #tpu.memory_space<vmem>>, vector<1x1x64xbf16>,
    %c1_26 = arith.constant 1 : index
    %c0_27 = arith.constant 0 : index
    %c0_28 = arith.constant 0 : index
    %c0_29 = arith.constant 0 : index
    %25 = vector.load %arg0[%c1_26, %c0_27, %c0_28, %c0_29] : memref<2x2x2x128xbf16, #tpu.memory_space<vmem>>, vector<1x1x1x128xbf16>
    %26 = vector.shape_cast %25 : vector<1x1x1x128xbf16> to vector<1x128xbf16>
    %c0_30 = arith.constant 0 : index
    %c0_31 = arith.constant 0 : index
    %27 = vector.load %arg3[%c0_30, %c0_31] : memref<128x64xbf16, #tpu.memory_space<vmem>>, vector<128x64xbf16>
    %cst_32 = arith.constant dense<0.000000e+00> : vector<1x64xf32>
    %28 = tpu.matmul %26, %27, %cst_32 {dimension_numbers = #tpu.dot_dimension_numbers<[1], [0], [0], [1], [0, 0, 1, 1], [], []>} : vector<1x128xbf16>, vector<128x64xbf16>, vector<1x64xf32> -> vector<1x64xf32>
    %c0_33 = arith.constant 0 : index
    %c0_34 = arith.constant 0 : index
    %29 = vector.load %arg4[%c0_33, %c0_34] : memref<1x64xf32, #tpu.memory_space<vmem>>, vector<1x64xf32>
    %30 = arith.addf %28, %29 : vector<1x64xf32>
    %31 = arith.truncf %30 : vector<1x64xf32> to vector<1x64xbf16>
    %c0_35 = arith.constant 0 : index
    %c0_36 = arith.constant 0 : index
    %c0_37 = arith.constant 0 : index
    %32 = vector.load %arg6[%c0_35, %c0_36, %c0_37] : memref<2x1x64xbf16, #tpu.memory_space<vmem>>, vector<1x1x64xbf16>
    %33 = vector.shape_cast %32 : vector<1x1x64xbf16> to vector<1x64xbf16>
    %34 = vector.shape_cast %31 : vector<1x64xbf16> to vector<1x1x64xbf16>
    tpu.vector_store %arg6[%c0_35, %c0_36, %c0_37], %34 {strides = array<i32>} : memref<2x1x64xbf16, #tpu.memory_space<vmem>>, vector<1x1x64xbf16>,
    %c0_38 = arith.constant 0 : index
    %c1_39 = arith.constant 1 : index
    %c0_40 = arith.constant 0 : index
    %c0_41 = arith.constant 0 : index
    %35 = vector.load %arg0[%c0_38, %c1_39, %c0_40, %c0_41] : memref<2x2x2x128xbf16, #tpu.memory_space<vmem>>, vector<1x1x1x128xbf16>
    %36 = vector.shape_cast %35 : vector<1x1x1x128xbf16> to vector<1x128xbf16>
    %c0_42 = arith.constant 0 : index
    %c0_43 = arith.constant 0 : index
    %c0_44 = arith.constant 0 : index
    %37 = vector.load %arg1[%c0_42, %c0_43, %c0_44] : memref<3x128x64xbf16, #tpu.memory_space<vmem>>, vector<1x128x64xbf16>
    %38 = vector.shape_cast %37 : vector<1x128x64xbf16> to vector<128x64xbf16>
    %cst_45 = arith.constant dense<0.000000e+00> : vector<1x64xf32>
    %39 = tpu.matmul %36, %38, %cst_45 {dimension_numbers = #tpu.dot_dimension_numbers<[1], [0], [0], [1], [0, 0, 1, 1], [], []>} : vector<1x128xbf16>, vector<128x64xbf16>, vector<1x64xf32> -> vector<1x64xf32>
    %c1_46 = arith.constant 1 : index
    %c1_47 = arith.constant 1 : index
    %c0_48 = arith.constant 0 : index
    %c0_49 = arith.constant 0 : index
    %40 = vector.load %arg0[%c1_46, %c1_47, %c0_48, %c0_49] : memref<2x2x2x128xbf16, #tpu.memory_space<vmem>>, vector<1x1x1x128xbf16>
    %41 = vector.shape_cast %40 : vector<1x1x1x128xbf16> to vector<1x128xbf16>
    %c1_50 = arith.constant 1 : index
    %c0_51 = arith.constant 0 : index
    %c0_52 = arith.constant 0 : index
    %42 = vector.load %arg1[%c1_50, %c0_51, %c0_52] : memref<3x128x64xbf16, #tpu.memory_space<vmem>>, vector<1x128x64xbf16>
    %43 = vector.shape_cast %42 : vector<1x128x64xbf16> to vector<128x64xbf16>
    %cst_53 = arith.constant dense<0.000000e+00> : vector<1x64xf32>
    %44 = tpu.matmul %41, %43, %cst_53 {dimension_numbers = #tpu.dot_dimension_numbers<[1], [0], [0], [1], [0, 0, 1, 1], [], []>} : vector<1x128xbf16>, vector<128x64xbf16>, vector<1x64xf32> -> vector<1x64xf32>
    %45 = arith.addf %39, %44 : vector<1x64xf32>
    %c0_54 = arith.constant 0 : index
    %c1_55 = arith.constant 1 : index
    %c1_56 = arith.constant 1 : index
    %c0_57 = arith.constant 0 : index
    %46 = vector.load %arg0[%c0_54, %c1_55, %c1_56, %c0_57] : memref<2x2x2x128xbf16, #tpu.memory_space<vmem>>, vector<1x1x1x128xbf16>
    %47 = vector.shape_cast %46 : vector<1x1x1x128xbf16> to vector<1x128xbf16>
    %c2_58 = arith.constant 2 : index
    %c0_59 = arith.constant 0 : index
    %c0_60 = arith.constant 0 : index
    %48 = vector.load %arg1[%c2_58, %c0_59, %c0_60] : memref<3x128x64xbf16, #tpu.memory_space<vmem>>, vector<1x128x64xbf16>
    %49 = vector.shape_cast %48 : vector<1x128x64xbf16> to vector<128x64xbf16>
    %cst_61 = arith.constant dense<0.000000e+00> : vector<1x64xf32>
    %50 = tpu.matmul %47, %49, %cst_61 {dimension_numbers = #tpu.dot_dimension_numbers<[1], [0], [0], [1], [0, 0, 1, 1], [], []>} : vector<1x128xbf16>, vector<128x64xbf16>, vector<1x64xf32> -> vector<1x64xf32>
    %51 = arith.addf %45, %50 : vector<1x64xf32>
    %c0_62 = arith.constant 0 : index
    %c0_63 = arith.constant 0 : index
    %52 = vector.load %arg2[%c0_62, %c0_63] : memref<1x64xf32, #tpu.memory_space<vmem>>, vector<1x64xf32>
    %53 = arith.addf %51, %52 : vector<1x64xf32>
    %cst_64 = arith.constant 0.000000e+00 : f32
    %54 = vector.broadcast %cst_64 : f32 to vector<1x64xf32>
    %55 = arith.maximumf %53, %54 : vector<1x64xf32>
    %56 = arith.truncf %55 : vector<1x64xf32> to vector<1x64xbf16>
    %c1_65 = arith.constant 1 : index
    %c0_66 = arith.constant 0 : index
    %c0_67 = arith.constant 0 : index
    %57 = vector.load %arg5[%c1_65, %c0_66, %c0_67] : memref<2x1x64xbf16, #tpu.memory_space<vmem>>, vector<1x1x64xbf16>
    %58 = vector.shape_cast %57 : vector<1x1x64xbf16> to vector<1x64xbf16>
    %59 = vector.shape_cast %56 : vector<1x64xbf16> to vector<1x1x64xbf16>
    tpu.vector_store %arg5[%c1_65, %c0_66, %c0_67], %59 {strides = array<i32>} : memref<2x1x64xbf16, #tpu.memory_space<vmem>>, vector<1x1x64xbf16>,
    %c1_68 = arith.constant 1 : index
    %c1_69 = arith.constant 1 : index
    %c0_70 = arith.constant 0 : index
    %c0_71 = arith.constant 0 : index
    %60 = vector.load %arg0[%c1_68, %c1_69, %c0_70, %c0_71] : memref<2x2x2x128xbf16, #tpu.memory_space<vmem>>, vector<1x1x1x128xbf16>
    %61 = vector.shape_cast %60 : vector<1x1x1x128xbf16> to vector<1x128xbf16>
    %c0_72 = arith.constant 0 : index
    %c0_73 = arith.constant 0 : index
    %62 = vector.load %arg3[%c0_72, %c0_73] : memref<128x64xbf16, #tpu.memory_space<vmem>>, vector<128x64xbf16>
    %cst_74 = arith.constant dense<0.000000e+00> : vector<1x64xf32>
    %63 = tpu.matmul %61, %62, %cst_74 {dimension_numbers = #tpu.dot_dimension_numbers<[1], [0], [0], [1], [0, 0, 1, 1], [], []>} : vector<1x128xbf16>, vector<128x64xbf16>, vector<1x64xf32> -> vector<1x64xf32>
    %c0_75 = arith.constant 0 : index
    %c0_76 = arith.constant 0 : index
    %64 = vector.load %arg4[%c0_75, %c0_76] : memref<1x64xf32, #tpu.memory_space<vmem>>, vector<1x64xf32>
    %65 = arith.addf %63, %64 : vector<1x64xf32>
    %66 = arith.truncf %65 : vector<1x64xf32> to vector<1x64xbf16>
    %c1_77 = arith.constant 1 : index
    %c0_78 = arith.constant 0 : index
    %c0_79 = arith.constant 0 : index
    %67 = vector.load %arg6[%c1_77, %c0_78, %c0_79] : memref<2x1x64xbf16, #tpu.memory_space<vmem>>, vector<1x1x64xbf16>
    %68 = vector.shape_cast %67 : vector<1x1x64xbf16> to vector<1x64xbf16>
    %69 = vector.shape_cast %66 : vector<1x64xbf16> to vector<1x1x64xbf16>
    tpu.vector_store %arg6[%c1_77, %c0_78, %c0_79], %69 {strides = array<i32>} : memref<2x1x64xbf16, #tpu.memory_space<vmem>>, vector<1x1x64xbf16>,
    return
  }
}

module attributes {stable_mosaic.version = 11 : i64} {
  func.func @_fused_conv_kernel(%arg0: memref<1x2x3x192xbf16, #tpu.memory_space<vmem>>, %arg1: memref<3x192x64xbf16, #tpu.memory_space<vmem>>, %arg2: memref<1x64xf32, #tpu.memory_space<vmem>>, %arg3: memref<2x1x64xbf16, #tpu.memory_space<vmem>>, %arg4: memref<2x1x64xbf16, #tpu.memory_space<vmem>>) attributes {dimension_semantics = [], scalar_prefetch = 0 : i64, scratch_operands = 0 : i64, tpu.core_type = #tpu.core_type<tc>} {
    %c0 = arith.constant 0 : index
    %c0_0 = arith.constant 0 : index
    %c0_1 = arith.constant 0 : index
    %c0_2 = arith.constant 0 : index
    %0 = vector.load %arg0[%c0, %c0_0, %c0_1, %c0_2] : memref<1x2x3x192xbf16, #tpu.memory_space<vmem>>, vector<1x1x1x192xbf16>
    %1 = vector.shape_cast %0 : vector<1x1x1x192xbf16> to vector<1x192xbf16>
    %c0_3 = arith.constant 0 : index
    %c0_4 = arith.constant 0 : index
    %c0_5 = arith.constant 0 : index
    %2 = vector.load %arg1[%c0_3, %c0_4, %c0_5] : memref<3x192x64xbf16, #tpu.memory_space<vmem>>, vector<1x192x64xbf16>
    %3 = vector.shape_cast %2 : vector<1x192x64xbf16> to vector<192x64xbf16>
    %cst = arith.constant dense<0.000000e+00> : vector<1x64xf32>
    %4 = tpu.matmul %1, %3, %cst {dimension_numbers = #tpu.dot_dimension_numbers<[1], [0], [0], [1], [0, 0, 1, 1], [], []>} : vector<1x192xbf16>, vector<192x64xbf16>, vector<1x64xf32> -> vector<1x64xf32>
    %c0_6 = arith.constant 0 : index
    %c0_7 = arith.constant 0 : index
    %c1 = arith.constant 1 : index
    %c0_8 = arith.constant 0 : index
    %5 = vector.load %arg0[%c0_6, %c0_7, %c1, %c0_8] : memref<1x2x3x192xbf16, #tpu.memory_space<vmem>>, vector<1x1x1x192xbf16>
    %6 = vector.shape_cast %5 : vector<1x1x1x192xbf16> to vector<1x192xbf16>
    %c1_9 = arith.constant 1 : index
    %c0_10 = arith.constant 0 : index
    %c0_11 = arith.constant 0 : index
    %7 = vector.load %arg1[%c1_9, %c0_10, %c0_11] : memref<3x192x64xbf16, #tpu.memory_space<vmem>>, vector<1x192x64xbf16>
    %8 = vector.shape_cast %7 : vector<1x192x64xbf16> to vector<192x64xbf16>
    %cst_12 = arith.constant dense<0.000000e+00> : vector<1x64xf32>
    %9 = tpu.matmul %6, %8, %cst_12 {dimension_numbers = #tpu.dot_dimension_numbers<[1], [0], [0], [1], [0, 0, 1, 1], [], []>} : vector<1x192xbf16>, vector<192x64xbf16>, vector<1x64xf32> -> vector<1x64xf32>
    %10 = arith.addf %4, %9 : vector<1x64xf32>
    %c0_13 = arith.constant 0 : index
    %c0_14 = arith.constant 0 : index
    %c2 = arith.constant 2 : index
    %c0_15 = arith.constant 0 : index
    %11 = vector.load %arg0[%c0_13, %c0_14, %c2, %c0_15] : memref<1x2x3x192xbf16, #tpu.memory_space<vmem>>, vector<1x1x1x192xbf16>
    %12 = vector.shape_cast %11 : vector<1x1x1x192xbf16> to vector<1x192xbf16>
    %c2_16 = arith.constant 2 : index
    %c0_17 = arith.constant 0 : index
    %c0_18 = arith.constant 0 : index
    %13 = vector.load %arg1[%c2_16, %c0_17, %c0_18] : memref<3x192x64xbf16, #tpu.memory_space<vmem>>, vector<1x192x64xbf16>
    %14 = vector.shape_cast %13 : vector<1x192x64xbf16> to vector<192x64xbf16>
    %cst_19 = arith.constant dense<0.000000e+00> : vector<1x64xf32>
    %15 = tpu.matmul %12, %14, %cst_19 {dimension_numbers = #tpu.dot_dimension_numbers<[1], [0], [0], [1], [0, 0, 1, 1], [], []>} : vector<1x192xbf16>, vector<192x64xbf16>, vector<1x64xf32> -> vector<1x64xf32>
    %16 = arith.addf %10, %15 : vector<1x64xf32>
    %c0_20 = arith.constant 0 : index
    %c0_21 = arith.constant 0 : index
    %17 = vector.load %arg2[%c0_20, %c0_21] : memref<1x64xf32, #tpu.memory_space<vmem>>, vector<1x64xf32>
    %18 = arith.addf %16, %17 : vector<1x64xf32>
    %c0_22 = arith.constant 0 : index
    %c0_23 = arith.constant 0 : index
    %c0_24 = arith.constant 0 : index
    %19 = vector.load %arg3[%c0_22, %c0_23, %c0_24] : memref<2x1x64xbf16, #tpu.memory_space<vmem>>, vector<1x1x64xbf16>
    %20 = vector.shape_cast %19 : vector<1x1x64xbf16> to vector<1x64xbf16>
    %21 = arith.extf %20 : vector<1x64xbf16> to vector<1x64xf32>
    %22 = arith.addf %18, %21 : vector<1x64xf32>
    %cst_25 = arith.constant 0.000000e+00 : f32
    %23 = vector.broadcast %cst_25 : f32 to vector<1x64xf32>
    %24 = arith.maximumf %22, %23 : vector<1x64xf32>
    %25 = arith.truncf %24 : vector<1x64xf32> to vector<1x64xbf16>
    %c0_26 = arith.constant 0 : index
    %c0_27 = arith.constant 0 : index
    %c0_28 = arith.constant 0 : index
    %26 = vector.load %arg4[%c0_26, %c0_27, %c0_28] : memref<2x1x64xbf16, #tpu.memory_space<vmem>>, vector<1x1x64xbf16>
    %27 = vector.shape_cast %26 : vector<1x1x64xbf16> to vector<1x64xbf16>
    %28 = vector.shape_cast %25 : vector<1x64xbf16> to vector<1x1x64xbf16>
    tpu.vector_store %arg4[%c0_26, %c0_27, %c0_28], %28 {strides = array<i32>} : memref<2x1x64xbf16, #tpu.memory_space<vmem>>, vector<1x1x64xbf16>,
    %c0_29 = arith.constant 0 : index
    %c1_30 = arith.constant 1 : index
    %c0_31 = arith.constant 0 : index
    %c0_32 = arith.constant 0 : index
    %29 = vector.load %arg0[%c0_29, %c1_30, %c0_31, %c0_32] : memref<1x2x3x192xbf16, #tpu.memory_space<vmem>>, vector<1x1x1x192xbf16>
    %30 = vector.shape_cast %29 : vector<1x1x1x192xbf16> to vector<1x192xbf16>
    %c0_33 = arith.constant 0 : index
    %c0_34 = arith.constant 0 : index
    %c0_35 = arith.constant 0 : index
    %31 = vector.load %arg1[%c0_33, %c0_34, %c0_35] : memref<3x192x64xbf16, #tpu.memory_space<vmem>>, vector<1x192x64xbf16>
    %32 = vector.shape_cast %31 : vector<1x192x64xbf16> to vector<192x64xbf16>
    %cst_36 = arith.constant dense<0.000000e+00> : vector<1x64xf32>
    %33 = tpu.matmul %30, %32, %cst_36 {dimension_numbers = #tpu.dot_dimension_numbers<[1], [0], [0], [1], [0, 0, 1, 1], [], []>} : vector<1x192xbf16>, vector<192x64xbf16>, vector<1x64xf32> -> vector<1x64xf32>
    %c0_37 = arith.constant 0 : index
    %c1_38 = arith.constant 1 : index
    %c1_39 = arith.constant 1 : index
    %c0_40 = arith.constant 0 : index
    %34 = vector.load %arg0[%c0_37, %c1_38, %c1_39, %c0_40] : memref<1x2x3x192xbf16, #tpu.memory_space<vmem>>, vector<1x1x1x192xbf16>
    %35 = vector.shape_cast %34 : vector<1x1x1x192xbf16> to vector<1x192xbf16>
    %c1_41 = arith.constant 1 : index
    %c0_42 = arith.constant 0 : index
    %c0_43 = arith.constant 0 : index
    %36 = vector.load %arg1[%c1_41, %c0_42, %c0_43] : memref<3x192x64xbf16, #tpu.memory_space<vmem>>, vector<1x192x64xbf16>
    %37 = vector.shape_cast %36 : vector<1x192x64xbf16> to vector<192x64xbf16>
    %cst_44 = arith.constant dense<0.000000e+00> : vector<1x64xf32>
    %38 = tpu.matmul %35, %37, %cst_44 {dimension_numbers = #tpu.dot_dimension_numbers<[1], [0], [0], [1], [0, 0, 1, 1], [], []>} : vector<1x192xbf16>, vector<192x64xbf16>, vector<1x64xf32> -> vector<1x64xf32>
    %39 = arith.addf %33, %38 : vector<1x64xf32>
    %c0_45 = arith.constant 0 : index
    %c1_46 = arith.constant 1 : index
    %c2_47 = arith.constant 2 : index
    %c0_48 = arith.constant 0 : index
    %40 = vector.load %arg0[%c0_45, %c1_46, %c2_47, %c0_48] : memref<1x2x3x192xbf16, #tpu.memory_space<vmem>>, vector<1x1x1x192xbf16>
    %41 = vector.shape_cast %40 : vector<1x1x1x192xbf16> to vector<1x192xbf16>
    %c2_49 = arith.constant 2 : index
    %c0_50 = arith.constant 0 : index
    %c0_51 = arith.constant 0 : index
    %42 = vector.load %arg1[%c2_49, %c0_50, %c0_51] : memref<3x192x64xbf16, #tpu.memory_space<vmem>>, vector<1x192x64xbf16>
    %43 = vector.shape_cast %42 : vector<1x192x64xbf16> to vector<192x64xbf16>
    %cst_52 = arith.constant dense<0.000000e+00> : vector<1x64xf32>
    %44 = tpu.matmul %41, %43, %cst_52 {dimension_numbers = #tpu.dot_dimension_numbers<[1], [0], [0], [1], [0, 0, 1, 1], [], []>} : vector<1x192xbf16>, vector<192x64xbf16>, vector<1x64xf32> -> vector<1x64xf32>
    %45 = arith.addf %39, %44 : vector<1x64xf32>
    %c0_53 = arith.constant 0 : index
    %c0_54 = arith.constant 0 : index
    %46 = vector.load %arg2[%c0_53, %c0_54] : memref<1x64xf32, #tpu.memory_space<vmem>>, vector<1x64xf32>
    %47 = arith.addf %45, %46 : vector<1x64xf32>
    %c1_55 = arith.constant 1 : index
    %c0_56 = arith.constant 0 : index
    %c0_57 = arith.constant 0 : index
    %48 = vector.load %arg3[%c1_55, %c0_56, %c0_57] : memref<2x1x64xbf16, #tpu.memory_space<vmem>>, vector<1x1x64xbf16>
    %49 = vector.shape_cast %48 : vector<1x1x64xbf16> to vector<1x64xbf16>
    %50 = arith.extf %49 : vector<1x64xbf16> to vector<1x64xf32>
    %51 = arith.addf %47, %50 : vector<1x64xf32>
    %cst_58 = arith.constant 0.000000e+00 : f32
    %52 = vector.broadcast %cst_58 : f32 to vector<1x64xf32>
    %53 = arith.maximumf %51, %52 : vector<1x64xf32>
    %54 = arith.truncf %53 : vector<1x64xf32> to vector<1x64xbf16>
    %c1_59 = arith.constant 1 : index
    %c0_60 = arith.constant 0 : index
    %c0_61 = arith.constant 0 : index
    %55 = vector.load %arg4[%c1_59, %c0_60, %c0_61] : memref<2x1x64xbf16, #tpu.memory_space<vmem>>, vector<1x1x64xbf16>
    %56 = vector.shape_cast %55 : vector<1x1x64xbf16> to vector<1x64xbf16>
    %57 = vector.shape_cast %54 : vector<1x64xbf16> to vector<1x1x64xbf16>
    tpu.vector_store %arg4[%c1_59, %c0_60, %c0_61], %57 {strides = array<i32>} : memref<2x1x64xbf16, #tpu.memory_space<vmem>>, vector<1x1x64xbf16>,
    return
  }
}

</mosaic_0001>

<bundles_post_ra>
// kernel: _lambda_.10
= control target key start
LH: loop header
LB: loop body
LE: loop exit
PB: predicated region body
PF: predicated region fallthrough
CT: control target
= control target key end

     0   :  { %v2688_v0 = vmov 0.0   ;;  %vm2689_vm0 = vmmov 0   ;;  %vm105_vm1 = vcmask 1040384   ;;  %vm101_vm2 = vcmask 932864   ;;  %s3341_s1 = inlined_call_operand.vmem [shape: bf16[7,114,128], index: 1, kind: input, shape index: {}]   ;;  %s3342_s0 = inlined_call_operand.vmem [shape: bf16[2,2,19,114], index: 0, kind: input, shape index: {}]   ;;  %s3343_s2 = inlined_call_operand.vmem [shape: f32[1,128], index: 2, kind: input, shape index: {}]   ;;  %s3344_s3 = inlined_call_operand.vmem [shape: bf16[2,16,128], index: 3, kind: output, shape index: {}]  }
   0x1   :  { %2276 = vmatprep.subr.bf16.mxu0 %v2688_v0  ;;  %2296 = vmatprep.subr.bf16.mxu1 %v2688_v0  ;;  %v2558_v1 = vld [vmem:[%s3341_s1 + $0x3c] sm:$0xff]   ;;  %v2560_v3 = vld [vmem:[%s3341_s1 + $0x44] sm:$0xff]   ;;  %v2562_v5 = vld [vmem:[%s3341_s1 + $0x4c] sm:$0xff]   ;;  %vm274_vm3 = vsmask.f32 7424  ;;  %vm534_vm4 = vcmask 1046528  }
   0x2   :  { %v2559_v2 = vld [vmem:[%s3341_s1] sm:$0xff]   ;;  %2292 = vmatprep.mubr.msk.bf16.mxu0 %vm2689_vm0, %v2688_v0  ;;  %2312 = vmatprep.mubr.msk.bf16.mxu1 %vm2689_vm0, %v2688_v0  ;;  %v2561_v4 = vld [vmem:[%s3341_s1 + $0x8] sm:$0xff]   ;;  %v2563_v6 = vld [vmem:[%s3341_s1 + $0x10] sm:$0xff]   ;;  %vm769_vm5 = vsmask.f32 6400 }
   0x3   :  { %2277 = vmatpush3.bf16.msra.mxu0 %v2558_v1  ;;  %2297 = vmatpush3.bf16.msra.mxu1 %v2559_v2  ;;  %v2564_v7 = vld [vmem:[%s3341_s1 + $0x54] sm:$0xff]   ;;  %v2566_v9 = vld [vmem:[%s3341_s1 + $0x5c] sm:$0xff]   ;;  %v2568_v11 = vld [vmem:[%s3341_s1 + $0x64] sm:$0xff]  }
   0x4   :  { %2278 = vmatprep.subr.bf16.mxu0 %v2688_v0  ;;  %2298 = vmatprep.subr.bf16.mxu1 %v2688_v0  ;;  %v2565_v8 = vld [vmem:[%s3341_s1 + $0x18] sm:$0xff]   ;;  %v2567_v10 = vld [vmem:[%s3341_s1 + $0x20] sm:$0xff]   ;;  %v2569_v12 = vld [vmem:[%s3341_s1 + $0x28] sm:$0xff]  }
   0x5   :  { %v2572_v13 = vld [vmem:[%s3341_s1 + $0x74] ss:$0 sps:$4 sm:$0x11]   ;;  %v2570_v14 = vld [vmem:[%s3341_s1 + $0x6c] sm:$0xff]   ;;  %v2574_v19 = vld [vmem:[%s3342_s0 + $0x18] sm:$0xff]  }
   0x6   :  { %v2573_v15 = vld [vmem:[%s3341_s1 + $0x38] ss:$0 sps:$4 sm:$0x11]   ;;  %v2571_v16 = vld [vmem:[%s3341_s1 + $0x30] sm:$0xff]   ;;  %v107_v17 = vsel %vm105_vm1, %v2572_v13, 0  ;;  %v2575_v20 = vld [vmem:[%s3342_s0] sm:$0xff]  }
   0x7   :  { %2279 = vmatpush3.bf16.msra.mxu0 %v2560_v3  ;;  %2299 = vmatpush3.bf16.msra.mxu1 %v2561_v4  ;;  %v204_v18 = vsel %vm105_vm1, %v2573_v15, 0  ;;  %v2576_v21 = vld [vmem:[%s3341_s1 + $0x78] sm:$0xff]   ;;  %v2578_v23 = vld [vmem:[%s3341_s1 + $0x80] sm:$0xff]   ;;  %v2580_v25 = vld [vmem:[%s3341_s1 + $0x88] sm:$0xff]  }
   0x8   :  { %2280 = vmatprep.subr.bf16.mxu0 %v2688_v0  ;;  %2300 = vmatprep.subr.bf16.mxu1 %v2688_v0  ;;  %v2577_v22 = vld [vmem:[%s3341_s1 + $0xb4] sm:$0xff]   ;;  %v2579_v24 = vld [vmem:[%s3341_s1 + $0xbc] sm:$0xff]   ;;  %v2581_v26 = vld [vmem:[%s3341_s1 + $0xc4] sm:$0xff]  }
   0x9   :  { %v2582_v27 = vld [vmem:[%s3341_s1 + $0x90] sm:$0xff]   ;;  %v247_v28 = vld [vmem:[%s3342_s0] sm:$0xf]  ;;  %v2825_v29 = vld [vmem:[%s3342_s0 + $0x4] sm:$0xf] }
   0xa   :  { %v2583_v30 = vld [vmem:[%s3341_s1 + $0xcc] sm:$0xff]   ;;  %v1847_v31 = vld [vmem:[%s3342_s0 + $0x18] sm:$0xf]  ;;  %v2836_v32 = vld [vmem:[%s3342_s0 + $0x1c] sm:$0xf]  ;;  %v1836_v33 = vcombine.low %v247_v28, %v2825_v29 }
   0xb   :  { %2281 = vmatpush3.bf16.msra.mxu0 %v2562_v5  ;;  %2301 = vmatpush3.bf16.msra.mxu1 %v2563_v6  ;;  %v2584_v34 = vld [vmem:[%s3341_s1 + $0x98] sm:$0xff]   ;;  %v1865_v35 = vcombine.low %v1847_v31, %v2836_v32  ;;  %v2852_v37 = vld [vmem:[%s3342_s0 + $0x8] ss:$0 sps:$4 sm:$0x11]   ;;  %v2586_v40 = vld [vmem:[%s3341_s1 + $0xa0] sm:$0xff]  }
   0xc   :  { %2282 = vmatprep.subr.bf16.mxu0 %v2688_v0  ;;  %2302 = vmatprep.subr.bf16.mxu1 %v2688_v0  ;;  %v2585_v36 = vld [vmem:[%s3341_s1 + $0xd4] sm:$0xff]   ;;  %v2858_v38 = vld [vmem:[%s3342_s0 + $0x20] ss:$0 sps:$4 sm:$0x11]   ;;  %v278_v39 = vshll.u32 %v1836_v33, 16  ;;  %v2588_v43 = vld [vmem:[%s3341_s1 + $0xa8] sm:$0xff]  }
   0xd   :  { %v411_v41 = vshll.u32 %v1865_v35, 16  ;;  %v2587_v42 = vld [vmem:[%s3341_s1 + $0xdc] sm:$0xff]   ;;  %v2589_v44 = vld [vmem:[%s3341_s1 + $0xe4] sm:$0xff]   ;;  %v2590_v45 = vld [vmem:[%s3341_s1 + $0xb0] ss:$0 sps:$4 sm:$0x11]  }
   0xe   :  { %v276_v46 = vshrl.u32 %v1836_v33, 16  ;;  %v280_v47 = vrot.slane %v278_v39, 1  ;;  %v283_v48 = vshll.u32 %v2852_v37, 16  ;;  %v409_v49 = vshrl.u32 %v1865_v35, 16  ;;  %v2596_v60 = vld [vmem:[%s3341_s1 + $0xf0] sm:$0xff]   ;;  %v2598_v63 = vld [vmem:[%s3341_s1 + $0xf8] sm:$0xff]  }
   0xf   :  { %2283 = vmatpush3.bf16.msra.mxu0 %v2564_v7  ;;  %2303 = vmatpush3.bf16.msra.mxu1 %v2565_v8  ;;  %v2591_v50 = vld [vmem:[%s3341_s1 + $0xec] ss:$0 sps:$4 sm:$0x11]   ;;  %v413_v51 = vrot.slane %v411_v41, 1  ;;  %v416_v52 = vshll.u32 %v2858_v38, 16  ;;  %v336_v55 = vsel %vm105_vm1, %v2590_v45, 0 }
  0x10   :  { %2284 = vmatprep.subr.bf16.mxu0 %v2688_v0  ;;  %2304 = vmatprep.subr.bf16.mxu1 %v2688_v0  ;;  %v281_v53 = vor.u32 %v280_v47, %v276_v46  ;;  %v285_v54 = vrot.slane %v283_v48, 1  ;;  %v469_v58 = vsel %vm105_vm1, %v2591_v50, 0  ;;  %v2597_v62 = vld [vmem:[%s3341_s1 + $0x12c] sm:$0xff]   ;;  %v2599_v1 = vld [vmem:[%s3341_s1 + $0x134] sm:$0xff]   ;;  %v2600_v2 = vld [vmem:[%s3341_s1 + $0x100] sm:$0xff]  }
  0x11   :  { %v414_v56 = vor.u32 %v413_v51, %v409_v49  ;;  %v418_v57 = vrot.slane %v416_v52, 1  ;;  %v2601_v3 = vld [vmem:[%s3341_s1 + $0x13c] sm:$0xff]   ;;  %v2602_v4 = vld [vmem:[%s3341_s1 + $0x108] sm:$0xff]   ;;  %v2604_v6 = vld [vmem:[%s3341_s1 + $0x110] sm:$0xff]  }
  0x12   :  { %v286_v59 = vsel %vm274_vm3, %v281_v53, %v285_v54  ;;  %v2603_v5 = vld [vmem:[%s3341_s1 + $0x144] sm:$0xff]   ;;  %v2605_v7 = vld [vmem:[%s3341_s1 + $0x14c] sm:$0xff]   ;;  %v2606_v8 = vld [vmem:[%s3341_s1 + $0x118] sm:$0xff]  }
  0x13   :  { %2285 = vmatpush3.bf16.msra.mxu0 %v2566_v9  ;;  %2305 = vmatpush3.bf16.msra.mxu1 %v2567_v10  ;;  %v419_v61 = vsel %vm274_vm3, %v414_v56, %v418_v57  ;;  %v514_v9 = vld [vmem:[%s3342_s0] sm:$0xe]  ;;  %v2607_v10 = vld [vmem:[%s3341_s1 + $0x154] sm:$0xff]   ;;  %v2611_v15 = vld [vmem:[%s3341_s1 + $0x164] ss:$0 sps:$4 sm:$0x11]  }
  0x14   :  { %2286 = vmatprep.subr.bf16.mxu0 %v2688_v0  ;;  %2306 = vmatprep.subr.bf16.mxu1 %v2688_v0  ;;  %v2954_v13 = vcombine.low %v514_v9, %v2825_v29  ;;  %v2616_v28 = vld [vmem:[%s3341_s1 + $0x170] sm:$0xff]   ;;  %v2617_v29 = vld [vmem:[%s3341_s1 + $0x44] sm:$0xff]   ;;  %v2628_v45 = vld [vmem:[%s3341_s1 + $0x1a0] ss:$0 sps:$4 sm:$0x11]  }
  0x15   :  { %v2619_v31 = vld [vmem:[%s3341_s1 + $0x4c] sm:$0xff]   ;;  %v2621_v33 = vld [vmem:[%s3341_s1 + $0x54] sm:$0xff]   ;;  %v836_v53 = vsel %vm105_vm1, %v2628_v45, 0  ;;  %v2631_v56 = vld [vmem:[%s3342_s0 + $0x24] sm:$0xff]  }
  0x16   :  { %v2622_v35 = vld [vmem:[%s3341_s1 + $0x188] sm:$0xff]   ;;  %v774_v39 = vshll.u32 %v2954_v13, 16  ;;  %v2629_v47 = vld [vmem:[%s3341_s1 + $0x74] ss:$0 sps:$4 sm:$0x11]   ;;  %v2632_v57 = vld [vmem:[%s3341_s1] sm:$0xff]  }
  0x17   :  { %2287 = vmatpush3.bf16.msra.mxu0 %v2568_v11  ;;  %2307 = vmatpush3.bf16.msra.mxu1 %v2569_v12  ;;  %v1901_v11 = vld [vmem:[%s3342_s0 + $0x18] sm:$0xe]  ;;  %v2610_v12 = vld [vmem:[%s3341_s1 + $0x128] ss:$0 sps:$4 sm:$0x11]   ;;  %v2627_v50 = vld [vmem:[%s3341_s1 + $0x6c] sm:$0xff]  }
  0x18   :  { %2288 = vmatprep.subr.bf16.mxu0 %v2688_v0  ;;  %2308 = vmatprep.subr.bf16.mxu1 %v2688_v0  ;;  %v776_v46 = vrot.slane %v774_v39, 2  ;;  %v992_v54 = vsel %vm105_vm1, %v2629_v47, 0  ;;  %v3123_v9 = vld [vmem:[%s3342_s0 + $0x14] ss:$0 sps:$4 sm:$0x11]  }
  0x19   :  { %v2665_v47 = vld [vmem:[%s3341_s1 + $0xec] ss:$0 sps:$4 sm:$0x11]  }
  0x1b   :  { %2289 = vmatpush3.bf16.msra.mxu0 %v2570_v14  ;;  %2309 = vmatpush3.bf16.msra.mxu1 %v2571_v16  ;;  %v2608_v14 = vld [vmem:[%s3341_s1 + $0x120] sm:$0xff]  }
  0x1c   :  { %2290 = vmatprep.subr.bf16.mxu0 %v2688_v0  ;;  %2310 = vmatprep.subr.bf16.mxu1 %v2688_v0  ;;  %v2609_v16 = vld [vmem:[%s3341_s1 + $0x15c] sm:$0xff]  }
  0x1f   :  { %2291 = vmatpush3.bf16.msra.mxu0 %v107_v17  ;;  %2311 = vmatpush3.bf16.msra.mxu1 %v204_v18  ;;  %v1917_v17 = vcombine.low %v1901_v11, %v2836_v32  ;;  %v535_v18 = vrot.slane %v2954_v13, 1  ;;  %v2620_v32 = vld [vmem:[%s3341_s1 + $0x180] sm:$0xff]   ;;  %v2644_v11 = vld [vmem:[%s3341_s1 + $0x30] sm:$0xff]  }
  0x20   :  { %2316 = vmatprep.subr.bf16.mxu0 %v2688_v0  ;;  %2336 = vmatprep.subr.bf16.mxu1 %v2688_v0 }
  0x22   :  { %2293 = vmatmul.mubr.msk.bf16.vlgmr.msra.gmra.mrb[0].mxu0 %vm101_vm2, %v2574_v19  ;;  %2313 = vmatmul.mubr.msk.bf16.vlgmr.msra.gmra.mrb[0].mxu1 %vm101_vm2, %v2575_v20  ;;  %v536_v19 = vrot.slane %v2852_v37, 1  ;;  %v587_v20 = vsel %vm105_vm1, %v2610_v12, 0  ;;  %v771_v37 = vshrl.u32 %v2954_v13, 16  ;;  %v2645_v12 = vld [vmem:[%s3341_s1 + $0xa8] sm:$0xff]  }
  0x23   :  { %2317 = vmatpush3.bf16.msra.mxu0 %v2576_v21  ;;  %2337 = vmatpush3.bf16.msra.mxu1 %v2577_v22  ;;  %v704_v21 = vsel %vm105_vm1, %v2611_v15, 0  ;;  %v652_v22 = vrot.slane %v1917_v17, 1  ;;  %v2646_v13 = vld [vmem:[%s3341_s1 + $0x38] ss:$0 sps:$4 sm:$0x11]  }
  0x24   :  { %2318 = vmatprep.subr.bf16.mxu0 %v2688_v0  ;;  %2338 = vmatprep.subr.bf16.mxu1 %v2688_v0  ;;  %v2647_v17 = vld [vmem:[%s3341_s1 + $0xb0] ss:$0 sps:$4 sm:$0x11]  }
  0x25   :  { %2332 = vmatprep.mubr.msk.bf16.mxu0 %vm2689_vm0, %v2688_v0  ;;  %2352 = vmatprep.mubr.msk.bf16.mxu1 %vm2689_vm0, %v2688_v0 }
  0x27   :  { %2319 = vmatpush3.bf16.msra.mxu0 %v2578_v23  ;;  %2339 = vmatpush3.bf16.msra.mxu1 %v2579_v24  ;;  %v653_v23 = vrot.slane %v2858_v38, 1  ;;  %v537_v24 = vsel %vm534_vm4, %v535_v18, %v536_v19  ;;  %v2624_v38 = vld [vmem:[%s3341_s1 + $0x190] sm:$0xff]   ;;  %v1089_v18 = vsel %vm105_vm1, %v2646_v13, 0  ;;  %v2682_v13 = vld [vmem:[%s3341_s1 + $0x15c] sm:$0xff]  }
  0x28   :  { %2320 = vmatprep.subr.bf16.mxu0 %v2688_v0  ;;  %2340 = vmatprep.subr.bf16.mxu1 %v2688_v0 }
  0x2b   :  { %2321 = vmatpush3.bf16.msra.mxu0 %v2580_v25  ;;  %2341 = vmatpush3.bf16.msra.mxu1 %v2581_v26  ;;  %v2614_v25 = vld [vmem:[%s3341_s1 + $0x168] sm:$0xff]   ;;  %v654_v26 = vsel %vm534_vm4, %v652_v22, %v653_v23  ;;  %v2651_v23 = vld [vmem:[%s3341_s1 + $0xb4] sm:$0xff]  }
  0x2c   :  { %2322 = vmatprep.subr.bf16.mxu0 %v2688_v0  ;;  %2342 = vmatprep.subr.bf16.mxu1 %v2688_v0  ;;  %v2648_v22 = vld [vmem:[%s3342_s0 + $0xc] sm:$0xff]  }
  0x2f   :  { %2323 = vmatpush3.bf16.msra.mxu0 %v2582_v27  ;;  %2343 = vmatpush3.bf16.msra.mxu1 %v2583_v30  ;;  %v2615_v27 = vld [vmem:[%s3341_s1 + $0x3c] sm:$0xff]  }
  0x30   :  { %2324 = vmatprep.subr.bf16.mxu0 %v2688_v0  ;;  %2344 = vmatprep.subr.bf16.mxu1 %v2688_v0  ;;  %v2618_v30 = vld [vmem:[%s3341_s1 + $0x178] sm:$0xff]  }
  0x33   :  { %2325 = vmatpush3.bf16.msra.mxu0 %v2584_v34  ;;  %2345 = vmatpush3.bf16.msra.mxu1 %v2585_v36  ;;  %v2630_v34 = vld [vmem:[%s3342_s0 + $0x8] ss:$0 sps:$4 sm:$0x33]   ;;  %v2623_v36 = vld [vmem:[%s3341_s1 + $0x5c] sm:$0xff]  }
  0x34   :  { %2326 = vmatprep.subr.bf16.mxu0 %v2688_v0  ;;  %2346 = vmatprep.subr.bf16.mxu1 %v2688_v0  ;;  %v782_v41 = vshll.u32 %v2630_v34, 16 }
  0x36   :  { %v784_v49 = vrot.slane %v782_v41, 2  ;;  %v2052_v41 = vld [vmem:[%s3342_s0 + $0xc] sm:$0xe] }
  0x37   :  { %2327 = vmatpush3.bf16.msra.mxu0 %v2586_v40  ;;  %2347 = vmatpush3.bf16.msra.mxu1 %v2587_v42  ;;  %v779_v40 = vshrl.u32 %v2630_v34, 16  ;;  %v2625_v42 = vld [vmem:[%s3341_s1 + $0x64] sm:$0xff]   ;;  %v2659_v34 = vld [vmem:[%s3341_s1 + $0xd4] sm:$0xff]  }
  0x38   :  { %2328 = vmatprep.subr.bf16.mxu0 %v2688_v0  ;;  %2348 = vmatprep.subr.bf16.mxu1 %v2688_v0 }
  0x39   :  { %v781_v48 = vrot.slane %v779_v40, 1  ;;  %v2662_v40 = vld [vmem:[%s3341_s1 + $0x118] sm:$0xff]  }
  0x3b   :  { %2329 = vmatpush3.bf16.msra.mxu0 %v2588_v43  ;;  %2349 = vmatpush3.bf16.msra.mxu1 %v2589_v44  ;;  %v773_v43 = vrot.slane %v771_v37, 1  ;;  %v2626_v44 = vld [vmem:[%s3341_s1 + $0x198] sm:$0xff]   ;;  %v785_v52 = vor.u32 %v784_v49, %v781_v48  ;;  %v2666_v49 = vld [vmem:[%s3341_s1 + $0x128] ss:$0 sps:$4 sm:$0x11]  }
  0x3c   :  { %2330 = vmatprep.subr.bf16.mxu0 %v2688_v0  ;;  %2350 = vmatprep.subr.bf16.mxu1 %v2688_v0  ;;  %v2661_v37 = vld [vmem:[%s3341_s1 + $0xdc] sm:$0xff]  }
  0x3d   :  { %v777_v51 = vor.u32 %v776_v46, %v773_v43  ;;  %v2664_v46 = vld [vmem:[%s3341_s1 + $0x120] sm:$0xff]  }
  0x3f   :  { %2331 = vmatpush3.bf16.msra.mxu0 %v336_v55  ;;  %2351 = vmatpush3.bf16.msra.mxu1 %v469_v58  ;;  %v786_v55 = vsel %vm769_vm5, %v777_v51, %v785_v52  ;;  %v2633_v58 = vld [vmem:[%s3341_s1 + $0x78] sm:$0xff]   ;;  %v1351_v52 = vsel %vm105_vm1, %v2665_v47, 0 }
  0x40   :  { %2356 = vmatprep.subr.bf16.mxu0 %v2688_v0  ;;  %2376 = vmatprep.subr.bf16.mxu1 %v2688_v0 }
  0x42   :  { %2333 = vmatmul.mubr.msk.bf16.vlgmr.msra.gmra.mrb[4].mxu0 %vm101_vm2, %v286_v59  ;;  %2353 = vmatmul.mubr.msk.bf16.vlgmr.msra.gmra.mrb[4].mxu1 %vm101_vm2, %v419_v61  ;;  %v2634_v59 = vld [vmem:[%s3341_s1 + $0x8] sm:$0xff]   ;;  %v2636_v61 = vld [vmem:[%s3341_s1 + $0x10] sm:$0xff]  }
  0x43   :  { %2357 = vmatpush3.bf16.msra.mxu0 %v2596_v60  ;;  %2377 = vmatpush3.bf16.msra.mxu1 %v2597_v62  ;;  %v2635_v60 = vld [vmem:[%s3341_s1 + $0x80] sm:$0xff]   ;;  %v2637_v62 = vld [vmem:[%s3341_s1 + $0x88] sm:$0xff]  }
  0x44   :  { %2358 = vmatprep.subr.bf16.mxu0 %v2688_v0  ;;  %2378 = vmatprep.subr.bf16.mxu1 %v2688_v0 }
  0x45   :  { %2372 = vmatprep.mubr.msk.bf16.mxu0 %vm2689_vm0, %v2688_v0  ;;  %2392 = vmatprep.mubr.msk.bf16.mxu1 %vm2689_vm0, %v2688_v0 }
  0x47   :  { %2359 = vmatpush3.bf16.msra.mxu0 %v2598_v63  ;;  %2379 = vmatpush3.bf16.msra.mxu1 %v2599_v1  ;;  %v2638_v63 = vld [vmem:[%s3341_s1 + $0x18] sm:$0xff]   ;;  %v2639_v1 = vld [vmem:[%s3341_s1 + $0x90] sm:$0xff]  }
  0x48   :  { %2360 = vmatprep.subr.bf16.mxu0 %v2688_v0  ;;  %2380 = vmatprep.subr.bf16.mxu1 %v2688_v0 }
  0x4b   :  { %2361 = vmatpush3.bf16.msra.mxu0 %v2600_v2  ;;  %2381 = vmatpush3.bf16.msra.mxu1 %v2601_v3  ;;  %v1994_v2 = vld [vmem:[%s3342_s0 + $0xc] sm:$0xf]  ;;  %v3102_v3 = vld [vmem:[%s3342_s0 + $0x10] sm:$0xf] }
  0x4c   :  { %2362 = vmatprep.subr.bf16.mxu0 %v2688_v0  ;;  %2382 = vmatprep.subr.bf16.mxu1 %v2688_v0  ;;  %v3232_v48 = vcombine.low %v2052_v41, %v3102_v3 }
  0x4f   :  { %2363 = vmatpush3.bf16.msra.mxu0 %v2602_v4  ;;  %2383 = vmatpush3.bf16.msra.mxu1 %v2603_v5  ;;  %v2640_v4 = vld [vmem:[%s3341_s1 + $0x20] sm:$0xff]   ;;  %v2641_v5 = vld [vmem:[%s3341_s1 + $0x98] sm:$0xff]  }
  0x50   :  { %2364 = vmatprep.subr.bf16.mxu0 %v2688_v0  ;;  %2384 = vmatprep.subr.bf16.mxu1 %v2688_v0 }
  0x53   :  { %2365 = vmatpush3.bf16.msra.mxu0 %v2604_v6  ;;  %2385 = vmatpush3.bf16.msra.mxu1 %v2605_v7  ;;  %v2012_v6 = vcombine.low %v1994_v2, %v3102_v3  ;;  %v2642_v7 = vld [vmem:[%s3341_s1 + $0x28] sm:$0xff]   ;;  %v2677_v2 = vld [vmem:[%s3341_s1 + $0x180] sm:$0xff]  }
  0x54   :  { %2366 = vmatprep.subr.bf16.mxu0 %v2688_v0  ;;  %2386 = vmatprep.subr.bf16.mxu1 %v2688_v0  ;;  %v2678_v3 = vld [vmem:[%s3341_s1 + $0x14c] sm:$0xff]  }
  0x57   :  { %2367 = vmatpush3.bf16.msra.mxu0 %v2606_v8  ;;  %2387 = vmatpush3.bf16.msra.mxu1 %v2607_v10  ;;  %v2643_v8 = vld [vmem:[%s3341_s1 + $0xa0] sm:$0xff]   ;;  %v1161_v10 = vshll.u32 %v2012_v6, 16 }
  0x58   :  { %2368 = vmatprep.subr.bf16.mxu0 %v2688_v0  ;;  %2388 = vmatprep.subr.bf16.mxu1 %v2688_v0 }
  0x59   :  { %v1163_v15 = vrot.slane %v1161_v10, 1  ;;  %v2078_v10 = vld [vmem:[%s3342_s0 + $0x24] sm:$0xe] }
  0x5b   :  { %2369 = vmatpush3.bf16.msra.mxu0 %v2608_v14  ;;  %2389 = vmatpush3.bf16.msra.mxu1 %v2609_v16  ;;  %v1159_v14 = vshrl.u32 %v2012_v6, 16  ;;  %v1166_v16 = vshll.u32 %v3123_v9, 16  ;;  %v2680_v6 = vld [vmem:[%s3341_s1 + $0x154] sm:$0xff]  }
  0x5c   :  { %2370 = vmatprep.subr.bf16.mxu0 %v2688_v0  ;;  %2390 = vmatprep.subr.bf16.mxu1 %v2688_v0 }
  0x5d   :  { %v1164_v19 = vor.u32 %v1163_v15, %v1159_v14 }
  0x5f   :  { %2371 = vmatpush3.bf16.msra.mxu0 %v587_v20  ;;  %2391 = vmatpush3.bf16.msra.mxu1 %v704_v21  ;;  %v1168_v20 = vrot.slane %v1166_v16, 1  ;;  %v1219_v21 = vsel %vm105_vm1, %v2647_v17, 0  ;;  %v2683_v17 = vld [vmem:[%s3341_s1 + $0x198] sm:$0xff]  }
  0x60   :  { %2396 = vmatprep.subr.bf16.mxu0 %v2688_v0  ;;  %2416 = vmatprep.subr.bf16.mxu1 %v2688_v0 }
  0x62   :  { %2373 = vmatmul.mubr.msk.bf16.vlgmr.msra.gmra.mrb[8].mxu0 %vm101_vm2, %v537_v24  ;;  %2393 = vmatmul.mubr.msk.bf16.vlgmr.msra.gmra.mrb[8].mxu1 %vm101_vm2, %v654_v26  ;;  %v1169_v24 = vsel %vm274_vm3, %v1164_v19, %v1168_v20  ;;  %v2653_v26 = vld [vmem:[%s3341_s1 + $0xbc] sm:$0xff]  }
  0x63   :  { %2397 = vmatpush3.bf16.msra.mxu0 %v2614_v25  ;;  %2417 = vmatpush3.bf16.msra.mxu1 %v2615_v27  ;;  %v2652_v25 = vld [vmem:[%s3341_s1 + $0xf0] sm:$0xff]   ;;  %v2654_v27 = vld [vmem:[%s3341_s1 + $0xf8] sm:$0xff]  }
  0x64   :  { %2398 = vmatprep.subr.bf16.mxu0 %v2688_v0  ;;  %2418 = vmatprep.subr.bf16.mxu1 %v2688_v0 }
  0x65   :  { %2412 = vmatprep.mubr.msk.bf16.mxu0 %vm2689_vm0, %v2688_v0  ;;  %2432 = vmatprep.mubr.msk.bf16.mxu1 %vm2689_vm0, %v2688_v0 }
  0x67   :  { %2399 = vmatpush3.bf16.msra.mxu0 %v2616_v28  ;;  %2419 = vmatpush3.bf16.msra.mxu1 %v2617_v29  ;;  %v2655_v28 = vld [vmem:[%s3341_s1 + $0xc4] sm:$0xff]  }
  0x68   :  { %2400 = vmatprep.subr.bf16.mxu0 %v2688_v0  ;;  %2420 = vmatprep.subr.bf16.mxu1 %v2688_v0  ;;  %v2656_v29 = vld [vmem:[%s3341_s1 + $0x100] sm:$0xff]  }
  0x6b   :  { %2401 = vmatpush3.bf16.msra.mxu0 %v2618_v30  ;;  %2421 = vmatpush3.bf16.msra.mxu1 %v2619_v31  ;;  %v2657_v30 = vld [vmem:[%s3341_s1 + $0xcc] sm:$0xff]  }
  0x6c   :  { %2402 = vmatprep.subr.bf16.mxu0 %v2688_v0  ;;  %2422 = vmatprep.subr.bf16.mxu1 %v2688_v0  ;;  %v2658_v31 = vld [vmem:[%s3341_s1 + $0x108] sm:$0xff]  }
  0x6f   :  { %2403 = vmatpush3.bf16.msra.mxu0 %v2620_v32  ;;  %2423 = vmatpush3.bf16.msra.mxu1 %v2621_v33  ;;  %v2023_v32 = vld [vmem:[%s3342_s0 + $0x24] sm:$0xf]  ;;  %v3192_v33 = vld [vmem:[%s3342_s0 + $0x28] sm:$0xf] }
  0x70   :  { %2404 = vmatprep.subr.bf16.mxu0 %v2688_v0  ;;  %2424 = vmatprep.subr.bf16.mxu1 %v2688_v0  ;;  %v2094_v14 = vcombine.low %v2078_v10, %v3192_v33 }
  0x73   :  { %2405 = vmatpush3.bf16.msra.mxu0 %v2622_v35  ;;  %2425 = vmatpush3.bf16.msra.mxu1 %v2623_v36  ;;  %v2041_v35 = vcombine.low %v2023_v32, %v3192_v33  ;;  %v2660_v36 = vld [vmem:[%s3341_s1 + $0x110] sm:$0xff]  }
  0x74   :  { %2406 = vmatprep.subr.bf16.mxu0 %v2688_v0  ;;  %2426 = vmatprep.subr.bf16.mxu1 %v2688_v0 }
  0x75   :  { %v1293_v39 = vshll.u32 %v2041_v35, 16  ;;  %v1291_v43 = vshrl.u32 %v2041_v35, 16 }
  0x77   :  { %2407 = vmatpush3.bf16.msra.mxu0 %v2624_v38  ;;  %2427 = vmatpush3.bf16.msra.mxu1 %v2625_v42  ;;  %v3210_v38 = vld [vmem:[%s3342_s0 + $0x2c] ss:$0 sps:$4 sm:$0x11]   ;;  %v2663_v42 = vld [vmem:[%s3341_s1 + $0xe4] sm:$0xff]  }
  0x78   :  { %2408 = vmatprep.subr.bf16.mxu0 %v2688_v0  ;;  %2428 = vmatprep.subr.bf16.mxu1 %v2688_v0  ;;  %v1298_v45 = vshll.u32 %v3210_v38, 16 }
  0x7a   :  { %v1300_v51 = vrot.slane %v1298_v45, 1 }
  0x7b   :  { %2409 = vmatpush3.bf16.msra.mxu0 %v2626_v44  ;;  %2429 = vmatpush3.bf16.msra.mxu1 %v2627_v50  ;;  %v1295_v44 = vrot.slane %v1293_v39, 1 }
  0x7c   :  { %2410 = vmatprep.subr.bf16.mxu0 %v2688_v0  ;;  %2430 = vmatprep.subr.bf16.mxu1 %v2688_v0 }
  0x7d   :  { %v1296_v50 = vor.u32 %v1295_v44, %v1291_v43 }
  0x7f   :  { %2411 = vmatpush3.bf16.msra.mxu0 %v836_v53  ;;  %2431 = vmatpush3.bf16.msra.mxu1 %v992_v54  ;;  %v1415_v53 = vrot.slane %v3232_v48, 1  ;;  %v1416_v54 = vrot.slane %v3123_v9, 1  ;;  %v2681_v9 = vld [vmem:[%s3341_s1 + $0x190] sm:$0xff]  }
  0x80   :  { %2436 = vmatprep.subr.bf16.mxu0 %v2688_v0  ;;  %2456 = vmatprep.subr.bf16.mxu1 %v2688_v0 }
  0x82   :  { %2413 = vmatmul.mubr.msk.bf16.vlgmr.msra.gmra.mrb[12].mxu0 %vm101_vm2, %v786_v55  ;;  %2433 = vmatmul.mubr.msk.bf16.vlgmr.msra.gmra.mrb[12].mxu1 %vm101_vm2, %v2631_v56  ;;  %v1467_v55 = vsel %vm105_vm1, %v2666_v49, 0  ;;  %v1301_v56 = vsel %vm274_vm3, %v1296_v50, %v1300_v51 }
  0x83   :  { %2437 = vmatpush3.bf16.msra.mxu0 %v2632_v57  ;;  %2457 = vmatpush3.bf16.msra.mxu1 %v2633_v58  ;;  %v2670_v57 = vld [vmem:[%s3341_s1 + $0x12c] sm:$0xff]   ;;  %v1417_v58 = vsel %vm534_vm4, %v1415_v53, %v1416_v54 }
  0x84   :  { %2438 = vmatprep.subr.bf16.mxu0 %v2688_v0  ;;  %2458 = vmatprep.subr.bf16.mxu1 %v2688_v0 }
  0x85   :  { %2452 = vmatprep.mubr.msk.bf16.mxu0 %vm2689_vm0, %v2688_v0  ;;  %2472 = vmatprep.mubr.msk.bf16.mxu1 %vm2689_vm0, %v2688_v0 }
  0x87   :  { %2439 = vmatpush3.bf16.msra.mxu0 %v2634_v59  ;;  %2459 = vmatpush3.bf16.msra.mxu1 %v2635_v60  ;;  %v2671_v59 = vld [vmem:[%s3341_s1 + $0x168] sm:$0xff]   ;;  %v2672_v60 = vld [vmem:[%s3341_s1 + $0x134] sm:$0xff]  }
  0x88   :  { %2440 = vmatprep.subr.bf16.mxu0 %v2688_v0  ;;  %2460 = vmatprep.subr.bf16.mxu1 %v2688_v0 }
  0x8b   :  { %2441 = vmatpush3.bf16.msra.mxu0 %v2636_v61  ;;  %2461 = vmatpush3.bf16.msra.mxu1 %v2637_v62  ;;  %v2673_v61 = vld [vmem:[%s3341_s1 + $0x170] sm:$0xff]   ;;  %v2674_v62 = vld [vmem:[%s3341_s1 + $0x13c] sm:$0xff]  }
  0x8c   :  { %2442 = vmatprep.subr.bf16.mxu0 %v2688_v0  ;;  %2462 = vmatprep.subr.bf16.mxu1 %v2688_v0 }
  0x8f   :  { %2443 = vmatpush3.bf16.msra.mxu0 %v2638_v63  ;;  %2463 = vmatpush3.bf16.msra.mxu1 %v2639_v1  ;;  %v2675_v63 = vld [vmem:[%s3341_s1 + $0x178] sm:$0xff]   ;;  %v2676_v1 = vld [vmem:[%s3341_s1 + $0x144] sm:$0xff]  }
  0x90   :  { %2444 = vmatprep.subr.bf16.mxu0 %v2688_v0  ;;  %2464 = vmatprep.subr.bf16.mxu1 %v2688_v0 }
  0x93   :  { %2445 = vmatpush3.bf16.msra.mxu0 %v2640_v4  ;;  %2465 = vmatpush3.bf16.msra.mxu1 %v2641_v5  ;;  %v2679_v4 = vld [vmem:[%s3341_s1 + $0x188] sm:$0xff]   ;;  %v2687_v5 = vld [vmem:[%s3342_s0 + $0x14] ss:$0 sps:$4 sm:$0x33]  }
  0x94   :  { %2446 = vmatprep.subr.bf16.mxu0 %v2688_v0  ;;  %2466 = vmatprep.subr.bf16.mxu1 %v2688_v0 }
  0x97   :  { %2447 = vmatpush3.bf16.msra.mxu0 %v2642_v7  ;;  %2467 = vmatpush3.bf16.msra.mxu1 %v2643_v8  ;;  %v1648_v7 = vshrl.u32 %v3232_v48, 16  ;;  %v1651_v8 = vshll.u32 %v3232_v48, 16 }
  0x98   :  { %2448 = vmatprep.subr.bf16.mxu0 %v2688_v0  ;;  %2468 = vmatprep.subr.bf16.mxu1 %v2688_v0 }
  0x99   :  { %v1650_v15 = vrot.slane %v1648_v7, 1  ;;  %v1653_v16 = vrot.slane %v1651_v8, 2 }
  0x9b   :  { %2449 = vmatpush3.bf16.msra.mxu0 %v2644_v11  ;;  %2469 = vmatpush3.bf16.msra.mxu1 %v2645_v12  ;;  %v1656_v11 = vshrl.u32 %v2687_v5, 16  ;;  %v1659_v12 = vshll.u32 %v2687_v5, 16 }
  0x9c   :  { %2450 = vmatprep.subr.bf16.mxu0 %v2688_v0  ;;  %2470 = vmatprep.subr.bf16.mxu1 %v2688_v0 }
  0x9d   :  { %v1658_v19 = vrot.slane %v1656_v11, 1  ;;  %v1661_v20 = vrot.slane %v1659_v12, 2 }
  0x9f   :  { %2451 = vmatpush3.bf16.msra.mxu0 %v1089_v18  ;;  %2471 = vmatpush3.bf16.msra.mxu1 %v1219_v21  ;;  %v2684_v18 = vld [vmem:[%s3341_s1 + $0x164] ss:$0 sps:$4 sm:$0x11]   ;;  %v2685_v21 = vld [vmem:[%s3341_s1 + $0x1a0] ss:$0 sps:$4 sm:$0x11]  }
  0xa0   :  { %2476 = vmatprep.subr.bf16.mxu0 %v2688_v0  ;;  %2496 = vmatprep.subr.bf16.mxu1 %v2688_v0 }
  0xa2   :  { %2453 = vmatmul.mubr.msk.bf16.vlgmr.msra.gmra.mrb[16].mxu0 %vm101_vm2, %v2648_v22  ;;  %2473 = vmatmul.mubr.msk.bf16.vlgmr.msra.gmra.mrb[16].mxu1 %vm101_vm2, %v1169_v24  ;;  %v1531_v22 = vrot.slane %v2094_v14, 1  ;;  %v1583_v24 = vsel %vm105_vm1, %v2684_v18, 0 }
  0xa3   :  { %2477 = vmatpush3.bf16.msra.mxu0 %v2651_v23  ;;  %2497 = vmatpush3.bf16.msra.mxu1 %v2652_v25  ;;  %v1532_v23 = vrot.slane %v3210_v38, 1  ;;  %v1654_v25 = vor.u32 %v1653_v16, %v1650_v15 }
  0xa4   :  { %2478 = vmatprep.subr.bf16.mxu0 %v2688_v0  ;;  %2498 = vmatprep.subr.bf16.mxu1 %v2688_v0 }
  0xa5   :  { %2492 = vmatprep.mubr.msk.bf16.mxu0 %vm2689_vm0, %v2688_v0  ;;  %2512 = vmatprep.mubr.msk.bf16.mxu1 %vm2689_vm0, %v2688_v0 }
  0xa7   :  { %2479 = vmatpush3.bf16.msra.mxu0 %v2653_v26  ;;  %2499 = vmatpush3.bf16.msra.mxu1 %v2654_v27  ;;  %v1662_v26 = vor.u32 %v1661_v20, %v1658_v19  ;;  %v1713_v27 = vsel %vm105_vm1, %v2685_v21, 0 }
  0xa8   :  { %2480 = vmatprep.subr.bf16.mxu0 %v2688_v0  ;;  %2500 = vmatprep.subr.bf16.mxu1 %v2688_v0 }
  0xab   :  { %2481 = vmatpush3.bf16.msra.mxu0 %v2655_v28  ;;  %2501 = vmatpush3.bf16.msra.mxu1 %v2656_v29  ;;  %v1533_v28 = vsel %vm534_vm4, %v1531_v22, %v1532_v23  ;;  %v1663_v29 = vsel %vm769_vm5, %v1654_v25, %v1662_v26 }
  0xac   :  { %2482 = vmatprep.subr.bf16.mxu0 %v2688_v0  ;;  %2502 = vmatprep.subr.bf16.mxu1 %v2688_v0 }
  0xaf   :  { %2483 = vmatpush3.bf16.msra.mxu0 %v2657_v30  ;;  %2503 = vmatpush3.bf16.msra.mxu1 %v2658_v31 }
  0xb0   :  { %2484 = vmatprep.subr.bf16.mxu0 %v2688_v0  ;;  %2504 = vmatprep.subr.bf16.mxu1 %v2688_v0 }
  0xb3   :  { %2485 = vmatpush3.bf16.msra.mxu0 %v2659_v34  ;;  %2505 = vmatpush3.bf16.msra.mxu1 %v2660_v36 }
  0xb4   :  { %2486 = vmatprep.subr.bf16.mxu0 %v2688_v0  ;;  %2506 = vmatprep.subr.bf16.mxu1 %v2688_v0 }
  0xb7   :  { %2487 = vmatpush3.bf16.msra.mxu0 %v2661_v37  ;;  %2507 = vmatpush3.bf16.msra.mxu1 %v2662_v40 }
  0xb8   :  { %2488 = vmatprep.subr.bf16.mxu0 %v2688_v0  ;;  %2508 = vmatprep.subr.bf16.mxu1 %v2688_v0 }
  0xbb   :  { %2489 = vmatpush3.bf16.msra.mxu0 %v2663_v42  ;;  %2509 = vmatpush3.bf16.msra.mxu1 %v2664_v46 }
  0xbc   :  { %2490 = vmatprep.subr.bf16.mxu0 %v2688_v0  ;;  %2510 = vmatprep.subr.bf16.mxu1 %v2688_v0 }
  0xbf   :  { %2491 = vmatpush3.bf16.msra.mxu0 %v1351_v52  ;;  %2511 = vmatpush3.bf16.msra.mxu1 %v1467_v55 }
  0xc0   :  { %2516 = vmatprep.subr.bf16.mxu0 %v2688_v0  ;;  %2536 = vmatprep.subr.bf16.mxu1 %v2688_v0 }
  0xc2   :  { %2493 = vmatmul.mubr.msk.bf16.vlgmr.msra.gmra.mrb[20].mxu0 %vm101_vm2, %v1301_v56  ;;  %2513 = vmatmul.mubr.msk.bf16.vlgmr.msra.gmra.mrb[20].mxu1 %vm101_vm2, %v1417_v58 }
  0xc3   :  { %2517 = vmatpush3.bf16.msra.mxu0 %v2670_v57  ;;  %2537 = vmatpush3.bf16.msra.mxu1 %v2671_v59 }
  0xc4   :  { %2518 = vmatprep.subr.bf16.mxu0 %v2688_v0  ;;  %2538 = vmatprep.subr.bf16.mxu1 %v2688_v0 }
  0xc5   :  { %2532 = vmatprep.mubr.msk.bf16.mxu0 %vm2689_vm0, %v2688_v0  ;;  %2552 = vmatprep.mubr.msk.bf16.mxu1 %vm2689_vm0, %v2688_v0 }
  0xc7   :  { %2519 = vmatpush3.bf16.msra.mxu0 %v2672_v60  ;;  %2539 = vmatpush3.bf16.msra.mxu1 %v2673_v61 }
  0xc8   :  { %2520 = vmatprep.subr.bf16.mxu0 %v2688_v0  ;;  %2540 = vmatprep.subr.bf16.mxu1 %v2688_v0 }
  0xcb   :  { %2521 = vmatpush3.bf16.msra.mxu0 %v2674_v62  ;;  %2541 = vmatpush3.bf16.msra.mxu1 %v2675_v63 }
  0xcc   :  { %2522 = vmatprep.subr.bf16.mxu0 %v2688_v0  ;;  %2542 = vmatprep.subr.bf16.mxu1 %v2688_v0 }
  0xcf   :  { %2523 = vmatpush3.bf16.msra.mxu0 %v2676_v1  ;;  %2543 = vmatpush3.bf16.msra.mxu1 %v2677_v2  ;;  %v1952_v1 = vld [vmem:[%s3343_s2] ss:$0 sm:$0xff] }
  0xd0   :  { %2524 = vmatprep.subr.bf16.mxu0 %v2688_v0  ;;  %2544 = vmatprep.subr.bf16.mxu1 %v2688_v0 }
  0xd3   :  { %2525 = vmatpush3.bf16.msra.mxu0 %v2678_v3  ;;  %2545 = vmatpush3.bf16.msra.mxu1 %v2679_v4 }
  0xd4   :  { %2526 = vmatprep.subr.bf16.mxu0 %v2688_v0  ;;  %2546 = vmatprep.subr.bf16.mxu1 %v2688_v0 }
  0xd7   :  { %2527 = vmatpush3.bf16.msra.mxu0 %v2680_v6  ;;  %2547 = vmatpush3.bf16.msra.mxu1 %v2681_v9 }
  0xd8   :  { %2528 = vmatprep.subr.bf16.mxu0 %v2688_v0  ;;  %2548 = vmatprep.subr.bf16.mxu1 %v2688_v0 }
  0xdb   :  { %2529 = vmatpush3.bf16.msra.mxu0 %v2682_v13  ;;  %2549 = vmatpush3.bf16.msra.mxu1 %v2683_v17 }
  0xdc   :  { %2530 = vmatprep.subr.bf16.mxu0 %v2688_v0  ;;  %2550 = vmatprep.subr.bf16.mxu1 %v2688_v0 }
  0xdf   :  { %2531 = vmatpush3.bf16.msra.mxu0 %v1583_v24  ;;  %2551 = vmatpush3.bf16.msra.mxu1 %v1713_v27 }
  0xe2   :  { %2533 = vmatmul.mubr.msk.bf16.vlgmr.msra.gmra.mrb[24].mxu0 %vm101_vm2, %v1533_v28  ;;  %2553 = vmatmul.mubr.msk.bf16.vlgmr.msra.gmra.mrb[24].mxu1 %vm101_vm2, %v1663_v29 }
  0xf5   :  { %v143_v30 = vpop.f32.mrb[0].mxu0  ;;  %v240_v31 = vpop.f32.mrb[0].mxu1 }
  0xf6   :  { %v2294_v32 = vpop.f32.mrb[1].mxu0  ;;  %v241_v33 = vadd.f32 %v240_v31, %v143_v30  ;;  %v2314_v34 = vpop.f32.mrb[1].mxu1 }
  0xf7   :  { %v146_v35 = vpop.f32.mrb[2].mxu0  ;;  %v243_v36 = vpop.f32.mrb[2].mxu1 }
  0xf8   :  { %v2295_v0 = vpop.f32.mrb[3].mxu0  ;;  %v244_v37 = vadd.f32 %v243_v36, %v146_v35  ;;  %v2315_v38 = vpop.f32.mrb[3].mxu1 }
 0x115   :  { %v372_v39 = vpop.f32.mrb[4].mxu0  ;;  %v505_v41 = vpop.f32.mrb[4].mxu1 }
 0x116   :  { %v379_v40 = vadd.f32 %v372_v39, %v241_v33  ;;  %v2334_v42 = vpop.f32.mrb[5].mxu0  ;;  %v2354_v43 = vpop.f32.mrb[5].mxu1 }
 0x117   :  { %v375_v44 = vpop.f32.mrb[6].mxu0  ;;  %v508_v47 = vpop.f32.mrb[6].mxu1 }
 0x118   :  { %v512_v45 = vadd.f32 %v505_v41, %v379_v40  ;;  %v380_v46 = vadd.f32 %v375_v44, %v244_v37  ;;  %v2335_v48 = vpop.f32.mrb[7].mxu0  ;;  %v2355_v49 = vpop.f32.mrb[7].mxu1 }
 0x11a   :  { %v513_v50 = vadd.f32 %v508_v47, %v380_v46 }
 0x135   :  { %v623_v51 = vpop.f32.mrb[8].mxu0  ;;  %v740_v53 = vpop.f32.mrb[8].mxu1 }
 0x136   :  { %v630_v52 = vadd.f32 %v623_v51, %v512_v45  ;;  %v2374_v54 = vpop.f32.mrb[9].mxu0  ;;  %v2394_v55 = vpop.f32.mrb[9].mxu1 }
 0x137   :  { %v626_v56 = vpop.f32.mrb[10].mxu0  ;;  %v743_v59 = vpop.f32.mrb[10].mxu1 }
 0x138   :  { %v747_v57 = vadd.f32 %v740_v53, %v630_v52  ;;  %v631_v58 = vadd.f32 %v626_v56, %v513_v50  ;;  %v2375_v60 = vpop.f32.mrb[11].mxu0  ;;  %v2395_v61 = vpop.f32.mrb[11].mxu1 }
 0x13a   :  { %v748_v62 = vadd.f32 %v743_v59, %v631_v58 }
 0x155   :  { %v872_v63 = vpop.f32.mrb[12].mxu0  ;;  %v1028_v3 = vpop.f32.mrb[12].mxu1 }
 0x156   :  { %v879_v2 = vadd.f32 %v872_v63, %v747_v57  ;;  %v2414_v4 = vpop.f32.mrb[13].mxu0  ;;  %v2434_v5 = vpop.f32.mrb[13].mxu1 }
 0x157   :  { %v875_v6 = vpop.f32.mrb[14].mxu0  ;;  %v1031_v9 = vpop.f32.mrb[14].mxu1 }
 0x158   :  { %v888_v7 = vadd.f32 %v1952_v1, %v879_v2  ;;  %v880_v8 = vadd.f32 %v875_v6, %v748_v62  ;;  %v2415_v10 = vpop.f32.mrb[15].mxu0  ;;  %v2435_v11 = vpop.f32.mrb[15].mxu1 }
 0x15a   :  { %v889_v12 = vadd.f32 %v1952_v1, %v880_v8  ;;  %v890_v13 = vmax.f32 %v888_v7, 0.0 }
 0x15c   :  { %v891_v14 = vmax.f32 %v889_v12, 0.0 }
 0x15e   :  { %v2142_v15 = vpack.c.bf16 %v891_v14, %v890_v13 }
 0x160   :  { %2143 = vst [vmem:[%s3344_s3] sm:$0xff] %v2142_v15  }
 0x175   :  { %v1125_v16 = vpop.f32.mrb[16].mxu0  ;;  %v1255_v18 = vpop.f32.mrb[16].mxu1 }
 0x176   :  { %v1126_v17 = vadd.f32 %v1125_v16, %v1028_v3  ;;  %v2454_v19 = vpop.f32.mrb[17].mxu0  ;;  %v2474_v20 = vpop.f32.mrb[17].mxu1 }
 0x177   :  { %v1128_v21 = vpop.f32.mrb[18].mxu0  ;;  %v1258_v24 = vpop.f32.mrb[18].mxu1 }
 0x178   :  { %v1262_v22 = vadd.f32 %v1255_v18, %v1126_v17  ;;  %v1129_v23 = vadd.f32 %v1128_v21, %v1031_v9  ;;  %v2455_v25 = vpop.f32.mrb[19].mxu0  ;;  %v2475_v26 = vpop.f32.mrb[19].mxu1 }
 0x17a   :  { %v1263_v27 = vadd.f32 %v1258_v24, %v1129_v23 }
 0x195   :  { %v1387_v28 = vpop.f32.mrb[20].mxu0  ;;  %v1503_v30 = vpop.f32.mrb[20].mxu1 }
 0x196   :  { %v1394_v29 = vadd.f32 %v1387_v28, %v1262_v22  ;;  %v2494_v31 = vpop.f32.mrb[21].mxu0  ;;  %v2514_v32 = vpop.f32.mrb[21].mxu1 }
 0x197   :  { %v1390_v33 = vpop.f32.mrb[22].mxu0  ;;  %v1506_v36 = vpop.f32.mrb[22].mxu1 }
 0x198   :  { %v1510_v34 = vadd.f32 %v1503_v30, %v1394_v29  ;;  %v1395_v35 = vadd.f32 %v1390_v33, %v1263_v27  ;;  %v2495_v0 = vpop.f32.mrb[23].mxu0  ;;  %v2515_v37 = vpop.f32.mrb[23].mxu1 }
 0x19a   :  { %v1511_v38 = vadd.f32 %v1506_v36, %v1395_v35 }
 0x1b5   :  { %v1619_v39 = vpop.f32.mrb[24].mxu0  ;;  %v1749_v41 = vpop.f32.mrb[24].mxu1 }
 0x1b6   :  { %v1626_v40 = vadd.f32 %v1619_v39, %v1510_v34  ;;  %v2534_v42 = vpop.f32.mrb[25].mxu0  ;;  %v2554_v43 = vpop.f32.mrb[25].mxu1 }
 0x1b7   :  { %v1622_v44 = vpop.f32.mrb[26].mxu0  ;;  %v1752_v47 = vpop.f32.mrb[26].mxu1 }
 0x1b8   :  { %v1756_v45 = vadd.f32 %v1749_v41, %v1626_v40  ;;  %v1627_v46 = vadd.f32 %v1622_v44, %v1511_v38  ;;  %v2535_v48 = vpop.f32.mrb[27].mxu0  ;;  %v2555_v49 = vpop.f32.mrb[27].mxu1 }
 0x1ba   :  { %v1765_v50 = vadd.f32 %v1952_v1, %v1756_v45  ;;  %v1757_v51 = vadd.f32 %v1752_v47, %v1627_v46 }
 0x1bc   :  { %v1766_v52 = vadd.f32 %v1952_v1, %v1757_v51  ;;  %v1767_v53 = vmax.f32 %v1765_v50, 0.0 }
 0x1be   :  { %v1768_v54 = vmax.f32 %v1766_v52, 0.0 }
 0x1c0   :  { %v2147_v55 = vpack.c.bf16 %v1768_v54, %v1767_v53 }
 0x1c2   :  { %2149 = vst [vmem:[%s3344_s3 + $0x8] sm:$0xff] %v2147_v55  }

// kernel: _lambda_.11
= control target key start
LH: loop header
LB: loop body
LE: loop exit
PB: predicated region body
PF: predicated region fallthrough
CT: control target
= control target key end

     0   :  { %vm47_vm0 = vsmask.f32 3328  ;;  %vm48_vm1 = vsmask.f32 7440  ;;  %s140_s12 = smov 120   ;;  %vm124_vm3 = vcmask 519168   ;;  %s213_s0 = inlined_call_operand.vmem [shape: bf16[2,2,2,9,72], index: 0, kind: input, shape index: {}]   ;;  %s214_s1 = inlined_call_operand.vmem [shape: bf16[2,8,64], index: 1, kind: output, shape index: {}]  }
   0x1   :  { %v8_v0 = vld [vmem:[%s213_s0] sm:$0xf]  ;;  %v9_v1 = vld [vmem:[%s213_s0 + $0x8] sm:$0xf]  ;;  %v45_v8 = vld [vmem:[%s213_s0 + $0x4] sm:$0x1] }
   0x2   :  { %v133_v2 = vld [vmem:[%s213_s0 + $0x20] sm:$0xf]  ;;  %17 = vrot.lane.b32.xlu0 %v8_v0, %s140_s12  ;;  %v51_v3 = vshrl.u32 %v8_v0, 16  ;;  %v54_v4 = vshll.u32 %v8_v0, 16  ;;  %v65_v5 = vshrl.u32 %v9_v1, 16  ;;  %v68_v6 = vshll.u32 %v9_v1, 16  ;;  %vm184_vm2 = vmor %vm47_vm0, %vm48_vm1 }
   0x3   :  { %37 = vrot.lane.b32.xlu1 %v133_v2, %s140_s12  ;;  %v134_v7 = vld [vmem:[%s213_s0 + $0x28] sm:$0xf]  ;;  %v46_v9 = vld [vmem:[%s213_s0 + $0xc] sm:$0x1]  ;;  %v131_v10 = vld [vmem:[%s213_s0 + $0x10] sm:$0xf] }
   0x4   :  { %v53_v11 = vrot.slane %v51_v3, 4  ;;  %v56_v12 = vrot.slane %v54_v4, 5  ;;  %v67_v13 = vrot.slane %v65_v5, 4  ;;  %v70_v14 = vrot.slane %v68_v6, 5  ;;  %v132_v19 = vld [vmem:[%s213_s0 + $0x18] sm:$0xf] }
   0x5   :  { %v60_v15 = vshll.u32 %v45_v8, 16  ;;  %v74_v16 = vshll.u32 %v46_v9, 16  ;;  %v85_v17 = vshrl.u32 %v131_v10, 16  ;;  %v88_v18 = vshll.u32 %v131_v10, 16  ;;  %v137_v24 = vld [vmem:[%s213_s0 + $0x14] sm:$0x1] }
   0x6   :  { %19 = vrot.lane.b32.xlu0 %v9_v1, %s140_s12  ;;  %v57_v20 = vor.u32 %v56_v12, %v53_v11  ;;  %v71_v21 = vor.u32 %v70_v14, %v67_v13  ;;  %v13_v22 = vmax.bf16 %v131_v10, %v8_v0  ;;  %v99_v23 = vshrl.u32 %v132_v19, 16  ;;  %v138_v30 = vld [vmem:[%s213_s0 + $0x1c] sm:$0x1]  ;;  %v135_v51 = vld [vmem:[%s213_s0 + $0x30] sm:$0xf] }
   0x7   :  { %39 = vrot.lane.b32.xlu1 %v134_v7, %s140_s12  ;;  %v62_v26 = vrot.slane %v60_v15, 5  ;;  %v76_v27 = vrot.slane %v74_v16, 5  ;;  %v87_v28 = vrot.slane %v85_v17, 4  ;;  %v90_v29 = vrot.slane %v88_v18, 5  ;;  %v136_v57 = vld [vmem:[%s213_s0 + $0x38] sm:$0xf] }
   0x8   :  { %v58_v31 = vrot.slane %v57_v20, 4  ;;  %v72_v32 = vrot.slane %v71_v21, 4  ;;  %v14_v33 = vmax.bf16 %v132_v19, %v9_v1  ;;  %v101_v34 = vrot.slane %v99_v23, 4 }
   0x9   :  { %v102_v35 = vshll.u32 %v132_v19, 16  ;;  %v91_v36 = vor.u32 %v90_v29, %v87_v28  ;;  %v94_v37 = vshll.u32 %v137_v24, 16  ;;  %v108_v40 = vshll.u32 %v138_v30, 16 }
   0xa   :  { %v63_v38 = vsel %vm184_vm2, %v58_v31, %v62_v26  ;;  %v77_v39 = vsel %vm184_vm2, %v72_v32, %v76_v27 }
   0xb   :  { %116 = vrot.lane.b32.xlu0 %v63_v38, %s140_s12  ;;  %118 = vrot.lane.b32.xlu1 %v77_v39, %s140_s12  ;;  %v104_v41 = vrot.slane %v102_v35, 5  ;;  %v92_v42 = vrot.slane %v91_v36, 4  ;;  %v96_v43 = vrot.slane %v94_v37, 5  ;;  %v110_v46 = vrot.slane %v108_v40, 5 }
   0xd   :  { %v97_v44 = vsel %vm184_vm2, %v92_v42, %v96_v43  ;;  %v105_v45 = vor.u32 %v104_v41, %v101_v34 }
   0xf   :  { %v106_v47 = vrot.slane %v105_v45, 4 }
  0x11   :  { %v111_v48 = vsel %vm184_vm2, %v106_v47, %v110_v46 }
  0x74   :  { %v18_v49 = vpop.permute.xlu0 %17 }
  0x75   :  { %v23_v50 = vmax.bf16 %v18_v49, %v13_v22  ;;  %v38_v52 = vpop.permute.xlu1 %37 }
  0x77   :  { %v28_v53 = vmax.bf16 %v133_v2, %v23_v50 }
  0x78   :  { %v20_v54 = vpop.permute.xlu0 %19 }
  0x79   :  { %v24_v55 = vmax.bf16 %v20_v54, %v14_v33  ;;  %v33_v56 = vmax.bf16 %v135_v51, %v28_v53  ;;  %v40_v60 = vpop.permute.xlu1 %39 }
  0x7b   :  { %v29_v58 = vmax.bf16 %v134_v7, %v24_v55  ;;  %v43_v59 = vmax.bf16 %v38_v52, %v33_v56 }
  0x7d   :  { %v80_v61 = vmax.bf16 %v63_v38, %v43_v59  ;;  %v34_v62 = vmax.bf16 %v136_v57, %v29_v58  ;;  %v117_v63 = vpop.permute.xlu0 %116  ;;  %v119_v5 = vpop.permute.xlu1 %118 }
  0x7f   :  { %v44_v0 = vmax.bf16 %v40_v60, %v34_v62  ;;  %v114_v1 = vmax.bf16 %v97_v44, %v80_v61 }
  0x81   :  { %v81_v3 = vmax.bf16 %v77_v39, %v44_v0  ;;  %v122_v4 = vmax.bf16 %v117_v63, %v114_v1 }
  0x83   :  { %125 = vst.msk [vmem:[%s214_s1] sm:$0xf] %vm124_vm3, %v122_v4  ;;  %v115_v2 = vmax.bf16 %v111_v48, %v81_v3 }
  0x85   :  { %v123_v6 = vmax.bf16 %v119_v5, %v115_v2 }
  0x87   :  { %126 = vst.msk [vmem:[%s214_s1 + $0x4] sm:$0xf] %vm124_vm3, %v123_v6 }

// kernel: _lambda_.12
= control target key start
LH: loop header
LB: loop body
LE: loop exit
PB: predicated region body
PF: predicated region fallthrough
CT: control target
= control target key end

     0   :  { %v827_v0 = vmov 0.0   ;;  %vm828_vm0 = vmmov 0   ;;  %vm80_vm1 = vcmask 654336   ;;  %vm297_vm2 = vcmask 519168   ;;  %s1024_s1 = inlined_call_operand.vmem [shape: bf16[3,80,64], index: 1, kind: input, shape index: {}]   ;;  %s1025_s0 = inlined_call_operand.vmem [shape: bf16[1,2,10,80], index: 0, kind: input, shape index: {}]   ;;  %s1026_s2 = inlined_call_operand.vmem [shape: f32[1,64], index: 2, kind: input, shape index: {}]   ;;  %s1027_s3 = inlined_call_operand.vmem [shape: bf16[2,8,64], index: 3, kind: output, shape index: {}]  }
   0x1   :  { %707 = vmatprep.subr.bf16.mxu0 %v827_v0  ;;  %721 = vmatprep.subr.bf16.mxu1 %v827_v0  ;;  %v793_v1 = vld [vmem:[%s1024_s1 + $0x28] sm:$0xff]   ;;  %v794_v2 = vld [vmem:[%s1024_s1] sm:$0xff]   ;;  %v795_v3 = vld [vmem:[%s1024_s1 + $0x30] sm:$0xff]  }
   0x2   :  { %717 = vmatprep.mubr.msk.bf16.mxu0 %vm828_vm0, %v827_v0  ;;  %731 = vmatprep.mubr.msk.bf16.mxu1 %vm828_vm0, %v827_v0  ;;  %v796_v4 = vld [vmem:[%s1024_s1 + $0x8] sm:$0xff]   ;;  %v797_v5 = vld [vmem:[%s1024_s1 + $0x38] sm:$0xff]   ;;  %v798_v6 = vld [vmem:[%s1024_s1 + $0x10] sm:$0xff]  }
   0x3   :  { %708 = vmatpush3.bf16.msra.mxu0 %v793_v1  ;;  %722 = vmatpush3.bf16.msra.mxu1 %v794_v2  ;;  %v799_v7 = vld [vmem:[%s1024_s1 + $0x40] sm:$0xff]   ;;  %v800_v10 = vld [vmem:[%s1024_s1 + $0x18] sm:$0xff]   ;;  %v801_v12 = vld [vmem:[%s1024_s1 + $0x48] sm:$0xff]  }
   0x4   :  { %709 = vmatprep.subr.bf16.mxu0 %v827_v0  ;;  %723 = vmatprep.subr.bf16.mxu1 %v827_v0  ;;  %v15_v8 = vld [vmem:[%s1025_s0] sm:$0xf]  ;;  %v26_v9 = vld [vmem:[%s1025_s0 + $0x4] sm:$0x1]  ;;  %v804_v18 = vld [vmem:[%s1024_s1 + $0x50] sm:$0xff]  }
   0x5   :  { %v595_v11 = vcombine.low %v15_v8, %v26_v9  ;;  %v802_v15 = vld [vmem:[%s1024_s1 + $0x20] sm:$0xff]   ;;  %v805_v19 = vld [vmem:[%s1024_s1 + $0x28] sm:$0xff]   ;;  %v806_v20 = vld [vmem:[%s1024_s1 + $0x58] sm:$0xff]  }
   0x6   :  { %v807_v21 = vld [vmem:[%s1024_s1 + $0x30] sm:$0xff]   ;;  %v918_v22 = vld [vmem:[%s1025_s0 + $0x8] sm:$0xf]  ;;  %v924_v23 = vld [vmem:[%s1025_s0 + $0xc] sm:$0x1] }
   0x7   :  { %710 = vmatpush3.bf16.msra.mxu0 %v795_v3  ;;  %724 = vmatpush3.bf16.msra.mxu1 %v796_v4  ;;  %v44_v13 = vshrl.u32 %v595_v11, 16  ;;  %v46_v14 = vshll.u32 %v595_v11, 16  ;;  %v808_v24 = vld [vmem:[%s1024_s1 + $0x60] sm:$0xff]   ;;  %v638_v25 = vcombine.low %v918_v22, %v924_v23  ;;  %v809_v26 = vld [vmem:[%s1024_s1 + $0x38] sm:$0xff]   ;;  %v810_v28 = vld [vmem:[%s1024_s1 + $0x68] sm:$0xff]  }
   0x8   :  { %711 = vmatprep.subr.bf16.mxu0 %v827_v0  ;;  %725 = vmatprep.subr.bf16.mxu1 %v827_v0  ;;  %v197_v27 = vld [vmem:[%s1025_s0] sm:$0xe]  ;;  %v812_v32 = vld [vmem:[%s1024_s1 + $0x70] sm:$0xff]   ;;  %v813_v35 = vld [vmem:[%s1024_s1 + $0x48] sm:$0xff]  }
   0x9   :  { %v48_v16 = vrot.slane %v46_v14, 1  ;;  %v330_v29 = vshll.u32 %v638_v25, 16  ;;  %v811_v30 = vld [vmem:[%s1024_s1 + $0x40] sm:$0xff]   ;;  %v618_v31 = vcombine.low %v197_v27, %v26_v9  ;;  %v328_v33 = vshrl.u32 %v638_v25, 16  ;;  %v817_v39 = vld [vmem:[%s1024_s1 + $0x50] sm:$0xff]   ;;  %v818_v40 = vld [vmem:[%s1024_s1 + $0x8] sm:$0xff]  }
   0xa   :  { %v816_v38 = vld [vmem:[%s1024_s1] sm:$0xff]   ;;  %v819_v41 = vld [vmem:[%s1024_s1 + $0x58] sm:$0xff]   ;;  %v820_v42 = vld [vmem:[%s1024_s1 + $0x10] sm:$0xff]  }
   0xb   :  { %712 = vmatpush3.bf16.msra.mxu0 %v797_v5  ;;  %726 = vmatpush3.bf16.msra.mxu1 %v798_v6  ;;  %v49_v17 = vor.u32 %v48_v16, %v44_v13  ;;  %v332_v34 = vrot.slane %v330_v29, 1  ;;  %v212_v36 = vrot.slane %v618_v31, 1  ;;  %v821_v43 = vld [vmem:[%s1024_s1 + $0x60] sm:$0xff]   ;;  %v822_v44 = vld [vmem:[%s1024_s1 + $0x18] sm:$0xff]   ;;  %v823_v45 = vld [vmem:[%s1024_s1 + $0x68] sm:$0xff]  }
   0xc   :  { %713 = vmatprep.subr.bf16.mxu0 %v827_v0  ;;  %727 = vmatprep.subr.bf16.mxu1 %v827_v0  ;;  %v651_v46 = vld [vmem:[%s1025_s0 + $0x8] sm:$0xe]  ;;  %v824_v47 = vld [vmem:[%s1024_s1 + $0x20] sm:$0xff]   ;;  %v825_v49 = vld [vmem:[%s1024_s1 + $0x70] sm:$0xff]  }
   0xd   :  { %v333_v37 = vor.u32 %v332_v34, %v328_v33  ;;  %v662_v48 = vcombine.low %v651_v46, %v924_v23  ;;  %v625_v61 = vld [vmem:[%s1026_s2] ss:$0 sm:$0xff] }
   0xf   :  { %714 = vmatpush3.bf16.msra.mxu0 %v799_v7  ;;  %728 = vmatpush3.bf16.msra.mxu1 %v800_v10  ;;  %v494_v50 = vrot.slane %v662_v48, 1 }
  0x10   :  { %715 = vmatprep.subr.bf16.mxu0 %v827_v0  ;;  %729 = vmatprep.subr.bf16.mxu1 %v827_v0 }
  0x13   :  { %716 = vmatpush3.bf16.msra.mxu0 %v801_v12  ;;  %730 = vmatpush3.bf16.msra.mxu1 %v802_v15 }
  0x14   :  { %735 = vmatprep.subr.bf16.mxu0 %v827_v0  ;;  %749 = vmatprep.subr.bf16.mxu1 %v827_v0 }
  0x16   :  { %718 = vmatmul.mubr.msk.bf16.vlgmr.msra.gmra.mrb[0].mxu0 %vm80_vm1, %v49_v17  ;;  %732 = vmatmul.mubr.msk.bf16.vlgmr.msra.gmra.mrb[0].mxu1 %vm80_vm1, %v15_v8 }
  0x17   :  { %736 = vmatpush3.bf16.msra.mxu0 %v804_v18  ;;  %750 = vmatpush3.bf16.msra.mxu1 %v805_v19 }
  0x18   :  { %737 = vmatprep.subr.bf16.mxu0 %v827_v0  ;;  %751 = vmatprep.subr.bf16.mxu1 %v827_v0 }
  0x19   :  { %745 = vmatprep.mubr.msk.bf16.mxu0 %vm828_vm0, %v827_v0  ;;  %759 = vmatprep.mubr.msk.bf16.mxu1 %vm828_vm0, %v827_v0 }
  0x1b   :  { %738 = vmatpush3.bf16.msra.mxu0 %v806_v20  ;;  %752 = vmatpush3.bf16.msra.mxu1 %v807_v21 }
  0x1c   :  { %739 = vmatprep.subr.bf16.mxu0 %v827_v0  ;;  %753 = vmatprep.subr.bf16.mxu1 %v827_v0 }
  0x1f   :  { %740 = vmatpush3.bf16.msra.mxu0 %v808_v24  ;;  %754 = vmatpush3.bf16.msra.mxu1 %v809_v26 }
  0x20   :  { %741 = vmatprep.subr.bf16.mxu0 %v827_v0  ;;  %755 = vmatprep.subr.bf16.mxu1 %v827_v0 }
  0x23   :  { %742 = vmatpush3.bf16.msra.mxu0 %v810_v28  ;;  %756 = vmatpush3.bf16.msra.mxu1 %v811_v30 }
  0x24   :  { %743 = vmatprep.subr.bf16.mxu0 %v827_v0  ;;  %757 = vmatprep.subr.bf16.mxu1 %v827_v0 }
  0x27   :  { %744 = vmatpush3.bf16.msra.mxu0 %v812_v32  ;;  %758 = vmatpush3.bf16.msra.mxu1 %v813_v35 }
  0x28   :  { %763 = vmatprep.subr.bf16.mxu0 %v827_v0  ;;  %777 = vmatprep.subr.bf16.mxu1 %v827_v0 }
  0x2a   :  { %746 = vmatmul.mubr.msk.bf16.vlgmr.msra.gmra.mrb[4].mxu0 %vm80_vm1, %v212_v36  ;;  %760 = vmatmul.mubr.msk.bf16.vlgmr.msra.gmra.mrb[4].mxu1 %vm80_vm1, %v333_v37 }
  0x2b   :  { %764 = vmatpush3.bf16.msra.mxu0 %v816_v38  ;;  %778 = vmatpush3.bf16.msra.mxu1 %v817_v39 }
  0x2c   :  { %765 = vmatprep.subr.bf16.mxu0 %v827_v0  ;;  %779 = vmatprep.subr.bf16.mxu1 %v827_v0 }
  0x2d   :  { %773 = vmatprep.mubr.msk.bf16.mxu0 %vm828_vm0, %v827_v0  ;;  %787 = vmatprep.mubr.msk.bf16.mxu1 %vm828_vm0, %v827_v0 }
  0x2f   :  { %766 = vmatpush3.bf16.msra.mxu0 %v818_v40  ;;  %780 = vmatpush3.bf16.msra.mxu1 %v819_v41 }
  0x30   :  { %767 = vmatprep.subr.bf16.mxu0 %v827_v0  ;;  %781 = vmatprep.subr.bf16.mxu1 %v827_v0 }
  0x33   :  { %768 = vmatpush3.bf16.msra.mxu0 %v820_v42  ;;  %782 = vmatpush3.bf16.msra.mxu1 %v821_v43 }
  0x34   :  { %769 = vmatprep.subr.bf16.mxu0 %v827_v0  ;;  %783 = vmatprep.subr.bf16.mxu1 %v827_v0 }
  0x37   :  { %770 = vmatpush3.bf16.msra.mxu0 %v822_v44  ;;  %784 = vmatpush3.bf16.msra.mxu1 %v823_v45 }
  0x38   :  { %771 = vmatprep.subr.bf16.mxu0 %v827_v0  ;;  %785 = vmatprep.subr.bf16.mxu1 %v827_v0 }
  0x3b   :  { %772 = vmatpush3.bf16.msra.mxu0 %v824_v47  ;;  %786 = vmatpush3.bf16.msra.mxu1 %v825_v49 }
  0x3e   :  { %774 = vmatmul.mubr.msk.bf16.vlgmr.msra.gmra.mrb[8].mxu0 %vm80_vm1, %v918_v22  ;;  %788 = vmatmul.mubr.msk.bf16.vlgmr.msra.gmra.mrb[8].mxu1 %vm80_vm1, %v494_v50 }
  0xe9   :  { %v118_v51 = vpop.f32.mrb[0].mxu0  ;;  %v191_v52 = vpop.f32.mrb[0].mxu1 }
  0xea   :  { %v719_v53 = vpop.f32.mrb[1].mxu0  ;;  %v192_v54 = vadd.f32 %v191_v52, %v118_v51  ;;  %v733_v55 = vpop.f32.mrb[1].mxu1 }
  0xeb   :  { %v121_v56 = vpop.f32.mrb[2].mxu0  ;;  %v194_v57 = vpop.f32.mrb[2].mxu1 }
  0xec   :  { %v720_v58 = vpop.f32.mrb[3].mxu0  ;;  %v734_v59 = vpop.f32.mrb[3].mxu1 }
  0xfd   :  { %v280_v60 = vpop.f32.mrb[4].mxu0  ;;  %v401_v63 = vpop.f32.mrb[4].mxu1 }
  0xfe   :  { %v286_v62 = vadd.f32 %v280_v60, %v192_v54  ;;  %v747_v0 = vpop.f32.mrb[5].mxu0  ;;  %v761_v1 = vpop.f32.mrb[5].mxu1 }
  0xff   :  { %v283_v2 = vpop.f32.mrb[6].mxu0  ;;  %v404_v4 = vpop.f32.mrb[6].mxu1 }
 0x100   :  { %v294_v3 = vadd.f32 %v625_v61, %v286_v62  ;;  %v748_v5 = vpop.f32.mrb[7].mxu0  ;;  %v762_v6 = vpop.f32.mrb[7].mxu1 }
 0x102   :  { %v295_v7 = vmax.f32 %v294_v3, 0.0 }
 0x104   :  { %v296_v8 = vpack.c.bf16 %v295_v7, %v295_v7 }
 0x106   :  { %298 = vst.msk [vmem:[%s1027_s3] sm:$0xf] %vm297_vm2, %v296_v8 }
 0x111   :  { %v474_v9 = vpop.f32.mrb[8].mxu0  ;;  %v562_v11 = vpop.f32.mrb[8].mxu1 }
 0x112   :  { %v475_v10 = vadd.f32 %v474_v9, %v401_v63  ;;  %v775_v12 = vpop.f32.mrb[9].mxu0  ;;  %v789_v13 = vpop.f32.mrb[9].mxu1 }
 0x113   :  { %v477_v14 = vpop.f32.mrb[10].mxu0  ;;  %v565_v16 = vpop.f32.mrb[10].mxu1 }
 0x114   :  { %v568_v15 = vadd.f32 %v562_v11, %v475_v10  ;;  %v776_v17 = vpop.f32.mrb[11].mxu0  ;;  %v790_v18 = vpop.f32.mrb[11].mxu1 }
 0x116   :  { %v576_v19 = vadd.f32 %v625_v61, %v568_v15 }
 0x118   :  { %v577_v20 = vmax.f32 %v576_v19, 0.0 }
 0x11a   :  { %v578_v21 = vpack.c.bf16 %v577_v20, %v577_v20 }
 0x11c   :  { %670 = vst.msk [vmem:[%s1027_s3 + $0x4] sm:$0xf] %vm297_vm2, %v578_v21 }

// kernel: _lambda_.13
= control target key start
LH: loop header
LB: loop body
LE: loop exit
PB: predicated region body
PF: predicated region fallthrough
CT: control target
= control target key end

     0   :  { %v838_v0 = vmov 0.0   ;;  %vm839_vm0 = vmmov 0   ;;  %vm83_vm1 = vcmask 654336   ;;  %vm303_vm2 = vcmask 519168   ;;  %s1043_s1 = inlined_call_operand.vmem [shape: bf16[3,80,64], index: 1, kind: input, shape index: {}]   ;;  %s1044_s0 = inlined_call_operand.vmem [shape: bf16[1,2,10,80], index: 0, kind: input, shape index: {}]   ;;  %s1045_s3 = inlined_call_operand.vmem [shape: bf16[2,8,64], index: 3, kind: input, shape index: {}]   ;;  %s1046_s2 = inlined_call_operand.vmem [shape: f32[1,64], index: 2, kind: input, shape index: {}]   ;;  %s1047_s4 = inlined_call_operand.vmem [shape: bf16[2,8,64], index: 4, kind: output, shape index: {}]  }
   0x1   :  { %718 = vmatprep.subr.bf16.mxu0 %v838_v0  ;;  %732 = vmatprep.subr.bf16.mxu1 %v838_v0  ;;  %v804_v1 = vld [vmem:[%s1043_s1 + $0x28] sm:$0xff]   ;;  %v805_v2 = vld [vmem:[%s1043_s1] sm:$0xff]   ;;  %v806_v3 = vld [vmem:[%s1043_s1 + $0x30] sm:$0xff]  }
   0x2   :  { %728 = vmatprep.mubr.msk.bf16.mxu0 %vm839_vm0, %v838_v0  ;;  %742 = vmatprep.mubr.msk.bf16.mxu1 %vm839_vm0, %v838_v0  ;;  %v807_v4 = vld [vmem:[%s1043_s1 + $0x8] sm:$0xff]   ;;  %v808_v5 = vld [vmem:[%s1043_s1 + $0x38] sm:$0xff]   ;;  %v809_v6 = vld [vmem:[%s1043_s1 + $0x10] sm:$0xff]  }
   0x3   :  { %719 = vmatpush3.bf16.msra.mxu0 %v804_v1  ;;  %733 = vmatpush3.bf16.msra.mxu1 %v805_v2  ;;  %v810_v7 = vld [vmem:[%s1043_s1 + $0x40] sm:$0xff]   ;;  %v811_v10 = vld [vmem:[%s1043_s1 + $0x18] sm:$0xff]   ;;  %v812_v12 = vld [vmem:[%s1043_s1 + $0x48] sm:$0xff]  }
   0x4   :  { %720 = vmatprep.subr.bf16.mxu0 %v838_v0  ;;  %734 = vmatprep.subr.bf16.mxu1 %v838_v0  ;;  %v18_v8 = vld [vmem:[%s1044_s0] sm:$0xf]  ;;  %v29_v9 = vld [vmem:[%s1044_s0 + $0x4] sm:$0x1]  ;;  %v815_v18 = vld [vmem:[%s1043_s1 + $0x50] sm:$0xff]  }
   0x5   :  { %v605_v11 = vcombine.low %v18_v8, %v29_v9  ;;  %v813_v15 = vld [vmem:[%s1043_s1 + $0x20] sm:$0xff]   ;;  %v816_v19 = vld [vmem:[%s1043_s1 + $0x28] sm:$0xff]   ;;  %v817_v20 = vld [vmem:[%s1043_s1 + $0x58] sm:$0xff]  }
   0x6   :  { %v818_v21 = vld [vmem:[%s1043_s1 + $0x30] sm:$0xff]   ;;  %v934_v22 = vld [vmem:[%s1044_s0 + $0x8] sm:$0xf]  ;;  %v940_v23 = vld [vmem:[%s1044_s0 + $0xc] sm:$0x1] }
   0x7   :  { %721 = vmatpush3.bf16.msra.mxu0 %v806_v3  ;;  %735 = vmatpush3.bf16.msra.mxu1 %v807_v4  ;;  %v47_v13 = vshrl.u32 %v605_v11, 16  ;;  %v49_v14 = vshll.u32 %v605_v11, 16  ;;  %v819_v24 = vld [vmem:[%s1043_s1 + $0x60] sm:$0xff]   ;;  %v648_v25 = vcombine.low %v934_v22, %v940_v23  ;;  %v820_v26 = vld [vmem:[%s1043_s1 + $0x38] sm:$0xff]   ;;  %v821_v28 = vld [vmem:[%s1043_s1 + $0x68] sm:$0xff]  }
   0x8   :  { %722 = vmatprep.subr.bf16.mxu0 %v838_v0  ;;  %736 = vmatprep.subr.bf16.mxu1 %v838_v0  ;;  %v200_v27 = vld [vmem:[%s1044_s0] sm:$0xe]  ;;  %v823_v32 = vld [vmem:[%s1043_s1 + $0x70] sm:$0xff]   ;;  %v824_v35 = vld [vmem:[%s1043_s1 + $0x48] sm:$0xff]  }
   0x9   :  { %v51_v16 = vrot.slane %v49_v14, 1  ;;  %v336_v29 = vshll.u32 %v648_v25, 16  ;;  %v822_v30 = vld [vmem:[%s1043_s1 + $0x40] sm:$0xff]   ;;  %v628_v31 = vcombine.low %v200_v27, %v29_v9  ;;  %v334_v33 = vshrl.u32 %v648_v25, 16  ;;  %v828_v39 = vld [vmem:[%s1043_s1 + $0x50] sm:$0xff]   ;;  %v829_v40 = vld [vmem:[%s1043_s1 + $0x8] sm:$0xff]  }
   0xa   :  { %v827_v38 = vld [vmem:[%s1043_s1] sm:$0xff]   ;;  %v830_v41 = vld [vmem:[%s1043_s1 + $0x58] sm:$0xff]   ;;  %v831_v42 = vld [vmem:[%s1043_s1 + $0x10] sm:$0xff]  }
   0xb   :  { %723 = vmatpush3.bf16.msra.mxu0 %v808_v5  ;;  %737 = vmatpush3.bf16.msra.mxu1 %v809_v6  ;;  %v52_v17 = vor.u32 %v51_v16, %v47_v13  ;;  %v338_v34 = vrot.slane %v336_v29, 1  ;;  %v215_v36 = vrot.slane %v628_v31, 1  ;;  %v832_v43 = vld [vmem:[%s1043_s1 + $0x60] sm:$0xff]   ;;  %v833_v44 = vld [vmem:[%s1043_s1 + $0x18] sm:$0xff]   ;;  %v834_v45 = vld [vmem:[%s1043_s1 + $0x68] sm:$0xff]  }
   0xc   :  { %724 = vmatprep.subr.bf16.mxu0 %v838_v0  ;;  %738 = vmatprep.subr.bf16.mxu1 %v838_v0  ;;  %v661_v46 = vld [vmem:[%s1044_s0 + $0x8] sm:$0xe]  ;;  %v835_v47 = vld [vmem:[%s1043_s1 + $0x20] sm:$0xff]   ;;  %v836_v49 = vld [vmem:[%s1043_s1 + $0x70] sm:$0xff]  }
   0xd   :  { %v339_v37 = vor.u32 %v338_v34, %v334_v33  ;;  %v672_v48 = vcombine.low %v661_v46, %v940_v23  ;;  %v298_v60 = vld [vmem:[%s1045_s3] sm:$0xff]  }
   0xe   :  { %v635_v62 = vld [vmem:[%s1046_s2] ss:$0 sm:$0xff] }
   0xf   :  { %725 = vmatpush3.bf16.msra.mxu0 %v810_v7  ;;  %739 = vmatpush3.bf16.msra.mxu1 %v811_v10  ;;  %v500_v50 = vrot.slane %v672_v48, 1 }
  0x10   :  { %726 = vmatprep.subr.bf16.mxu0 %v838_v0  ;;  %740 = vmatprep.subr.bf16.mxu1 %v838_v0 }
  0x13   :  { %727 = vmatpush3.bf16.msra.mxu0 %v812_v12  ;;  %741 = vmatpush3.bf16.msra.mxu1 %v813_v15 }
  0x14   :  { %746 = vmatprep.subr.bf16.mxu0 %v838_v0  ;;  %760 = vmatprep.subr.bf16.mxu1 %v838_v0 }
  0x16   :  { %729 = vmatmul.mubr.msk.bf16.vlgmr.msra.gmra.mrb[0].mxu0 %vm83_vm1, %v52_v17  ;;  %743 = vmatmul.mubr.msk.bf16.vlgmr.msra.gmra.mrb[0].mxu1 %vm83_vm1, %v18_v8 }
  0x17   :  { %747 = vmatpush3.bf16.msra.mxu0 %v815_v18  ;;  %761 = vmatpush3.bf16.msra.mxu1 %v816_v19  ;;  %v585_v19 = vunpack.c.h.bf16 %v298_v60 }
  0x18   :  { %748 = vmatprep.subr.bf16.mxu0 %v838_v0  ;;  %762 = vmatprep.subr.bf16.mxu1 %v838_v0 }
  0x19   :  { %756 = vmatprep.mubr.msk.bf16.mxu0 %vm839_vm0, %v838_v0  ;;  %770 = vmatprep.mubr.msk.bf16.mxu1 %vm839_vm0, %v838_v0 }
  0x1b   :  { %749 = vmatpush3.bf16.msra.mxu0 %v817_v20  ;;  %763 = vmatpush3.bf16.msra.mxu1 %v818_v21 }
  0x1c   :  { %750 = vmatprep.subr.bf16.mxu0 %v838_v0  ;;  %764 = vmatprep.subr.bf16.mxu1 %v838_v0 }
  0x1f   :  { %751 = vmatpush3.bf16.msra.mxu0 %v819_v24  ;;  %765 = vmatpush3.bf16.msra.mxu1 %v820_v26 }
  0x20   :  { %752 = vmatprep.subr.bf16.mxu0 %v838_v0  ;;  %766 = vmatprep.subr.bf16.mxu1 %v838_v0 }
  0x23   :  { %753 = vmatpush3.bf16.msra.mxu0 %v821_v28  ;;  %767 = vmatpush3.bf16.msra.mxu1 %v822_v30 }
  0x24   :  { %754 = vmatprep.subr.bf16.mxu0 %v838_v0  ;;  %768 = vmatprep.subr.bf16.mxu1 %v838_v0 }
  0x27   :  { %755 = vmatpush3.bf16.msra.mxu0 %v823_v32  ;;  %769 = vmatpush3.bf16.msra.mxu1 %v824_v35 }
  0x28   :  { %774 = vmatprep.subr.bf16.mxu0 %v838_v0  ;;  %788 = vmatprep.subr.bf16.mxu1 %v838_v0 }
  0x2a   :  { %757 = vmatmul.mubr.msk.bf16.vlgmr.msra.gmra.mrb[4].mxu0 %vm83_vm1, %v215_v36  ;;  %771 = vmatmul.mubr.msk.bf16.vlgmr.msra.gmra.mrb[4].mxu1 %vm83_vm1, %v339_v37 }
  0x2b   :  { %775 = vmatpush3.bf16.msra.mxu0 %v827_v38  ;;  %789 = vmatpush3.bf16.msra.mxu1 %v828_v39 }
  0x2c   :  { %776 = vmatprep.subr.bf16.mxu0 %v838_v0  ;;  %790 = vmatprep.subr.bf16.mxu1 %v838_v0 }
  0x2d   :  { %784 = vmatprep.mubr.msk.bf16.mxu0 %vm839_vm0, %v838_v0  ;;  %798 = vmatprep.mubr.msk.bf16.mxu1 %vm839_vm0, %v838_v0 }
  0x2f   :  { %777 = vmatpush3.bf16.msra.mxu0 %v829_v40  ;;  %791 = vmatpush3.bf16.msra.mxu1 %v830_v41 }
  0x30   :  { %778 = vmatprep.subr.bf16.mxu0 %v838_v0  ;;  %792 = vmatprep.subr.bf16.mxu1 %v838_v0 }
  0x33   :  { %779 = vmatpush3.bf16.msra.mxu0 %v831_v42  ;;  %793 = vmatpush3.bf16.msra.mxu1 %v832_v43 }
  0x34   :  { %780 = vmatprep.subr.bf16.mxu0 %v838_v0  ;;  %794 = vmatprep.subr.bf16.mxu1 %v838_v0 }
  0x37   :  { %781 = vmatpush3.bf16.msra.mxu0 %v833_v44  ;;  %795 = vmatpush3.bf16.msra.mxu1 %v834_v45 }
  0x38   :  { %782 = vmatprep.subr.bf16.mxu0 %v838_v0  ;;  %796 = vmatprep.subr.bf16.mxu1 %v838_v0  ;;  %v299_v0 = vunpack.c.l.bf16 %v298_v60 }
  0x3b   :  { %783 = vmatpush3.bf16.msra.mxu0 %v835_v47  ;;  %797 = vmatpush3.bf16.msra.mxu1 %v836_v49 }
  0x3e   :  { %785 = vmatmul.mubr.msk.bf16.vlgmr.msra.gmra.mrb[8].mxu0 %vm83_vm1, %v934_v22  ;;  %799 = vmatmul.mubr.msk.bf16.vlgmr.msra.gmra.mrb[8].mxu1 %vm83_vm1, %v500_v50 }
  0xe9   :  { %v121_v51 = vpop.f32.mrb[0].mxu0  ;;  %v194_v52 = vpop.f32.mrb[0].mxu1 }
  0xea   :  { %v730_v53 = vpop.f32.mrb[1].mxu0  ;;  %v195_v54 = vadd.f32 %v194_v52, %v121_v51  ;;  %v744_v55 = vpop.f32.mrb[1].mxu1 }
  0xeb   :  { %v124_v56 = vpop.f32.mrb[2].mxu0  ;;  %v197_v57 = vpop.f32.mrb[2].mxu1 }
  0xec   :  { %v731_v58 = vpop.f32.mrb[3].mxu0  ;;  %v745_v59 = vpop.f32.mrb[3].mxu1 }
  0xfd   :  { %v283_v61 = vpop.f32.mrb[4].mxu0  ;;  %v407_v1 = vpop.f32.mrb[4].mxu1 }
  0xfe   :  { %v289_v63 = vadd.f32 %v283_v61, %v195_v54  ;;  %v758_v2 = vpop.f32.mrb[5].mxu0  ;;  %v772_v3 = vpop.f32.mrb[5].mxu1 }
  0xff   :  { %v286_v4 = vpop.f32.mrb[6].mxu0  ;;  %v410_v6 = vpop.f32.mrb[6].mxu1 }
 0x100   :  { %v297_v5 = vadd.f32 %v635_v62, %v289_v63  ;;  %v759_v7 = vpop.f32.mrb[7].mxu0  ;;  %v773_v8 = vpop.f32.mrb[7].mxu1 }
 0x102   :  { %v300_v9 = vadd.f32 %v299_v0, %v297_v5 }
 0x104   :  { %v301_v10 = vmax.f32 %v300_v9, 0.0 }
 0x106   :  { %v302_v11 = vpack.c.bf16 %v301_v10, %v301_v10 }
 0x108   :  { %304 = vst.msk [vmem:[%s1047_s4] sm:$0xf] %vm303_vm2, %v302_v11 }
 0x111   :  { %v480_v12 = vpop.f32.mrb[8].mxu0  ;;  %v568_v14 = vpop.f32.mrb[8].mxu1 }
 0x112   :  { %v481_v13 = vadd.f32 %v480_v12, %v407_v1  ;;  %v786_v15 = vpop.f32.mrb[9].mxu0  ;;  %v800_v16 = vpop.f32.mrb[9].mxu1 }
 0x113   :  { %v483_v17 = vpop.f32.mrb[10].mxu0  ;;  %v571_v20 = vpop.f32.mrb[10].mxu1 }
 0x114   :  { %v574_v18 = vadd.f32 %v568_v14, %v481_v13  ;;  %v787_v21 = vpop.f32.mrb[11].mxu0  ;;  %v801_v22 = vpop.f32.mrb[11].mxu1 }
 0x116   :  { %v582_v23 = vadd.f32 %v635_v62, %v574_v18 }
 0x118   :  { %v586_v24 = vadd.f32 %v585_v19, %v582_v23 }
 0x11a   :  { %v587_v25 = vmax.f32 %v586_v24, 0.0 }
 0x11c   :  { %v588_v26 = vpack.c.bf16 %v587_v25, %v587_v25 }
 0x11e   :  { %681 = vst.msk [vmem:[%s1047_s4 + $0x4] sm:$0xf] %vm303_vm2, %v588_v26 }

// kernel: _lambda_.14
= control target key start
LH: loop header
LB: loop body
LE: loop exit
PB: predicated region body
PF: predicated region fallthrough
CT: control target
= control target key end

     0   :  { %v1080_v0 = vmov 0.0   ;;  %vm1081_vm0 = vmmov 0   ;;  %vm77_vm1 = vcmask 654336   ;;  %vm300_vm2 = vcmask 517120   ;;  %s1347_s1 = inlined_call_operand.vmem [shape: bf16[3,80,64], index: 1, kind: input, shape index: {}]   ;;  %s1348_s3 = inlined_call_operand.vmem [shape: bf16[80,64], index: 3, kind: input, shape index: {}]   ;;  %s1349_s0 = inlined_call_operand.vmem [shape: bf16[2,2,5,80], index: 0, kind: input, shape index: {}]   ;;  %s1350_s4 = inlined_call_operand.vmem [shape: f32[1,64], index: 4, kind: input, shape index: {}, may-alias: {2,4}]   ;;  %s1351_s2 = inlined_call_operand.vmem [shape: f32[1,64], index: 2, kind: input, shape index: {}, may-alias: {2,4}]   ;;  %s1352_s6 = inlined_call_operand.vmem [shape: bf16[2,4,64], index: 6, kind: output, shape index: {1}]   ;;  %s1353_s5 = inlined_call_operand.vmem [shape: bf16[2,4,64], index: 5, kind: output, shape index: {0}]  }
   0x1   :  { %924 = vmatprep.subr.bf16.mxu0 %v1080_v0  ;;  %v1038_v1 = vld [vmem:[%s1347_s1 + $0x28] sm:$0xff]   ;;  %938 = vmatprep.subr.bf16.mxu1 %v1080_v0  ;;  %v1039_v2 = vld [vmem:[%s1347_s1] sm:$0xff]   ;;  %v1040_v3 = vld [vmem:[%s1347_s1 + $0x30] sm:$0xff]  }
   0x2   :  { %934 = vmatprep.mubr.msk.bf16.mxu0 %vm1081_vm0, %v1080_v0  ;;  %948 = vmatprep.mubr.msk.bf16.mxu1 %vm1081_vm0, %v1080_v0  ;;  %v1041_v4 = vld [vmem:[%s1347_s1 + $0x8] sm:$0xff]   ;;  %v1042_v5 = vld [vmem:[%s1347_s1 + $0x38] sm:$0xff]   ;;  %v1043_v6 = vld [vmem:[%s1347_s1 + $0x10] sm:$0xff]  }
   0x3   :  { %925 = vmatpush3.bf16.msra.mxu0 %v1038_v1  ;;  %939 = vmatpush3.bf16.msra.mxu1 %v1039_v2  ;;  %v1044_v7 = vld [vmem:[%s1347_s1 + $0x40] sm:$0xff]   ;;  %v1045_v8 = vld [vmem:[%s1347_s1 + $0x18] sm:$0xff]   ;;  %v1046_v9 = vld [vmem:[%s1347_s1 + $0x48] sm:$0xff]  }
   0x4   :  { %926 = vmatprep.subr.bf16.mxu0 %v1080_v0  ;;  %940 = vmatprep.subr.bf16.mxu1 %v1080_v0  ;;  %v1047_v10 = vld [vmem:[%s1347_s1 + $0x20] sm:$0xff]   ;;  %v774_v11 = vld [vmem:[%s1349_s0 + $0x8] sm:$0x3]  ;;  %v1048_v13 = vld [vmem:[%s1347_s1 + $0x50] sm:$0xff]  }
   0x5   :  { %v23_v12 = vld [vmem:[%s1349_s0] sm:$0x3]  ;;  %v1050_v15 = vld [vmem:[%s1347_s1 + $0x58] sm:$0xff]   ;;  %v1051_v16 = vld [vmem:[%s1348_s3 + $0x8] sm:$0xff]  }
   0x6   :  { %v1049_v14 = vld [vmem:[%s1348_s3] sm:$0xff]   ;;  %v1053_v19 = vld [vmem:[%s1348_s3 + $0x10] sm:$0xff]   ;;  %v1054_v21 = vld [vmem:[%s1347_s1 + $0x68] sm:$0xff]  }
   0x7   :  { %927 = vmatpush3.bf16.msra.mxu0 %v1040_v3  ;;  %941 = vmatpush3.bf16.msra.mxu1 %v1041_v4  ;;  %v1058_v17 = vld [vmem:[%s1349_s0] ss:$0 sps:$4 sm:$0x77]   ;;  %v1055_v22 = vld [vmem:[%s1348_s3 + $0x18] sm:$0xff]   ;;  %v1056_v25 = vld [vmem:[%s1347_s1 + $0x70] sm:$0xff]  }
   0x8   :  { %928 = vmatprep.subr.bf16.mxu0 %v1080_v0  ;;  %942 = vmatprep.subr.bf16.mxu1 %v1080_v0  ;;  %v1052_v18 = vld [vmem:[%s1347_s1 + $0x60] sm:$0xff]   ;;  %v212_v20 = vshll.u32 %v1058_v17, 16  ;;  %v210_v23 = vshrl.u32 %v1058_v17, 16  ;;  %v1059_v28 = vld [vmem:[%s1347_s1 + $0x28] sm:$0xff]   ;;  %v1061_v31 = vld [vmem:[%s1347_s1 + $0x30] sm:$0xff]  }
   0x9   :  { %v1057_v26 = vld [vmem:[%s1348_s3 + $0x20] sm:$0xff]   ;;  %v815_v29 = vld [vmem:[%s1349_s0 + $0x8] sm:$0x3]  ;;  %v1063_v33 = vld [vmem:[%s1347_s1 + $0x38] sm:$0xff]  }
   0xa   :  { %v214_v24 = vrot.slane %v212_v20, 1  ;;  %v1060_v30 = vld [vmem:[%s1347_s1] sm:$0xff]   ;;  %v1062_v32 = vld [vmem:[%s1347_s1 + $0x8] sm:$0xff]   ;;  %v1064_v34 = vld [vmem:[%s1347_s1 + $0x10] sm:$0xff]  }
   0xb   :  { %929 = vmatpush3.bf16.msra.mxu0 %v1042_v5  ;;  %943 = vmatpush3.bf16.msra.mxu1 %v1043_v6  ;;  %v1065_v35 = vld [vmem:[%s1347_s1 + $0x40] sm:$0xff]   ;;  %v1066_v36 = vld [vmem:[%s1347_s1 + $0x18] sm:$0xff]   ;;  %v1067_v37 = vld [vmem:[%s1347_s1 + $0x48] sm:$0xff]  }
   0xc   :  { %930 = vmatprep.subr.bf16.mxu0 %v1080_v0  ;;  %944 = vmatprep.subr.bf16.mxu1 %v1080_v0  ;;  %v215_v27 = vor.u32 %v214_v24, %v210_v23  ;;  %v1068_v38 = vld [vmem:[%s1347_s1 + $0x20] sm:$0xff]   ;;  %v824_v39 = vld [vmem:[%s1349_s0 + $0xc] sm:$0x3]  ;;  %v1069_v40 = vld [vmem:[%s1347_s1 + $0x50] sm:$0xff]  }
   0xd   :  { %v823_v41 = vld [vmem:[%s1349_s0 + $0x4] sm:$0x3]  ;;  %v1071_v43 = vld [vmem:[%s1347_s1 + $0x58] sm:$0xff]   ;;  %v1072_v44 = vld [vmem:[%s1348_s3 + $0x8] sm:$0xff]  }
   0xe   :  { %v1070_v42 = vld [vmem:[%s1348_s3] sm:$0xff]   ;;  %v1074_v47 = vld [vmem:[%s1348_s3 + $0x10] sm:$0xff]   ;;  %v1075_v49 = vld [vmem:[%s1347_s1 + $0x68] sm:$0xff]  }
   0xf   :  { %931 = vmatpush3.bf16.msra.mxu0 %v1044_v7  ;;  %945 = vmatpush3.bf16.msra.mxu1 %v1045_v8  ;;  %v1079_v45 = vld [vmem:[%s1349_s0 + $0x4] ss:$0 sps:$4 sm:$0x77]   ;;  %v1076_v50 = vld [vmem:[%s1348_s3 + $0x18] sm:$0xff]   ;;  %v1077_v53 = vld [vmem:[%s1347_s1 + $0x70] sm:$0xff]  }
  0x10   :  { %932 = vmatprep.subr.bf16.mxu0 %v1080_v0  ;;  %946 = vmatprep.subr.bf16.mxu1 %v1080_v0  ;;  %v1073_v46 = vld [vmem:[%s1347_s1 + $0x60] sm:$0xff]   ;;  %v582_v48 = vshll.u32 %v1079_v45, 16  ;;  %v580_v51 = vshrl.u32 %v1079_v45, 16  ;;  %v867_v56 = vld [vmem:[%s1349_s0 + $0xc] sm:$0x3] }
  0x11   :  { %v1078_v54 = vld [vmem:[%s1348_s3 + $0x20] sm:$0xff]  }
  0x12   :  { %v584_v52 = vrot.slane %v582_v48, 1  ;;  %v816_v2 = vld [vmem:[%s1350_s4] ss:$0 sm:$0xff] }
  0x13   :  { %933 = vmatpush3.bf16.msra.mxu0 %v1046_v9  ;;  %947 = vmatpush3.bf16.msra.mxu1 %v1047_v10  ;;  %v814_v4 = vld [vmem:[%s1351_s2] ss:$0 sm:$0xff] }
  0x14   :  { %952 = vmatprep.subr.bf16.mxu0 %v1080_v0  ;;  %966 = vmatprep.subr.bf16.mxu1 %v1080_v0  ;;  %v585_v55 = vor.u32 %v584_v52, %v580_v51 }
  0x16   :  { %935 = vmatmul.mubr.msk.bf16.vlgmr.msra.gmra.mrb[0].mxu0 %vm77_vm1, %v774_v11  ;;  %949 = vmatmul.mubr.msk.bf16.vlgmr.msra.gmra.mrb[0].mxu1 %vm77_vm1, %v23_v12 }
  0x17   :  { %953 = vmatpush3.bf16.msra.mxu0 %v1048_v13  ;;  %967 = vmatpush3.bf16.msra.mxu1 %v1049_v14 }
  0x18   :  { %954 = vmatprep.subr.bf16.mxu0 %v1080_v0  ;;  %968 = vmatprep.subr.bf16.mxu1 %v1080_v0 }
  0x19   :  { %962 = vmatprep.mubr.msk.bf16.mxu0 %vm1081_vm0, %v1080_v0  ;;  %976 = vmatprep.mubr.msk.bf16.mxu1 %vm1081_vm0, %v1080_v0 }
  0x1b   :  { %955 = vmatpush3.bf16.msra.mxu0 %v1050_v15  ;;  %969 = vmatpush3.bf16.msra.mxu1 %v1051_v16 }
  0x1c   :  { %956 = vmatprep.subr.bf16.mxu0 %v1080_v0  ;;  %970 = vmatprep.subr.bf16.mxu1 %v1080_v0 }
  0x1f   :  { %957 = vmatpush3.bf16.msra.mxu0 %v1052_v18  ;;  %971 = vmatpush3.bf16.msra.mxu1 %v1053_v19 }
  0x20   :  { %958 = vmatprep.subr.bf16.mxu0 %v1080_v0  ;;  %972 = vmatprep.subr.bf16.mxu1 %v1080_v0 }
  0x23   :  { %959 = vmatpush3.bf16.msra.mxu0 %v1054_v21  ;;  %973 = vmatpush3.bf16.msra.mxu1 %v1055_v22 }
  0x24   :  { %960 = vmatprep.subr.bf16.mxu0 %v1080_v0  ;;  %974 = vmatprep.subr.bf16.mxu1 %v1080_v0 }
  0x27   :  { %961 = vmatpush3.bf16.msra.mxu0 %v1056_v25  ;;  %975 = vmatpush3.bf16.msra.mxu1 %v1057_v26 }
  0x28   :  { %980 = vmatprep.subr.bf16.mxu0 %v1080_v0  ;;  %994 = vmatprep.subr.bf16.mxu1 %v1080_v0 }
  0x2a   :  { %963 = vmatmul.mubr.msk.bf16.vlgmr.msra.gmra.mrb[4].mxu0 %vm77_vm1, %v215_v27  ;;  %977 = vmatmul.mubr.msk.bf16.vlgmr.msra.gmra.mrb[4].mxu1 %vm77_vm1, %v815_v29 }
  0x2b   :  { %981 = vmatpush3.bf16.msra.mxu0 %v1059_v28  ;;  %995 = vmatpush3.bf16.msra.mxu1 %v1060_v30 }
  0x2c   :  { %982 = vmatprep.subr.bf16.mxu0 %v1080_v0  ;;  %996 = vmatprep.subr.bf16.mxu1 %v1080_v0 }
  0x2d   :  { %990 = vmatprep.mubr.msk.bf16.mxu0 %vm1081_vm0, %v1080_v0  ;;  %1004 = vmatprep.mubr.msk.bf16.mxu1 %vm1081_vm0, %v1080_v0 }
  0x2f   :  { %983 = vmatpush3.bf16.msra.mxu0 %v1061_v31  ;;  %997 = vmatpush3.bf16.msra.mxu1 %v1062_v32 }
  0x30   :  { %984 = vmatprep.subr.bf16.mxu0 %v1080_v0  ;;  %998 = vmatprep.subr.bf16.mxu1 %v1080_v0 }
  0x33   :  { %985 = vmatpush3.bf16.msra.mxu0 %v1063_v33  ;;  %999 = vmatpush3.bf16.msra.mxu1 %v1064_v34 }
  0x34   :  { %986 = vmatprep.subr.bf16.mxu0 %v1080_v0  ;;  %1000 = vmatprep.subr.bf16.mxu1 %v1080_v0 }
  0x37   :  { %987 = vmatpush3.bf16.msra.mxu0 %v1065_v35  ;;  %1001 = vmatpush3.bf16.msra.mxu1 %v1066_v36 }
  0x38   :  { %988 = vmatprep.subr.bf16.mxu0 %v1080_v0  ;;  %1002 = vmatprep.subr.bf16.mxu1 %v1080_v0 }
  0x3b   :  { %989 = vmatpush3.bf16.msra.mxu0 %v1067_v37  ;;  %1003 = vmatpush3.bf16.msra.mxu1 %v1068_v38 }
  0x3c   :  { %1008 = vmatprep.subr.bf16.mxu0 %v1080_v0  ;;  %1022 = vmatprep.subr.bf16.mxu1 %v1080_v0 }
  0x3e   :  { %991 = vmatmul.mubr.msk.bf16.vlgmr.msra.gmra.mrb[8].mxu0 %vm77_vm1, %v824_v39  ;;  %1005 = vmatmul.mubr.msk.bf16.vlgmr.msra.gmra.mrb[8].mxu1 %vm77_vm1, %v823_v41 }
  0x3f   :  { %1009 = vmatpush3.bf16.msra.mxu0 %v1069_v40  ;;  %1023 = vmatpush3.bf16.msra.mxu1 %v1070_v42 }
  0x40   :  { %1010 = vmatprep.subr.bf16.mxu0 %v1080_v0  ;;  %1024 = vmatprep.subr.bf16.mxu1 %v1080_v0 }
  0x41   :  { %1018 = vmatprep.mubr.msk.bf16.mxu0 %vm1081_vm0, %v1080_v0  ;;  %1032 = vmatprep.mubr.msk.bf16.mxu1 %vm1081_vm0, %v1080_v0 }
  0x43   :  { %1011 = vmatpush3.bf16.msra.mxu0 %v1071_v43  ;;  %1025 = vmatpush3.bf16.msra.mxu1 %v1072_v44 }
  0x44   :  { %1012 = vmatprep.subr.bf16.mxu0 %v1080_v0  ;;  %1026 = vmatprep.subr.bf16.mxu1 %v1080_v0 }
  0x47   :  { %1013 = vmatpush3.bf16.msra.mxu0 %v1073_v46  ;;  %1027 = vmatpush3.bf16.msra.mxu1 %v1074_v47 }
  0x48   :  { %1014 = vmatprep.subr.bf16.mxu0 %v1080_v0  ;;  %1028 = vmatprep.subr.bf16.mxu1 %v1080_v0 }
  0x4b   :  { %1015 = vmatpush3.bf16.msra.mxu0 %v1075_v49  ;;  %1029 = vmatpush3.bf16.msra.mxu1 %v1076_v50 }
  0x4c   :  { %1016 = vmatprep.subr.bf16.mxu0 %v1080_v0  ;;  %1030 = vmatprep.subr.bf16.mxu1 %v1080_v0 }
  0x4f   :  { %1017 = vmatpush3.bf16.msra.mxu0 %v1077_v53  ;;  %1031 = vmatpush3.bf16.msra.mxu1 %v1078_v54 }
  0x52   :  { %1019 = vmatmul.mubr.msk.bf16.vlgmr.msra.gmra.mrb[12].mxu0 %vm77_vm1, %v585_v55  ;;  %1033 = vmatmul.mubr.msk.bf16.vlgmr.msra.gmra.mrb[12].mxu1 %vm77_vm1, %v867_v56 }
  0xe9   :  { %v115_v57 = vpop.f32.mrb[0].mxu0  ;;  %v188_v59 = vpop.f32.mrb[0].mxu1 }
  0xea   :  { %v936_v58 = vpop.f32.mrb[1].mxu0  ;;  %v189_v60 = vadd.f32 %v188_v59, %v115_v57  ;;  %v950_v62 = vpop.f32.mrb[1].mxu1 }
  0xeb   :  { %v118_v61 = vpop.f32.mrb[2].mxu0  ;;  %v191_v1 = vpop.f32.mrb[2].mxu1 }
  0xec   :  { %v937_v63 = vpop.f32.mrb[3].mxu0  ;;  %v951_v0 = vpop.f32.mrb[3].mxu1 }
  0xfd   :  { %v283_v3 = vpop.f32.mrb[4].mxu0  ;;  %v387_v7 = vpop.f32.mrb[4].mxu1 }
  0xfe   :  { %v289_v5 = vadd.f32 %v283_v3, %v189_v60  ;;  %v964_v6 = vpop.f32.mrb[5].mxu0  ;;  %v388_v9 = vadd.f32 %v816_v2, %v387_v7  ;;  %v978_v10 = vpop.f32.mrb[5].mxu1 }
  0xff   :  { %v286_v8 = vpop.f32.mrb[6].mxu0  ;;  %v390_v13 = vpop.f32.mrb[6].mxu1 }
 0x100   :  { %v297_v11 = vadd.f32 %v814_v4, %v289_v5  ;;  %v965_v12 = vpop.f32.mrb[7].mxu0  ;;  %v393_v14 = vpack.c.bf16 %v388_v9, %v388_v9  ;;  %v979_v15 = vpop.f32.mrb[7].mxu1 }
 0x102   :  { %v298_v16 = vmax.f32 %v297_v11, 0.0  ;;  %394 = vst.msk [vmem:[%s1352_s6] sm:$0x3] %vm300_vm2, %v393_v14 }
 0x104   :  { %v299_v17 = vpack.c.bf16 %v298_v16, %v298_v16 }
 0x106   :  { %301 = vst.msk [vmem:[%s1353_s5] sm:$0x3] %vm300_vm2, %v299_v17 }
 0x111   :  { %v486_v18 = vpop.f32.mrb[8].mxu0  ;;  %v559_v20 = vpop.f32.mrb[8].mxu1 }
 0x112   :  { %v992_v19 = vpop.f32.mrb[9].mxu0  ;;  %v560_v21 = vadd.f32 %v559_v20, %v486_v18  ;;  %v1006_v23 = vpop.f32.mrb[9].mxu1 }
 0x113   :  { %v489_v22 = vpop.f32.mrb[10].mxu0  ;;  %v562_v25 = vpop.f32.mrb[10].mxu1 }
 0x114   :  { %v993_v24 = vpop.f32.mrb[11].mxu0  ;;  %v1007_v26 = vpop.f32.mrb[11].mxu1 }
 0x125   :  { %v653_v27 = vpop.f32.mrb[12].mxu0  ;;  %v757_v30 = vpop.f32.mrb[12].mxu1 }
 0x126   :  { %v659_v28 = vadd.f32 %v653_v27, %v560_v21  ;;  %v1020_v29 = vpop.f32.mrb[13].mxu0  ;;  %v758_v31 = vadd.f32 %v816_v2, %v757_v30  ;;  %v1034_v33 = vpop.f32.mrb[13].mxu1 }
 0x127   :  { %v656_v32 = vpop.f32.mrb[14].mxu0  ;;  %v760_v36 = vpop.f32.mrb[14].mxu1 }
 0x128   :  { %v667_v34 = vadd.f32 %v814_v4, %v659_v28  ;;  %v1021_v35 = vpop.f32.mrb[15].mxu0  ;;  %v763_v37 = vpack.c.bf16 %v758_v31, %v758_v31  ;;  %v1035_v38 = vpop.f32.mrb[15].mxu1 }
 0x12a   :  { %v668_v39 = vmax.f32 %v667_v34, 0.0  ;;  %875 = vst.msk [vmem:[%s1352_s6 + $0x2] sm:$0x3] %vm300_vm2, %v763_v37 }
 0x12c   :  { %v669_v40 = vpack.c.bf16 %v668_v39, %v668_v39 }
 0x12e   :  { %866 = vst.msk [vmem:[%s1353_s5 + $0x2] sm:$0x3] %vm300_vm2, %v669_v40 }

// kernel: _lambda_.15
= control target key start
LH: loop header
LB: loop body
LE: loop exit
PB: predicated region body
PF: predicated region fallthrough
CT: control target
= control target key end

     0   :  { %v920_v0 = vmov 0.0   ;;  %vm921_vm0 = vmmov 0   ;;  %vm91_vm1 = vcmask 785408   ;;  %vm325_vm2 = vcmask 517120   ;;  %s1144_s1 = inlined_call_operand.vmem [shape: bf16[3,96,64], index: 1, kind: input, shape index: {}]   ;;  %s1145_s0 = inlined_call_operand.vmem [shape: bf16[1,2,6,96], index: 0, kind: input, shape index: {}]   ;;  %s1146_s3 = inlined_call_operand.vmem [shape: bf16[2,4,64], index: 3, kind: input, shape index: {}]   ;;  %s1147_s2 = inlined_call_operand.vmem [shape: f32[1,64], index: 2, kind: input, shape index: {}]   ;;  %s1148_s4 = inlined_call_operand.vmem [shape: bf16[2,4,64], index: 4, kind: output, shape index: {}]  }
   0x1   :  { %782 = vmatprep.subr.bf16.mxu0 %v920_v0  ;;  %798 = vmatprep.subr.bf16.mxu1 %v920_v0  ;;  %v880_v1 = vld [vmem:[%s1144_s1 + $0x30] sm:$0xff]   ;;  %v881_v2 = vld [vmem:[%s1144_s1] sm:$0xff]   ;;  %v882_v3 = vld [vmem:[%s1144_s1 + $0x38] sm:$0xff]  }
   0x2   :  { %794 = vmatprep.mubr.msk.bf16.mxu0 %vm921_vm0, %v920_v0  ;;  %810 = vmatprep.mubr.msk.bf16.mxu1 %vm921_vm0, %v920_v0  ;;  %v883_v4 = vld [vmem:[%s1144_s1 + $0x8] sm:$0xff]   ;;  %v884_v5 = vld [vmem:[%s1144_s1 + $0x40] sm:$0xff]   ;;  %v885_v6 = vld [vmem:[%s1144_s1 + $0x10] sm:$0xff]  }
   0x3   :  { %783 = vmatpush3.bf16.msra.mxu0 %v880_v1  ;;  %799 = vmatpush3.bf16.msra.mxu1 %v881_v2  ;;  %v886_v7 = vld [vmem:[%s1144_s1 + $0x48] sm:$0xff]   ;;  %v887_v8 = vld [vmem:[%s1144_s1 + $0x18] sm:$0xff]   ;;  %v892_v9 = vld [vmem:[%s1145_s0] ss:$0 sps:$4 sm:$0x77]  }
   0x4   :  { %784 = vmatprep.subr.bf16.mxu0 %v920_v0  ;;  %800 = vmatprep.subr.bf16.mxu1 %v920_v0  ;;  %v888_v10 = vld [vmem:[%s1144_s1 + $0x50] sm:$0xff]   ;;  %v51_v11 = vshll.u32 %v892_v9, 16  ;;  %v889_v12 = vld [vmem:[%s1144_s1 + $0x20] sm:$0xff]   ;;  %v49_v13 = vshrl.u32 %v892_v9, 16  ;;  %v890_v15 = vld [vmem:[%s1144_s1 + $0x58] sm:$0xff]  }
   0x5   :  { %v891_v16 = vld [vmem:[%s1144_s1 + $0x28] sm:$0xff]   ;;  %v893_v18 = vld [vmem:[%s1144_s1 + $0x60] sm:$0xff]   ;;  %v894_v20 = vld [vmem:[%s1144_s1 + $0x30] sm:$0xff]  }
   0x6   :  { %v53_v14 = vrot.slane %v51_v11, 1  ;;  %v18_v19 = vld [vmem:[%s1145_s0] sm:$0x3]  ;;  %v895_v21 = vld [vmem:[%s1144_s1 + $0x68] sm:$0xff]   ;;  %v896_v22 = vld [vmem:[%s1144_s1 + $0x38] sm:$0xff]  }
   0x7   :  { %785 = vmatpush3.bf16.msra.mxu0 %v882_v3  ;;  %801 = vmatpush3.bf16.msra.mxu1 %v883_v4  ;;  %v897_v23 = vld [vmem:[%s1144_s1 + $0x70] sm:$0xff]   ;;  %v898_v24 = vld [vmem:[%s1144_s1 + $0x40] sm:$0xff]   ;;  %v899_v26 = vld [vmem:[%s1144_s1 + $0x78] sm:$0xff]  }
   0x8   :  { %786 = vmatprep.subr.bf16.mxu0 %v920_v0  ;;  %802 = vmatprep.subr.bf16.mxu1 %v920_v0  ;;  %v54_v17 = vor.u32 %v53_v14, %v49_v13  ;;  %v906_v25 = vld [vmem:[%s1145_s0 + $0x4] ss:$0 sps:$4 sm:$0x77]   ;;  %v900_v27 = vld [vmem:[%s1144_s1 + $0x48] sm:$0xff]   ;;  %v902_v30 = vld [vmem:[%s1144_s1 + $0x50] sm:$0xff]  }
   0x9   :  { %v901_v28 = vld [vmem:[%s1144_s1 + $0x80] sm:$0xff]   ;;  %v360_v29 = vshll.u32 %v906_v25, 16  ;;  %v903_v32 = vld [vmem:[%s1144_s1 + $0x88] sm:$0xff]   ;;  %v358_v33 = vshrl.u32 %v906_v25, 16  ;;  %v904_v35 = vld [vmem:[%s1144_s1 + $0x58] sm:$0xff]  }
   0xa   :  { %v905_v31 = vld [vmem:[%s1145_s0] ss:$0 sps:$4 sm:$0x66]   ;;  %v909_v40 = vld [vmem:[%s1144_s1 + $0x8] sm:$0xff]   ;;  %v911_v42 = vld [vmem:[%s1144_s1 + $0x10] sm:$0xff]  }
   0xb   :  { %787 = vmatpush3.bf16.msra.mxu0 %v884_v5  ;;  %803 = vmatpush3.bf16.msra.mxu1 %v885_v6  ;;  %v362_v34 = vrot.slane %v360_v29, 1  ;;  %v231_v36 = vrot.slane %v905_v31, 1  ;;  %v907_v38 = vld [vmem:[%s1144_s1] sm:$0xff]   ;;  %v910_v41 = vld [vmem:[%s1144_s1 + $0x68] sm:$0xff]   ;;  %v912_v43 = vld [vmem:[%s1144_s1 + $0x70] sm:$0xff]  }
   0xc   :  { %788 = vmatprep.subr.bf16.mxu0 %v920_v0  ;;  %804 = vmatprep.subr.bf16.mxu1 %v920_v0  ;;  %v908_v39 = vld [vmem:[%s1144_s1 + $0x60] sm:$0xff]   ;;  %v913_v44 = vld [vmem:[%s1144_s1 + $0x18] sm:$0xff]   ;;  %v917_v48 = vld [vmem:[%s1144_s1 + $0x28] sm:$0xff]  }
   0xd   :  { %v363_v37 = vor.u32 %v362_v34, %v358_v33  ;;  %v914_v45 = vld [vmem:[%s1144_s1 + $0x78] sm:$0xff]   ;;  %v915_v46 = vld [vmem:[%s1144_s1 + $0x20] sm:$0xff]   ;;  %v918_v50 = vld [vmem:[%s1144_s1 + $0x88] sm:$0xff]  }
   0xe   :  { %v916_v47 = vld [vmem:[%s1144_s1 + $0x80] sm:$0xff]  }
   0xf   :  { %789 = vmatpush3.bf16.msra.mxu0 %v886_v7  ;;  %805 = vmatpush3.bf16.msra.mxu1 %v887_v8  ;;  %v919_v49 = vld [vmem:[%s1145_s0 + $0x4] ss:$0 sps:$4 sm:$0x66]   ;;  %v320_v62 = vld [vmem:[%s1146_s3] sm:$0x3] }
  0x10   :  { %790 = vmatprep.subr.bf16.mxu0 %v920_v0  ;;  %806 = vmatprep.subr.bf16.mxu1 %v920_v0  ;;  %v687_v51 = vld [vmem:[%s1145_s0 + $0x4] sm:$0x3]  ;;  %v538_v52 = vrot.slane %v919_v49, 1  ;;  %v321_v2 = vunpack.c.l.bf16 %v320_v62 }
  0x13   :  { %791 = vmatpush3.bf16.msra.mxu0 %v888_v10  ;;  %807 = vmatpush3.bf16.msra.mxu1 %v889_v12 }
  0x14   :  { %792 = vmatprep.subr.bf16.mxu0 %v920_v0  ;;  %808 = vmatprep.subr.bf16.mxu1 %v920_v0 }
  0x17   :  { %793 = vmatpush3.bf16.msra.mxu0 %v890_v15  ;;  %809 = vmatpush3.bf16.msra.mxu1 %v891_v16  ;;  %v738_v15 = vld [vmem:[%s1146_s3 + $0x2] sm:$0x3] }
  0x18   :  { %814 = vmatprep.subr.bf16.mxu0 %v920_v0  ;;  %830 = vmatprep.subr.bf16.mxu1 %v920_v0 }
  0x1a   :  { %795 = vmatmul.mubr.msk.bf16.vlgmr.msra.gmra.mrb[0].mxu0 %vm91_vm1, %v54_v17  ;;  %811 = vmatmul.mubr.msk.bf16.vlgmr.msra.gmra.mrb[0].mxu1 %vm91_vm1, %v18_v19 }
  0x1b   :  { %815 = vmatpush3.bf16.msra.mxu0 %v893_v18  ;;  %831 = vmatpush3.bf16.msra.mxu1 %v894_v20 }
  0x1c   :  { %816 = vmatprep.subr.bf16.mxu0 %v920_v0  ;;  %832 = vmatprep.subr.bf16.mxu1 %v920_v0 }
  0x1d   :  { %826 = vmatprep.mubr.msk.bf16.mxu0 %vm921_vm0, %v920_v0  ;;  %842 = vmatprep.mubr.msk.bf16.mxu1 %vm921_vm0, %v920_v0 }
  0x1f   :  { %817 = vmatpush3.bf16.msra.mxu0 %v895_v21  ;;  %833 = vmatpush3.bf16.msra.mxu1 %v896_v22  ;;  %v629_v22 = vunpack.c.l.bf16 %v738_v15 }
  0x20   :  { %818 = vmatprep.subr.bf16.mxu0 %v920_v0  ;;  %834 = vmatprep.subr.bf16.mxu1 %v920_v0 }
  0x23   :  { %819 = vmatpush3.bf16.msra.mxu0 %v897_v23  ;;  %835 = vmatpush3.bf16.msra.mxu1 %v898_v24 }
  0x24   :  { %820 = vmatprep.subr.bf16.mxu0 %v920_v0  ;;  %836 = vmatprep.subr.bf16.mxu1 %v920_v0 }
  0x27   :  { %821 = vmatpush3.bf16.msra.mxu0 %v899_v26  ;;  %837 = vmatpush3.bf16.msra.mxu1 %v900_v27 }
  0x28   :  { %822 = vmatprep.subr.bf16.mxu0 %v920_v0  ;;  %838 = vmatprep.subr.bf16.mxu1 %v920_v0 }
  0x2b   :  { %823 = vmatpush3.bf16.msra.mxu0 %v901_v28  ;;  %839 = vmatpush3.bf16.msra.mxu1 %v902_v30 }
  0x2c   :  { %824 = vmatprep.subr.bf16.mxu0 %v920_v0  ;;  %840 = vmatprep.subr.bf16.mxu1 %v920_v0 }
  0x2f   :  { %825 = vmatpush3.bf16.msra.mxu0 %v903_v32  ;;  %841 = vmatpush3.bf16.msra.mxu1 %v904_v35 }
  0x30   :  { %846 = vmatprep.subr.bf16.mxu0 %v920_v0  ;;  %862 = vmatprep.subr.bf16.mxu1 %v920_v0 }
  0x32   :  { %827 = vmatmul.mubr.msk.bf16.vlgmr.msra.gmra.mrb[4].mxu0 %vm91_vm1, %v231_v36  ;;  %843 = vmatmul.mubr.msk.bf16.vlgmr.msra.gmra.mrb[4].mxu1 %vm91_vm1, %v363_v37 }
  0x33   :  { %847 = vmatpush3.bf16.msra.mxu0 %v907_v38  ;;  %863 = vmatpush3.bf16.msra.mxu1 %v908_v39 }
  0x34   :  { %848 = vmatprep.subr.bf16.mxu0 %v920_v0  ;;  %864 = vmatprep.subr.bf16.mxu1 %v920_v0 }
  0x35   :  { %858 = vmatprep.mubr.msk.bf16.mxu0 %vm921_vm0, %v920_v0  ;;  %874 = vmatprep.mubr.msk.bf16.mxu1 %vm921_vm0, %v920_v0 }
  0x37   :  { %849 = vmatpush3.bf16.msra.mxu0 %v909_v40  ;;  %865 = vmatpush3.bf16.msra.mxu1 %v910_v41 }
  0x38   :  { %850 = vmatprep.subr.bf16.mxu0 %v920_v0  ;;  %866 = vmatprep.subr.bf16.mxu1 %v920_v0 }
  0x3b   :  { %851 = vmatpush3.bf16.msra.mxu0 %v911_v42  ;;  %867 = vmatpush3.bf16.msra.mxu1 %v912_v43 }
  0x3c   :  { %852 = vmatprep.subr.bf16.mxu0 %v920_v0  ;;  %868 = vmatprep.subr.bf16.mxu1 %v920_v0 }
  0x3f   :  { %853 = vmatpush3.bf16.msra.mxu0 %v913_v44  ;;  %869 = vmatpush3.bf16.msra.mxu1 %v914_v45 }
  0x40   :  { %854 = vmatprep.subr.bf16.mxu0 %v920_v0  ;;  %870 = vmatprep.subr.bf16.mxu1 %v920_v0 }
  0x43   :  { %855 = vmatpush3.bf16.msra.mxu0 %v915_v46  ;;  %871 = vmatpush3.bf16.msra.mxu1 %v916_v47 }
  0x44   :  { %856 = vmatprep.subr.bf16.mxu0 %v920_v0  ;;  %872 = vmatprep.subr.bf16.mxu1 %v920_v0  ;;  %v686_v0 = vld [vmem:[%s1147_s2] ss:$0 sm:$0xff] }
  0x47   :  { %857 = vmatpush3.bf16.msra.mxu0 %v917_v48  ;;  %873 = vmatpush3.bf16.msra.mxu1 %v918_v50 }
  0x4a   :  { %859 = vmatmul.mubr.msk.bf16.vlgmr.msra.gmra.mrb[8].mxu0 %vm91_vm1, %v687_v51  ;;  %875 = vmatmul.mubr.msk.bf16.vlgmr.msra.gmra.mrb[8].mxu1 %vm91_vm1, %v538_v52 }
  0xed   :  { %v129_v53 = vpop.f32.mrb[0].mxu0  ;;  %v208_v54 = vpop.f32.mrb[0].mxu1 }
  0xee   :  { %v796_v55 = vpop.f32.mrb[1].mxu0  ;;  %v209_v56 = vadd.f32 %v208_v54, %v129_v53  ;;  %v812_v57 = vpop.f32.mrb[1].mxu1 }
  0xef   :  { %v132_v58 = vpop.f32.mrb[2].mxu0  ;;  %v211_v59 = vpop.f32.mrb[2].mxu1 }
  0xf0   :  { %v797_v60 = vpop.f32.mrb[3].mxu0  ;;  %v813_v61 = vpop.f32.mrb[3].mxu1 }
 0x105   :  { %v305_v63 = vpop.f32.mrb[4].mxu0  ;;  %v437_v3 = vpop.f32.mrb[4].mxu1 }
 0x106   :  { %v311_v1 = vadd.f32 %v305_v63, %v209_v56  ;;  %v828_v4 = vpop.f32.mrb[5].mxu0  ;;  %v844_v5 = vpop.f32.mrb[5].mxu1 }
 0x107   :  { %v308_v6 = vpop.f32.mrb[6].mxu0  ;;  %v440_v8 = vpop.f32.mrb[6].mxu1 }
 0x108   :  { %v319_v7 = vadd.f32 %v686_v0, %v311_v1  ;;  %v829_v9 = vpop.f32.mrb[7].mxu0  ;;  %v845_v10 = vpop.f32.mrb[7].mxu1 }
 0x10a   :  { %v322_v11 = vadd.f32 %v321_v2, %v319_v7 }
 0x10c   :  { %v323_v12 = vmax.f32 %v322_v11, 0.0 }
 0x10e   :  { %v324_v13 = vpack.c.bf16 %v323_v12, %v323_v12 }
 0x110   :  { %326 = vst.msk [vmem:[%s1148_s4] sm:$0x3] %vm325_vm2, %v324_v13 }
 0x11d   :  { %v516_v14 = vpop.f32.mrb[8].mxu0  ;;  %v612_v17 = vpop.f32.mrb[8].mxu1 }
 0x11e   :  { %v517_v16 = vadd.f32 %v516_v14, %v437_v3  ;;  %v860_v18 = vpop.f32.mrb[9].mxu0  ;;  %v876_v19 = vpop.f32.mrb[9].mxu1 }
 0x11f   :  { %v519_v20 = vpop.f32.mrb[10].mxu0  ;;  %v615_v23 = vpop.f32.mrb[10].mxu1 }
 0x120   :  { %v618_v21 = vadd.f32 %v612_v17, %v517_v16  ;;  %v861_v24 = vpop.f32.mrb[11].mxu0  ;;  %v877_v25 = vpop.f32.mrb[11].mxu1 }
 0x122   :  { %v626_v26 = vadd.f32 %v686_v0, %v618_v21 }
 0x124   :  { %v630_v27 = vadd.f32 %v629_v22, %v626_v26 }
 0x126   :  { %v631_v28 = vmax.f32 %v630_v27, 0.0 }
 0x128   :  { %v632_v29 = vpack.c.bf16 %v631_v28, %v631_v28 }
 0x12a   :  { %739 = vst.msk [vmem:[%s1148_s4 + $0x2] sm:$0x3] %vm325_vm2, %v632_v29 }

// kernel: _lambda_.17
= control target key start
LH: loop header
LB: loop body
LE: loop exit
PB: predicated region body
PF: predicated region fallthrough
CT: control target
= control target key end

     0   :  { %v1087_v0 = vmov 0.0   ;;  %vm1088_vm0 = vmmov 0   ;;  %vm375_vm1 = vcmask 516096   ;;  %s1353_s1 = inlined_call_operand.vmem [shape: bf16[3,128,64], index: 1, kind: input, shape index: {}]   ;;  %s1354_s0 = inlined_call_operand.vmem [shape: bf16[1,2,4,128], index: 0, kind: input, shape index: {}]   ;;  %s1355_s3 = inlined_call_operand.vmem [shape: bf16[2,2,64], index: 3, kind: input, shape index: {}]   ;;  %s1356_s2 = inlined_call_operand.vmem [shape: f32[1,64], index: 2, kind: input, shape index: {}]   ;;  %s1357_s4 = inlined_call_operand.vmem [shape: bf16[2,2,64], index: 4, kind: output, shape index: {}]  }
   0x1   :  { %917 = vmatprep.subr.bf16.mxu0 %v1087_v0  ;;  %937 = vmatprep.subr.bf16.mxu1 %v1087_v0  ;;  %v1039_v1 = vld [vmem:[%s1353_s1 + $0x40] sm:$0xff]   ;;  %v1041_v3 = vld [vmem:[%s1353_s1 + $0x48] sm:$0xff]   ;;  %v1043_v5 = vld [vmem:[%s1353_s1 + $0x50] sm:$0xff]  }
   0x2   :  { %v1040_v2 = vld [vmem:[%s1353_s1] sm:$0xff]   ;;  %933 = vmatprep.mubr.msk.bf16.mxu0 %vm1088_vm0, %v1087_v0  ;;  %953 = vmatprep.mubr.msk.bf16.mxu1 %vm1088_vm0, %v1087_v0  ;;  %v1042_v4 = vld [vmem:[%s1353_s1 + $0x8] sm:$0xff]   ;;  %v1044_v6 = vld [vmem:[%s1353_s1 + $0x10] sm:$0xff]  }
   0x3   :  { %918 = vmatpush3.bf16.msra.mxu0 %v1039_v1  ;;  %938 = vmatpush3.bf16.msra.mxu1 %v1040_v2  ;;  %v1045_v7 = vld [vmem:[%s1353_s1 + $0x58] sm:$0xff]   ;;  %v1047_v9 = vld [vmem:[%s1353_s1 + $0x60] sm:$0xff]   ;;  %v1049_v12 = vld [vmem:[%s1353_s1 + $0x68] sm:$0xff]  }
   0x4   :  { %919 = vmatprep.subr.bf16.mxu0 %v1087_v0  ;;  %939 = vmatprep.subr.bf16.mxu1 %v1087_v0  ;;  %v1046_v8 = vld [vmem:[%s1353_s1 + $0x18] sm:$0xff]   ;;  %v1048_v10 = vld [vmem:[%s1353_s1 + $0x20] sm:$0xff]   ;;  %v1050_v13 = vld [vmem:[%s1353_s1 + $0x28] sm:$0xff]  }
   0x5   :  { %v756_v11 = vld.sshfl [vmem:[%s1354_s0] sm:$0x3 pattern:$0x76325410]  ;;  %v1051_v15 = vld [vmem:[%s1353_s1 + $0x70] sm:$0xff]   ;;  %v1053_v19 = vld [vmem:[%s1353_s1 + $0x78] sm:$0xff]  }
   0x6   :  { %v64_v14 = vshll.u32 %v756_v11, 16  ;;  %v1052_v16 = vld [vmem:[%s1353_s1 + $0x30] sm:$0xff]   ;;  %v62_v17 = vshrl.u32 %v756_v11, 16  ;;  %v1054_v20 = vld [vmem:[%s1353_s1 + $0x38] sm:$0xff]   ;;  %v18_v22 = vld [vmem:[%s1354_s0] sm:$0x1] }
   0x7   :  { %920 = vmatpush3.bf16.msra.mxu0 %v1041_v3  ;;  %940 = vmatpush3.bf16.msra.mxu1 %v1042_v4  ;;  %v1055_v23 = vld [vmem:[%s1353_s1 + $0x80] sm:$0xff]   ;;  %v1057_v25 = vld [vmem:[%s1353_s1 + $0x88] sm:$0xff]   ;;  %v1059_v27 = vld [vmem:[%s1353_s1 + $0x90] sm:$0xff]  }
   0x8   :  { %921 = vmatprep.subr.bf16.mxu0 %v1087_v0  ;;  %941 = vmatprep.subr.bf16.mxu1 %v1087_v0  ;;  %v66_v18 = vrot.slane %v64_v14, 1  ;;  %v1056_v24 = vld [vmem:[%s1353_s1 + $0x40] sm:$0xff]   ;;  %v1058_v26 = vld [vmem:[%s1353_s1 + $0x48] sm:$0xff]   ;;  %v1060_v28 = vld [vmem:[%s1353_s1 + $0x50] sm:$0xff]  }
   0x9   :  { %v1061_v29 = vld [vmem:[%s1353_s1 + $0x98] sm:$0xff]   ;;  %v1063_v31 = vld [vmem:[%s1353_s1 + $0xa0] sm:$0xff]   ;;  %v1065_v33 = vld [vmem:[%s1353_s1 + $0xa8] sm:$0xff]  }
   0xa   :  { %v67_v21 = vor.u32 %v66_v18, %v62_v17  ;;  %v1062_v30 = vld [vmem:[%s1353_s1 + $0x58] sm:$0xff]   ;;  %v1064_v32 = vld [vmem:[%s1353_s1 + $0x60] sm:$0xff]   ;;  %v1066_v34 = vld [vmem:[%s1353_s1 + $0x68] sm:$0xff]  }
   0xb   :  { %922 = vmatpush3.bf16.msra.mxu0 %v1043_v5  ;;  %942 = vmatpush3.bf16.msra.mxu1 %v1044_v6  ;;  %v817_v35 = vld.sshfl [vmem:[%s1354_s0 + $0x2] sm:$0x3 pattern:$0x76325410]  ;;  %v1067_v36 = vld [vmem:[%s1353_s1 + $0xb0] sm:$0xff]   ;;  %v1069_v39 = vld [vmem:[%s1353_s1 + $0xb8] sm:$0xff]  }
   0xc   :  { %923 = vmatprep.subr.bf16.mxu0 %v1087_v0  ;;  %943 = vmatprep.subr.bf16.mxu1 %v1087_v0  ;;  %v423_v37 = vshll.u32 %v817_v35, 16  ;;  %v1068_v38 = vld [vmem:[%s1353_s1 + $0x70] sm:$0xff]   ;;  %v789_v40 = vld.sshfl [vmem:[%s1354_s0] sm:$0x2 pattern:$0x76325410] }
   0xd   :  { %v421_v41 = vshrl.u32 %v817_v35, 16  ;;  %v1070_v43 = vld [vmem:[%s1353_s1 + $0x78] sm:$0xff]   ;;  %v271_v44 = vrot.slane %v789_v40, 1  ;;  %v1071_v46 = vld [vmem:[%s1353_s1] sm:$0xff]   ;;  %v1073_v48 = vld [vmem:[%s1353_s1 + $0x8] sm:$0xff]  }
   0xe   :  { %v425_v42 = vrot.slane %v423_v37, 1  ;;  %v1072_v47 = vld [vmem:[%s1353_s1 + $0x80] sm:$0xff]   ;;  %v1074_v49 = vld [vmem:[%s1353_s1 + $0x88] sm:$0xff]   ;;  %v1075_v50 = vld [vmem:[%s1353_s1 + $0x10] sm:$0xff]  }
   0xf   :  { %924 = vmatpush3.bf16.msra.mxu0 %v1045_v7  ;;  %944 = vmatpush3.bf16.msra.mxu1 %v1046_v8  ;;  %v1076_v51 = vld [vmem:[%s1353_s1 + $0x90] sm:$0xff]   ;;  %v1077_v52 = vld [vmem:[%s1353_s1 + $0x18] sm:$0xff]   ;;  %v1079_v54 = vld [vmem:[%s1353_s1 + $0x20] sm:$0xff]  }
  0x10   :  { %925 = vmatprep.subr.bf16.mxu0 %v1087_v0  ;;  %945 = vmatprep.subr.bf16.mxu1 %v1087_v0  ;;  %v426_v45 = vor.u32 %v425_v42, %v421_v41  ;;  %v1078_v53 = vld [vmem:[%s1353_s1 + $0x98] sm:$0xff]   ;;  %v1080_v55 = vld [vmem:[%s1353_s1 + $0xa0] sm:$0xff]   ;;  %v1081_v56 = vld [vmem:[%s1353_s1 + $0x28] sm:$0xff]  }
  0x11   :  { %v1082_v57 = vld [vmem:[%s1353_s1 + $0xa8] sm:$0xff]   ;;  %v1083_v58 = vld [vmem:[%s1353_s1 + $0x30] sm:$0xff]   ;;  %v1085_v60 = vld [vmem:[%s1353_s1 + $0x38] sm:$0xff]  }
  0x12   :  { %v1084_v59 = vld [vmem:[%s1353_s1 + $0xb0] sm:$0xff]   ;;  %v1086_v61 = vld [vmem:[%s1353_s1 + $0xb8] sm:$0xff]   ;;  %v851_v62 = vld.sshfl [vmem:[%s1354_s0 + $0x2] sm:$0x2 pattern:$0x76325410] }
  0x13   :  { %926 = vmatpush3.bf16.msra.mxu0 %v1047_v9  ;;  %946 = vmatpush3.bf16.msra.mxu1 %v1048_v10  ;;  %v799_v63 = vld [vmem:[%s1354_s0 + $0x2] sm:$0x1]  ;;  %v629_v1 = vrot.slane %v851_v62, 1 }
  0x14   :  { %927 = vmatprep.subr.bf16.mxu0 %v1087_v0  ;;  %947 = vmatprep.subr.bf16.mxu1 %v1087_v0 }
  0x17   :  { %928 = vmatpush3.bf16.msra.mxu0 %v1049_v12  ;;  %948 = vmatpush3.bf16.msra.mxu1 %v1050_v13  ;;  %v798_v12 = vld [vmem:[%s1356_s2] ss:$0 sm:$0xff] }
  0x18   :  { %929 = vmatprep.subr.bf16.mxu0 %v1087_v0  ;;  %949 = vmatprep.subr.bf16.mxu1 %v1087_v0 }
  0x1b   :  { %930 = vmatpush3.bf16.msra.mxu0 %v1051_v15  ;;  %950 = vmatpush3.bf16.msra.mxu1 %v1052_v16 }
  0x1c   :  { %931 = vmatprep.subr.bf16.mxu0 %v1087_v0  ;;  %951 = vmatprep.subr.bf16.mxu1 %v1087_v0 }
  0x1f   :  { %932 = vmatpush3.bf16.msra.mxu0 %v1053_v19  ;;  %952 = vmatpush3.bf16.msra.mxu1 %v1054_v20 }
  0x20   :  { %957 = vmatprep.subr.bf16.mxu0 %v1087_v0  ;;  %977 = vmatprep.subr.bf16.mxu1 %v1087_v0 }
  0x22   :  { %934 = vmatmul.mubr.bf16.vlgmr.msra.gmra.mrb[0].mxu0 %v67_v21  ;;  %954 = vmatmul.mubr.bf16.vlgmr.msra.gmra.mrb[0].mxu1 %v18_v22 }
  0x23   :  { %958 = vmatpush3.bf16.msra.mxu0 %v1055_v23  ;;  %978 = vmatpush3.bf16.msra.mxu1 %v1056_v24 }
  0x24   :  { %959 = vmatprep.subr.bf16.mxu0 %v1087_v0  ;;  %979 = vmatprep.subr.bf16.mxu1 %v1087_v0 }
  0x25   :  { %973 = vmatprep.mubr.msk.bf16.mxu0 %vm1088_vm0, %v1087_v0  ;;  %993 = vmatprep.mubr.msk.bf16.mxu1 %vm1088_vm0, %v1087_v0 }
  0x27   :  { %960 = vmatpush3.bf16.msra.mxu0 %v1057_v25  ;;  %980 = vmatpush3.bf16.msra.mxu1 %v1058_v26 }
  0x28   :  { %961 = vmatprep.subr.bf16.mxu0 %v1087_v0  ;;  %981 = vmatprep.subr.bf16.mxu1 %v1087_v0 }
  0x2b   :  { %962 = vmatpush3.bf16.msra.mxu0 %v1059_v27  ;;  %982 = vmatpush3.bf16.msra.mxu1 %v1060_v28  ;;  %v861_v27 = vld [vmem:[%s1355_s3 + $0x1] sm:$0x1] }
  0x2c   :  { %963 = vmatprep.subr.bf16.mxu0 %v1087_v0  ;;  %983 = vmatprep.subr.bf16.mxu1 %v1087_v0 }
  0x2f   :  { %964 = vmatpush3.bf16.msra.mxu0 %v1061_v29  ;;  %984 = vmatpush3.bf16.msra.mxu1 %v1062_v30 }
  0x30   :  { %965 = vmatprep.subr.bf16.mxu0 %v1087_v0  ;;  %985 = vmatprep.subr.bf16.mxu1 %v1087_v0 }
  0x33   :  { %966 = vmatpush3.bf16.msra.mxu0 %v1063_v31  ;;  %986 = vmatpush3.bf16.msra.mxu1 %v1064_v32 }
  0x34   :  { %967 = vmatprep.subr.bf16.mxu0 %v1087_v0  ;;  %987 = vmatprep.subr.bf16.mxu1 %v1087_v0 }
  0x37   :  { %968 = vmatpush3.bf16.msra.mxu0 %v1065_v33  ;;  %988 = vmatpush3.bf16.msra.mxu1 %v1066_v34  ;;  %v730_v34 = vunpack.c.l.bf16 %v861_v27 }
  0x38   :  { %969 = vmatprep.subr.bf16.mxu0 %v1087_v0  ;;  %989 = vmatprep.subr.bf16.mxu1 %v1087_v0 }
  0x3b   :  { %970 = vmatpush3.bf16.msra.mxu0 %v1067_v36  ;;  %990 = vmatpush3.bf16.msra.mxu1 %v1068_v38 }
  0x3c   :  { %971 = vmatprep.subr.bf16.mxu0 %v1087_v0  ;;  %991 = vmatprep.subr.bf16.mxu1 %v1087_v0 }
  0x3f   :  { %972 = vmatpush3.bf16.msra.mxu0 %v1069_v39  ;;  %992 = vmatpush3.bf16.msra.mxu1 %v1070_v43 }
  0x40   :  { %997 = vmatprep.subr.bf16.mxu0 %v1087_v0  ;;  %1017 = vmatprep.subr.bf16.mxu1 %v1087_v0 }
  0x42   :  { %974 = vmatmul.mubr.bf16.vlgmr.msra.gmra.mrb[4].mxu0 %v271_v44  ;;  %994 = vmatmul.mubr.bf16.vlgmr.msra.gmra.mrb[4].mxu1 %v426_v45 }
  0x43   :  { %998 = vmatpush3.bf16.msra.mxu0 %v1071_v46  ;;  %1018 = vmatpush3.bf16.msra.mxu1 %v1072_v47 }
  0x44   :  { %999 = vmatprep.subr.bf16.mxu0 %v1087_v0  ;;  %1019 = vmatprep.subr.bf16.mxu1 %v1087_v0 }
  0x45   :  { %1013 = vmatprep.mubr.msk.bf16.mxu0 %vm1088_vm0, %v1087_v0  ;;  %1033 = vmatprep.mubr.msk.bf16.mxu1 %vm1088_vm0, %v1087_v0 }
  0x47   :  { %1000 = vmatpush3.bf16.msra.mxu0 %v1073_v48  ;;  %1020 = vmatpush3.bf16.msra.mxu1 %v1074_v49 }
  0x48   :  { %1001 = vmatprep.subr.bf16.mxu0 %v1087_v0  ;;  %1021 = vmatprep.subr.bf16.mxu1 %v1087_v0 }
  0x4b   :  { %1002 = vmatpush3.bf16.msra.mxu0 %v1075_v50  ;;  %1022 = vmatpush3.bf16.msra.mxu1 %v1076_v51 }
  0x4c   :  { %1003 = vmatprep.subr.bf16.mxu0 %v1087_v0  ;;  %1023 = vmatprep.subr.bf16.mxu1 %v1087_v0 }
  0x4f   :  { %1004 = vmatpush3.bf16.msra.mxu0 %v1077_v52  ;;  %1024 = vmatpush3.bf16.msra.mxu1 %v1078_v53 }
  0x50   :  { %1005 = vmatprep.subr.bf16.mxu0 %v1087_v0  ;;  %1025 = vmatprep.subr.bf16.mxu1 %v1087_v0 }
  0x53   :  { %1006 = vmatpush3.bf16.msra.mxu0 %v1079_v54  ;;  %1026 = vmatpush3.bf16.msra.mxu1 %v1080_v55 }
  0x54   :  { %1007 = vmatprep.subr.bf16.mxu0 %v1087_v0  ;;  %1027 = vmatprep.subr.bf16.mxu1 %v1087_v0 }
  0x57   :  { %1008 = vmatpush3.bf16.msra.mxu0 %v1081_v56  ;;  %1028 = vmatpush3.bf16.msra.mxu1 %v1082_v57 }
  0x58   :  { %1009 = vmatprep.subr.bf16.mxu0 %v1087_v0  ;;  %1029 = vmatprep.subr.bf16.mxu1 %v1087_v0 }
  0x5b   :  { %1010 = vmatpush3.bf16.msra.mxu0 %v1083_v58  ;;  %1030 = vmatpush3.bf16.msra.mxu1 %v1084_v59 }
  0x5c   :  { %1011 = vmatprep.subr.bf16.mxu0 %v1087_v0  ;;  %1031 = vmatprep.subr.bf16.mxu1 %v1087_v0  ;;  %v370_v0 = vld [vmem:[%s1355_s3] sm:$0x1] }
  0x5d   :  { %v371_v14 = vunpack.c.l.bf16 %v370_v0 }
  0x5f   :  { %1012 = vmatpush3.bf16.msra.mxu0 %v1085_v60  ;;  %1032 = vmatpush3.bf16.msra.mxu1 %v1086_v61 }
  0x62   :  { %1014 = vmatmul.mubr.bf16.vlgmr.msra.gmra.mrb[8].mxu0 %v799_v63  ;;  %1034 = vmatmul.mubr.bf16.vlgmr.msra.gmra.mrb[8].mxu1 %v629_v1 }
  0xf5   :  { %v151_v2 = vpop.f32.mrb[0].mxu0  ;;  %v239_v3 = vpop.f32.mrb[0].mxu1 }
  0xf6   :  { %v935_v4 = vpop.f32.mrb[1].mxu0  ;;  %v240_v5 = vadd.f32 %v239_v3, %v151_v2  ;;  %v955_v6 = vpop.f32.mrb[1].mxu1 }
  0xf7   :  { %v154_v7 = vpop.f32.mrb[2].mxu0  ;;  %v242_v8 = vpop.f32.mrb[2].mxu1 }
  0xf8   :  { %v936_v9 = vpop.f32.mrb[3].mxu0  ;;  %v956_v10 = vpop.f32.mrb[3].mxu1 }
 0x115   :  { %v355_v11 = vpop.f32.mrb[4].mxu0  ;;  %v510_v15 = vpop.f32.mrb[4].mxu1 }
 0x116   :  { %v361_v13 = vadd.f32 %v355_v11, %v240_v5  ;;  %v975_v16 = vpop.f32.mrb[5].mxu0  ;;  %v995_v17 = vpop.f32.mrb[5].mxu1 }
 0x117   :  { %v358_v18 = vpop.f32.mrb[6].mxu0  ;;  %v513_v20 = vpop.f32.mrb[6].mxu1 }
 0x118   :  { %v369_v19 = vadd.f32 %v798_v12, %v361_v13  ;;  %v976_v21 = vpop.f32.mrb[7].mxu0  ;;  %v996_v22 = vpop.f32.mrb[7].mxu1 }
 0x11a   :  { %v372_v23 = vadd.f32 %v371_v14, %v369_v19 }
 0x11c   :  { %v373_v24 = vmax.f32 %v372_v23, 0.0 }
 0x11e   :  { %v374_v25 = vpack.c.bf16 %v373_v24, %v373_v24 }
 0x120   :  { %376 = vst.msk [vmem:[%s1357_s4] sm:$0x1] %vm375_vm1, %v374_v25 }
 0x135   :  { %v598_v26 = vpop.f32.mrb[8].mxu0  ;;  %v713_v29 = vpop.f32.mrb[8].mxu1 }
 0x136   :  { %v599_v28 = vadd.f32 %v598_v26, %v510_v15  ;;  %v1015_v30 = vpop.f32.mrb[9].mxu0  ;;  %v1035_v31 = vpop.f32.mrb[9].mxu1 }
 0x137   :  { %v601_v32 = vpop.f32.mrb[10].mxu0  ;;  %v716_v35 = vpop.f32.mrb[10].mxu1 }
 0x138   :  { %v719_v33 = vadd.f32 %v713_v29, %v599_v28  ;;  %v1016_v36 = vpop.f32.mrb[11].mxu0  ;;  %v1036_v37 = vpop.f32.mrb[11].mxu1 }
 0x13a   :  { %v727_v38 = vadd.f32 %v798_v12, %v719_v33 }
 0x13c   :  { %v731_v39 = vadd.f32 %v730_v34, %v727_v38 }
 0x13e   :  { %v732_v40 = vmax.f32 %v731_v39, 0.0 }
 0x140   :  { %v733_v41 = vpack.c.bf16 %v732_v40, %v732_v40 }
 0x142   :  { %862 = vst.msk [vmem:[%s1357_s4 + $0x1] sm:$0x1] %vm375_vm1, %v733_v41 }

// kernel: _lambda_.16
= control target key start
LH: loop header
LB: loop body
LE: loop exit
PB: predicated region body
PF: predicated region fallthrough
CT: control target
= control target key end

     0   :  { %v1200_v0 = vmov 0.0   ;;  %vm1201_vm0 = vmmov 0   ;;  %vm87_vm1 = vcmask 785408   ;;  %vm329_vm2 = vcmask 516096   ;;  %s1499_s1 = inlined_call_operand.vmem [shape: bf16[3,96,64], index: 1, kind: input, shape index: {}]   ;;  %s1500_s3 = inlined_call_operand.vmem [shape: bf16[96,64], index: 3, kind: input, shape index: {}]   ;;  %s1501_s0 = inlined_call_operand.vmem [shape: bf16[2,2,3,96], index: 0, kind: input, shape index: {}]   ;;  %s1502_s4 = inlined_call_operand.vmem [shape: f32[1,64], index: 4, kind: input, shape index: {}, may-alias: {2,4}]   ;;  %s1503_s2 = inlined_call_operand.vmem [shape: f32[1,64], index: 2, kind: input, shape index: {}, may-alias: {2,4}]   ;;  %s1504_s6 = inlined_call_operand.vmem [shape: bf16[2,2,64], index: 6, kind: output, shape index: {1}]   ;;  %s1505_s5 = inlined_call_operand.vmem [shape: bf16[2,2,64], index: 5, kind: output, shape index: {0}]  }
   0x1   :  { %1022 = vmatprep.subr.bf16.mxu0 %v1200_v0  ;;  %v1152_v1 = vld [vmem:[%s1499_s1 + $0x30] sm:$0xff]   ;;  %1038 = vmatprep.subr.bf16.mxu1 %v1200_v0  ;;  %v1153_v2 = vld [vmem:[%s1499_s1] sm:$0xff]   ;;  %v1154_v3 = vld [vmem:[%s1499_s1 + $0x38] sm:$0xff]  }
   0x2   :  { %1034 = vmatprep.mubr.msk.bf16.mxu0 %vm1201_vm0, %v1200_v0  ;;  %1050 = vmatprep.mubr.msk.bf16.mxu1 %vm1201_vm0, %v1200_v0  ;;  %v1155_v4 = vld [vmem:[%s1499_s1 + $0x8] sm:$0xff]   ;;  %v1156_v5 = vld [vmem:[%s1499_s1 + $0x40] sm:$0xff]   ;;  %v1157_v6 = vld [vmem:[%s1499_s1 + $0x10] sm:$0xff]  }
   0x3   :  { %1023 = vmatpush3.bf16.msra.mxu0 %v1152_v1  ;;  %1039 = vmatpush3.bf16.msra.mxu1 %v1153_v2  ;;  %v1158_v7 = vld [vmem:[%s1499_s1 + $0x48] sm:$0xff]   ;;  %v1159_v8 = vld [vmem:[%s1499_s1 + $0x18] sm:$0xff]   ;;  %v1160_v9 = vld [vmem:[%s1499_s1 + $0x50] sm:$0xff]  }
   0x4   :  { %1024 = vmatprep.subr.bf16.mxu0 %v1200_v0  ;;  %1040 = vmatprep.subr.bf16.mxu1 %v1200_v0  ;;  %v1161_v10 = vld [vmem:[%s1499_s1 + $0x20] sm:$0xff]   ;;  %v1162_v11 = vld [vmem:[%s1499_s1 + $0x58] sm:$0xff]   ;;  %v1163_v12 = vld [vmem:[%s1499_s1 + $0x28] sm:$0xff]  }
   0x5   :  { %v848_v13 = vld [vmem:[%s1501_s0 + $0x4] sm:$0x1]  ;;  %v23_v14 = vld [vmem:[%s1501_s0] sm:$0x1]  ;;  %v1166_v17 = vld [vmem:[%s1499_s1 + $0x68] sm:$0xff]  }
   0x6   :  { %v1164_v15 = vld [vmem:[%s1499_s1 + $0x60] sm:$0xff]   ;;  %v1167_v18 = vld [vmem:[%s1500_s3 + $0x8] sm:$0xff]   ;;  %v1168_v19 = vld [vmem:[%s1499_s1 + $0x70] sm:$0xff]  }
   0x7   :  { %1025 = vmatpush3.bf16.msra.mxu0 %v1154_v3  ;;  %1041 = vmatpush3.bf16.msra.mxu1 %v1155_v4  ;;  %v1165_v16 = vld [vmem:[%s1500_s3] sm:$0xff]   ;;  %v1169_v20 = vld [vmem:[%s1500_s3 + $0x10] sm:$0xff]   ;;  %v1170_v22 = vld [vmem:[%s1499_s1 + $0x78] sm:$0xff]  }
   0x8   :  { %1026 = vmatprep.subr.bf16.mxu0 %v1200_v0  ;;  %1042 = vmatprep.subr.bf16.mxu1 %v1200_v0  ;;  %v887_v21 = vld.sshfl [vmem:[%s1501_s0] sm:$0x3 pattern:$0x76325410]  ;;  %v1171_v23 = vld [vmem:[%s1500_s3 + $0x18] sm:$0xff]   ;;  %v1174_v29 = vld [vmem:[%s1499_s1 + $0x88] sm:$0xff]  }
   0x9   :  { %v235_v24 = vshll.u32 %v887_v21, 16  ;;  %v1172_v25 = vld [vmem:[%s1499_s1 + $0x80] sm:$0xff]   ;;  %v233_v27 = vshrl.u32 %v887_v21, 16  ;;  %v1175_v30 = vld [vmem:[%s1500_s3 + $0x28] sm:$0xff]   ;;  %v1176_v32 = vld [vmem:[%s1499_s1 + $0x30] sm:$0xff]  }
   0xa   :  { %v1173_v26 = vld [vmem:[%s1500_s3 + $0x20] sm:$0xff]   ;;  %v1178_v35 = vld [vmem:[%s1499_s1 + $0x38] sm:$0xff]   ;;  %v1179_v36 = vld [vmem:[%s1499_s1 + $0x8] sm:$0xff]  }
   0xb   :  { %1027 = vmatpush3.bf16.msra.mxu0 %v1156_v5  ;;  %1043 = vmatpush3.bf16.msra.mxu1 %v1157_v6  ;;  %v237_v28 = vrot.slane %v235_v24, 1  ;;  %v896_v33 = vld [vmem:[%s1501_s0 + $0x4] sm:$0x1]  ;;  %v1181_v38 = vld [vmem:[%s1499_s1 + $0x10] sm:$0xff]   ;;  %v1182_v39 = vld [vmem:[%s1499_s1 + $0x48] sm:$0xff]  }
   0xc   :  { %1028 = vmatprep.subr.bf16.mxu0 %v1200_v0  ;;  %1044 = vmatprep.subr.bf16.mxu1 %v1200_v0  ;;  %v1177_v34 = vld [vmem:[%s1499_s1] sm:$0xff]   ;;  %v1183_v40 = vld [vmem:[%s1499_s1 + $0x18] sm:$0xff]   ;;  %v1184_v41 = vld [vmem:[%s1499_s1 + $0x50] sm:$0xff]  }
   0xd   :  { %v238_v31 = vor.u32 %v237_v28, %v233_v27  ;;  %v1180_v37 = vld [vmem:[%s1499_s1 + $0x40] sm:$0xff]   ;;  %v1186_v43 = vld [vmem:[%s1499_s1 + $0x58] sm:$0xff]   ;;  %v1187_v44 = vld [vmem:[%s1499_s1 + $0x28] sm:$0xff]  }
   0xe   :  { %v1185_v42 = vld [vmem:[%s1499_s1 + $0x20] sm:$0xff]   ;;  %v1190_v49 = vld [vmem:[%s1499_s1 + $0x68] sm:$0xff]   ;;  %v1192_v51 = vld [vmem:[%s1499_s1 + $0x70] sm:$0xff]  }
   0xf   :  { %1029 = vmatpush3.bf16.msra.mxu0 %v1158_v7  ;;  %1045 = vmatpush3.bf16.msra.mxu1 %v1159_v8  ;;  %v906_v45 = vld [vmem:[%s1501_s0 + $0x6] sm:$0x1]  ;;  %v905_v47 = vld [vmem:[%s1501_s0 + $0x2] sm:$0x1]  ;;  %v1191_v50 = vld [vmem:[%s1500_s3 + $0x8] sm:$0xff]  }
  0x10   :  { %1030 = vmatprep.subr.bf16.mxu0 %v1200_v0  ;;  %1046 = vmatprep.subr.bf16.mxu1 %v1200_v0  ;;  %v1188_v46 = vld [vmem:[%s1499_s1 + $0x60] sm:$0xff]   ;;  %v1193_v52 = vld [vmem:[%s1500_s3 + $0x10] sm:$0xff]   ;;  %v1194_v53 = vld [vmem:[%s1499_s1 + $0x78] sm:$0xff]  }
  0x11   :  { %v1189_v48 = vld [vmem:[%s1500_s3] sm:$0xff]   ;;  %v1195_v55 = vld [vmem:[%s1500_s3 + $0x18] sm:$0xff]   ;;  %v1198_v61 = vld [vmem:[%s1499_s1 + $0x88] sm:$0xff]  }
  0x12   :  { %v946_v54 = vld.sshfl [vmem:[%s1501_s0 + $0x2] sm:$0x3 pattern:$0x76325410]  ;;  %v1199_v62 = vld [vmem:[%s1500_s3 + $0x28] sm:$0xff]  }
  0x13   :  { %1031 = vmatpush3.bf16.msra.mxu0 %v1160_v9  ;;  %1047 = vmatpush3.bf16.msra.mxu1 %v1161_v10  ;;  %v642_v56 = vshll.u32 %v946_v54, 16  ;;  %v1196_v57 = vld [vmem:[%s1499_s1 + $0x80] sm:$0xff]   ;;  %v640_v59 = vshrl.u32 %v946_v54, 16 }
  0x14   :  { %1032 = vmatprep.subr.bf16.mxu0 %v1200_v0  ;;  %1048 = vmatprep.subr.bf16.mxu1 %v1200_v0  ;;  %v1197_v58 = vld [vmem:[%s1500_s3 + $0x20] sm:$0xff]  }
  0x15   :  { %v644_v60 = vrot.slane %v642_v56, 1  ;;  %v956_v1 = vld [vmem:[%s1501_s0 + $0x6] sm:$0x1]  ;;  %v897_v10 = vld [vmem:[%s1502_s4] ss:$0 sm:$0xff] }
  0x17   :  { %1033 = vmatpush3.bf16.msra.mxu0 %v1162_v11  ;;  %1049 = vmatpush3.bf16.msra.mxu1 %v1163_v12  ;;  %v645_v63 = vor.u32 %v644_v60, %v640_v59  ;;  %v895_v12 = vld [vmem:[%s1503_s2] ss:$0 sm:$0xff] }
  0x18   :  { %1054 = vmatprep.subr.bf16.mxu0 %v1200_v0  ;;  %1070 = vmatprep.subr.bf16.mxu1 %v1200_v0 }
  0x1a   :  { %1035 = vmatmul.mubr.msk.bf16.vlgmr.msra.gmra.mrb[0].mxu0 %vm87_vm1, %v848_v13  ;;  %1051 = vmatmul.mubr.msk.bf16.vlgmr.msra.gmra.mrb[0].mxu1 %vm87_vm1, %v23_v14 }
  0x1b   :  { %1055 = vmatpush3.bf16.msra.mxu0 %v1164_v15  ;;  %1071 = vmatpush3.bf16.msra.mxu1 %v1165_v16 }
  0x1c   :  { %1056 = vmatprep.subr.bf16.mxu0 %v1200_v0  ;;  %1072 = vmatprep.subr.bf16.mxu1 %v1200_v0 }
  0x1d   :  { %1066 = vmatprep.mubr.msk.bf16.mxu0 %vm1201_vm0, %v1200_v0  ;;  %1082 = vmatprep.mubr.msk.bf16.mxu1 %vm1201_vm0, %v1200_v0 }
  0x1f   :  { %1057 = vmatpush3.bf16.msra.mxu0 %v1166_v17  ;;  %1073 = vmatpush3.bf16.msra.mxu1 %v1167_v18 }
  0x20   :  { %1058 = vmatprep.subr.bf16.mxu0 %v1200_v0  ;;  %1074 = vmatprep.subr.bf16.mxu1 %v1200_v0 }
  0x23   :  { %1059 = vmatpush3.bf16.msra.mxu0 %v1168_v19  ;;  %1075 = vmatpush3.bf16.msra.mxu1 %v1169_v20 }
  0x24   :  { %1060 = vmatprep.subr.bf16.mxu0 %v1200_v0  ;;  %1076 = vmatprep.subr.bf16.mxu1 %v1200_v0 }
  0x27   :  { %1061 = vmatpush3.bf16.msra.mxu0 %v1170_v22  ;;  %1077 = vmatpush3.bf16.msra.mxu1 %v1171_v23 }
  0x28   :  { %1062 = vmatprep.subr.bf16.mxu0 %v1200_v0  ;;  %1078 = vmatprep.subr.bf16.mxu1 %v1200_v0 }
  0x2b   :  { %1063 = vmatpush3.bf16.msra.mxu0 %v1172_v25  ;;  %1079 = vmatpush3.bf16.msra.mxu1 %v1173_v26 }
  0x2c   :  { %1064 = vmatprep.subr.bf16.mxu0 %v1200_v0  ;;  %1080 = vmatprep.subr.bf16.mxu1 %v1200_v0 }
  0x2f   :  { %1065 = vmatpush3.bf16.msra.mxu0 %v1174_v29  ;;  %1081 = vmatpush3.bf16.msra.mxu1 %v1175_v30 }
  0x30   :  { %1086 = vmatprep.subr.bf16.mxu0 %v1200_v0  ;;  %1102 = vmatprep.subr.bf16.mxu1 %v1200_v0 }
  0x32   :  { %1067 = vmatmul.mubr.msk.bf16.vlgmr.msra.gmra.mrb[4].mxu0 %vm87_vm1, %v238_v31  ;;  %1083 = vmatmul.mubr.msk.bf16.vlgmr.msra.gmra.mrb[4].mxu1 %vm87_vm1, %v896_v33 }
  0x33   :  { %1087 = vmatpush3.bf16.msra.mxu0 %v1176_v32  ;;  %1103 = vmatpush3.bf16.msra.mxu1 %v1177_v34 }
  0x34   :  { %1088 = vmatprep.subr.bf16.mxu0 %v1200_v0  ;;  %1104 = vmatprep.subr.bf16.mxu1 %v1200_v0 }
  0x35   :  { %1098 = vmatprep.mubr.msk.bf16.mxu0 %vm1201_vm0, %v1200_v0  ;;  %1114 = vmatprep.mubr.msk.bf16.mxu1 %vm1201_vm0, %v1200_v0 }
  0x37   :  { %1089 = vmatpush3.bf16.msra.mxu0 %v1178_v35  ;;  %1105 = vmatpush3.bf16.msra.mxu1 %v1179_v36 }
  0x38   :  { %1090 = vmatprep.subr.bf16.mxu0 %v1200_v0  ;;  %1106 = vmatprep.subr.bf16.mxu1 %v1200_v0 }
  0x3b   :  { %1091 = vmatpush3.bf16.msra.mxu0 %v1180_v37  ;;  %1107 = vmatpush3.bf16.msra.mxu1 %v1181_v38 }
  0x3c   :  { %1092 = vmatprep.subr.bf16.mxu0 %v1200_v0  ;;  %1108 = vmatprep.subr.bf16.mxu1 %v1200_v0 }
  0x3f   :  { %1093 = vmatpush3.bf16.msra.mxu0 %v1182_v39  ;;  %1109 = vmatpush3.bf16.msra.mxu1 %v1183_v40 }
  0x40   :  { %1094 = vmatprep.subr.bf16.mxu0 %v1200_v0  ;;  %1110 = vmatprep.subr.bf16.mxu1 %v1200_v0 }
  0x43   :  { %1095 = vmatpush3.bf16.msra.mxu0 %v1184_v41  ;;  %1111 = vmatpush3.bf16.msra.mxu1 %v1185_v42 }
  0x44   :  { %1096 = vmatprep.subr.bf16.mxu0 %v1200_v0  ;;  %1112 = vmatprep.subr.bf16.mxu1 %v1200_v0 }
  0x47   :  { %1097 = vmatpush3.bf16.msra.mxu0 %v1186_v43  ;;  %1113 = vmatpush3.bf16.msra.mxu1 %v1187_v44 }
  0x48   :  { %1118 = vmatprep.subr.bf16.mxu0 %v1200_v0  ;;  %1134 = vmatprep.subr.bf16.mxu1 %v1200_v0 }
  0x4a   :  { %1099 = vmatmul.mubr.msk.bf16.vlgmr.msra.gmra.mrb[8].mxu0 %vm87_vm1, %v906_v45  ;;  %1115 = vmatmul.mubr.msk.bf16.vlgmr.msra.gmra.mrb[8].mxu1 %vm87_vm1, %v905_v47 }
  0x4b   :  { %1119 = vmatpush3.bf16.msra.mxu0 %v1188_v46  ;;  %1135 = vmatpush3.bf16.msra.mxu1 %v1189_v48 }
  0x4c   :  { %1120 = vmatprep.subr.bf16.mxu0 %v1200_v0  ;;  %1136 = vmatprep.subr.bf16.mxu1 %v1200_v0 }
  0x4d   :  { %1130 = vmatprep.mubr.msk.bf16.mxu0 %vm1201_vm0, %v1200_v0  ;;  %1146 = vmatprep.mubr.msk.bf16.mxu1 %vm1201_vm0, %v1200_v0 }
  0x4f   :  { %1121 = vmatpush3.bf16.msra.mxu0 %v1190_v49  ;;  %1137 = vmatpush3.bf16.msra.mxu1 %v1191_v50 }
  0x50   :  { %1122 = vmatprep.subr.bf16.mxu0 %v1200_v0  ;;  %1138 = vmatprep.subr.bf16.mxu1 %v1200_v0 }
  0x53   :  { %1123 = vmatpush3.bf16.msra.mxu0 %v1192_v51  ;;  %1139 = vmatpush3.bf16.msra.mxu1 %v1193_v52 }
  0x54   :  { %1124 = vmatprep.subr.bf16.mxu0 %v1200_v0  ;;  %1140 = vmatprep.subr.bf16.mxu1 %v1200_v0 }
  0x57   :  { %1125 = vmatpush3.bf16.msra.mxu0 %v1194_v53  ;;  %1141 = vmatpush3.bf16.msra.mxu1 %v1195_v55 }
  0x58   :  { %1126 = vmatprep.subr.bf16.mxu0 %v1200_v0  ;;  %1142 = vmatprep.subr.bf16.mxu1 %v1200_v0 }
  0x5b   :  { %1127 = vmatpush3.bf16.msra.mxu0 %v1196_v57  ;;  %1143 = vmatpush3.bf16.msra.mxu1 %v1197_v58 }
  0x5c   :  { %1128 = vmatprep.subr.bf16.mxu0 %v1200_v0  ;;  %1144 = vmatprep.subr.bf16.mxu1 %v1200_v0 }
  0x5f   :  { %1129 = vmatpush3.bf16.msra.mxu0 %v1198_v61  ;;  %1145 = vmatpush3.bf16.msra.mxu1 %v1199_v62 }
  0x62   :  { %1131 = vmatmul.mubr.msk.bf16.vlgmr.msra.gmra.mrb[12].mxu0 %vm87_vm1, %v645_v63  ;;  %1147 = vmatmul.mubr.msk.bf16.vlgmr.msra.gmra.mrb[12].mxu1 %vm87_vm1, %v956_v1 }
  0xed   :  { %v125_v2 = vpop.f32.mrb[0].mxu0  ;;  %v204_v4 = vpop.f32.mrb[0].mxu1 }
  0xee   :  { %v1036_v3 = vpop.f32.mrb[1].mxu0  ;;  %v205_v5 = vadd.f32 %v204_v4, %v125_v2  ;;  %v1052_v7 = vpop.f32.mrb[1].mxu1 }
  0xef   :  { %v128_v6 = vpop.f32.mrb[2].mxu0  ;;  %v207_v9 = vpop.f32.mrb[2].mxu1 }
  0xf0   :  { %v1037_v8 = vpop.f32.mrb[3].mxu0  ;;  %v1053_v0 = vpop.f32.mrb[3].mxu1 }
 0x105   :  { %v312_v11 = vpop.f32.mrb[4].mxu0  ;;  %v424_v15 = vpop.f32.mrb[4].mxu1 }
 0x106   :  { %v318_v13 = vadd.f32 %v312_v11, %v205_v5  ;;  %v1068_v14 = vpop.f32.mrb[5].mxu0  ;;  %v425_v17 = vadd.f32 %v897_v10, %v424_v15  ;;  %v1084_v18 = vpop.f32.mrb[5].mxu1 }
 0x107   :  { %v315_v16 = vpop.f32.mrb[6].mxu0  ;;  %v427_v21 = vpop.f32.mrb[6].mxu1 }
 0x108   :  { %v326_v19 = vadd.f32 %v895_v12, %v318_v13  ;;  %v1069_v20 = vpop.f32.mrb[7].mxu0  ;;  %v430_v22 = vpack.c.bf16 %v425_v17, %v425_v17  ;;  %v1085_v23 = vpop.f32.mrb[7].mxu1 }
 0x10a   :  { %v327_v24 = vmax.f32 %v326_v19, 0.0  ;;  %431 = vst.msk [vmem:[%s1504_s6] sm:$0x1] %vm329_vm2, %v430_v22 }
 0x10c   :  { %v328_v25 = vpack.c.bf16 %v327_v24, %v327_v24 }
 0x10e   :  { %330 = vst.msk [vmem:[%s1505_s5] sm:$0x1] %vm329_vm2, %v328_v25 }
 0x11d   :  { %v533_v26 = vpop.f32.mrb[8].mxu0  ;;  %v612_v28 = vpop.f32.mrb[8].mxu1 }
 0x11e   :  { %v1100_v27 = vpop.f32.mrb[9].mxu0  ;;  %v613_v29 = vadd.f32 %v612_v28, %v533_v26  ;;  %v1116_v31 = vpop.f32.mrb[9].mxu1 }
 0x11f   :  { %v536_v30 = vpop.f32.mrb[10].mxu0  ;;  %v615_v33 = vpop.f32.mrb[10].mxu1 }
 0x120   :  { %v1101_v32 = vpop.f32.mrb[11].mxu0  ;;  %v1117_v34 = vpop.f32.mrb[11].mxu1 }
 0x135   :  { %v719_v35 = vpop.f32.mrb[12].mxu0  ;;  %v831_v38 = vpop.f32.mrb[12].mxu1 }
 0x136   :  { %v725_v36 = vadd.f32 %v719_v35, %v613_v29  ;;  %v1132_v37 = vpop.f32.mrb[13].mxu0  ;;  %v832_v39 = vadd.f32 %v897_v10, %v831_v38  ;;  %v1148_v41 = vpop.f32.mrb[13].mxu1 }
 0x137   :  { %v722_v40 = vpop.f32.mrb[14].mxu0  ;;  %v834_v44 = vpop.f32.mrb[14].mxu1 }
 0x138   :  { %v733_v42 = vadd.f32 %v895_v12, %v725_v36  ;;  %v1133_v43 = vpop.f32.mrb[15].mxu0  ;;  %v837_v45 = vpack.c.bf16 %v832_v39, %v832_v39  ;;  %v1149_v46 = vpop.f32.mrb[15].mxu1 }
 0x13a   :  { %v734_v47 = vmax.f32 %v733_v42, 0.0  ;;  %965 = vst.msk [vmem:[%s1504_s6 + $0x1] sm:$0x1] %vm329_vm2, %v837_v45 }
 0x13c   :  { %v735_v48 = vpack.c.bf16 %v734_v47, %v734_v47 }
 0x13e   :  { %955 = vst.msk [vmem:[%s1505_s5 + $0x1] sm:$0x1] %vm329_vm2, %v735_v48 }

// kernel: _lambda_.18
= control target key start
LH: loop header
LB: loop body
LE: loop exit
PB: predicated region body
PF: predicated region fallthrough
CT: control target
= control target key end

     0   :  { %v1379_v0 = vmov 0.0   ;;  %vm1380_vm0 = vmmov 0   ;;  %v1381_v25 = vmov 1966171168   ;;  %v256_v27 = vlaneseq  ;;  %s1762_s1 = inlined_call_operand.vmem [shape: bf16[3,128,64], index: 1, kind: input, shape index: {}]   ;;  %s1763_s3 = inlined_call_operand.vmem [shape: bf16[128,64], index: 3, kind: input, shape index: {}]   ;;  %s1764_s0 = inlined_call_operand.vmem [shape: bf16[2,2,2,128], index: 0, kind: input, shape index: {}]   ;;  %s1765_s4 = inlined_call_operand.vmem [shape: f32[1,64], index: 4, kind: input, shape index: {}, may-alias: {2,4}]   ;;  %s1766_s2 = inlined_call_operand.vmem [shape: f32[1,64], index: 2, kind: input, shape index: {}, may-alias: {2,4}]   ;;  %s1767_s6 = inlined_call_operand.vmem [shape: bf16[2,1,64], index: 6, kind: output, shape index: {1}]   ;;  %s1768_s5 = inlined_call_operand.vmem [shape: bf16[2,1,64], index: 5, kind: output, shape index: {0}]  }
   0x1   :  { %1152 = vmatprep.subr.bf16.mxu0 %v1379_v0  ;;  %v1315_v1 = vld [vmem:[%s1762_s1 + $0x40] sm:$0xff]   ;;  %1172 = vmatprep.subr.bf16.mxu1 %v1379_v0  ;;  %v1317_v3 = vld [vmem:[%s1762_s1 + $0x48] sm:$0xff]   ;;  %v1319_v5 = vld [vmem:[%s1762_s1 + $0x50] sm:$0xff]   ;;  %v254_v26 = vunpack.c.l.s4 %v1381_v25  ;;  %vm364_vm1 = vcmask 516096   ;;  %vm365_vm2 = vsmask.f32 256 }
   0x2   :  { %v1316_v2 = vld [vmem:[%s1762_s1] sm:$0xff]   ;;  %1168 = vmatprep.mubr.msk.bf16.mxu0 %vm1380_vm0, %v1379_v0  ;;  %1188 = vmatprep.mubr.msk.bf16.mxu1 %vm1380_vm0, %v1379_v0  ;;  %v1318_v4 = vld [vmem:[%s1762_s1 + $0x8] sm:$0xff]   ;;  %v1320_v6 = vld [vmem:[%s1762_s1 + $0x10] sm:$0xff]   ;;  %v257_v31 = vshrl.u32 %v256_v27, 7 }
   0x3   :  { %1153 = vmatpush3.bf16.msra.mxu0 %v1315_v1  ;;  %1173 = vmatpush3.bf16.msra.mxu1 %v1316_v2  ;;  %v1321_v7 = vld [vmem:[%s1762_s1 + $0x58] sm:$0xff]   ;;  %v1323_v9 = vld [vmem:[%s1762_s1 + $0x60] sm:$0xff]   ;;  %v1325_v11 = vld [vmem:[%s1762_s1 + $0x68] sm:$0xff]   ;;  %v255_v30 = vunpack.c.0.s8 %v254_v26 }
   0x4   :  { %1154 = vmatprep.subr.bf16.mxu0 %v1379_v0  ;;  %1174 = vmatprep.subr.bf16.mxu1 %v1379_v0  ;;  %v1322_v8 = vld [vmem:[%s1762_s1 + $0x18] sm:$0xff]   ;;  %v1324_v10 = vld [vmem:[%s1762_s1 + $0x20] sm:$0xff]   ;;  %v1326_v12 = vld [vmem:[%s1762_s1 + $0x28] sm:$0xff]  }
   0x5   :  { %v1327_v13 = vld [vmem:[%s1762_s1 + $0x70] sm:$0xff]   ;;  %v1329_v15 = vld [vmem:[%s1762_s1 + $0x78] sm:$0xff]   ;;  %v943_v17 = vld [vmem:[%s1764_s0 + $0x2] sm:$0x1]  ;;  %v258_v34 = vsub.s32 %v255_v30, %v257_v31 }
   0x6   :  { %v1328_v14 = vld [vmem:[%s1762_s1 + $0x30] sm:$0xff]   ;;  %v1330_v16 = vld [vmem:[%s1762_s1 + $0x38] sm:$0xff]   ;;  %v23_v18 = vld [vmem:[%s1764_s0] sm:$0x1] }
   0x7   :  { %1155 = vmatpush3.bf16.msra.mxu0 %v1317_v3  ;;  %1175 = vmatpush3.bf16.msra.mxu1 %v1318_v4  ;;  %v1331_v19 = vld [vmem:[%s1762_s1 + $0x80] sm:$0xff]   ;;  %v1333_v21 = vld [vmem:[%s1762_s1 + $0x88] sm:$0xff]   ;;  %v1335_v23 = vld [vmem:[%s1762_s1 + $0x90] sm:$0xff]   ;;  %v259_v40 = vrot.slane %v23_v18, %v258_v34 }
   0x8   :  { %1156 = vmatprep.subr.bf16.mxu0 %v1379_v0  ;;  %1176 = vmatprep.subr.bf16.mxu1 %v1379_v0  ;;  %v1332_v20 = vld [vmem:[%s1763_s3] sm:$0xff]   ;;  %v1334_v22 = vld [vmem:[%s1763_s3 + $0x8] sm:$0xff]   ;;  %v1336_v24 = vld [vmem:[%s1763_s3 + $0x10] sm:$0xff]  }
   0x9   :  { %v1337_v28 = vld [vmem:[%s1762_s1 + $0x98] sm:$0xff]   ;;  %v1339_v32 = vld [vmem:[%s1762_s1 + $0xa0] sm:$0xff]   ;;  %v1341_v36 = vld [vmem:[%s1762_s1 + $0xa8] sm:$0xff]   ;;  %v266_v43 = vrot.slane %v259_v40, %v258_v34 }
   0xa   :  { %v1338_v29 = vld [vmem:[%s1763_s3 + $0x18] sm:$0xff]   ;;  %v1340_v33 = vld [vmem:[%s1763_s3 + $0x20] sm:$0xff]   ;;  %v1342_v38 = vld [vmem:[%s1763_s3 + $0x28] sm:$0xff]  }
   0xb   :  { %1157 = vmatpush3.bf16.msra.mxu0 %v1319_v5  ;;  %1177 = vmatpush3.bf16.msra.mxu1 %v1320_v6  ;;  %v1538_v35 = vld [vmem:[%s1764_s0 + $0x1] sm:$0x1]  ;;  %v1343_v41 = vld [vmem:[%s1762_s1 + $0xb0] sm:$0xff]   ;;  %v1345_v44 = vld [vmem:[%s1762_s1 + $0xb8] sm:$0xff]   ;;  %v268_v46 = vshrl.u32 %v266_v43, 16 }
   0xc   :  { %1158 = vmatprep.subr.bf16.mxu0 %v1379_v0  ;;  %1178 = vmatprep.subr.bf16.mxu1 %v1379_v0  ;;  %v715_v37 = vrot.slane %v1538_v35, %v258_v34  ;;  %v1344_v42 = vld [vmem:[%s1763_s3 + $0x30] sm:$0xff]   ;;  %v1346_v45 = vld [vmem:[%s1763_s3 + $0x38] sm:$0xff]   ;;  %v1347_v47 = vld [vmem:[%s1762_s1 + $0x40] sm:$0xff]  }
   0xd   :  { %v1000_v48 = vld [vmem:[%s1764_s0 + $0x2] sm:$0x1]  ;;  %v1349_v50 = vld [vmem:[%s1762_s1 + $0x48] sm:$0xff]   ;;  %v1351_v52 = vld [vmem:[%s1762_s1 + $0x50] sm:$0xff]  }
   0xe   :  { %v1549_v39 = vrot.slane %v715_v37, %v258_v34  ;;  %v1348_v49 = vld [vmem:[%s1762_s1] sm:$0xff]   ;;  %v1350_v51 = vld [vmem:[%s1762_s1 + $0x8] sm:$0xff]   ;;  %v1352_v53 = vld [vmem:[%s1762_s1 + $0x10] sm:$0xff]  }
   0xf   :  { %1159 = vmatpush3.bf16.msra.mxu0 %v1321_v7  ;;  %1179 = vmatpush3.bf16.msra.mxu1 %v1322_v8  ;;  %v1353_v54 = vld [vmem:[%s1762_s1 + $0x58] sm:$0xff]   ;;  %v1355_v56 = vld [vmem:[%s1762_s1 + $0x60] sm:$0xff]   ;;  %v1357_v58 = vld [vmem:[%s1762_s1 + $0x68] sm:$0xff]  }
  0x10   :  { %1160 = vmatprep.subr.bf16.mxu0 %v1379_v0  ;;  %1180 = vmatprep.subr.bf16.mxu1 %v1379_v0  ;;  %v1354_v55 = vld [vmem:[%s1762_s1 + $0x18] sm:$0xff]   ;;  %v1356_v57 = vld [vmem:[%s1762_s1 + $0x20] sm:$0xff]   ;;  %v1358_v59 = vld [vmem:[%s1762_s1 + $0x28] sm:$0xff]  }
  0x11   :  { %v1359_v60 = vld [vmem:[%s1762_s1 + $0x70] sm:$0xff]   ;;  %v1361_v62 = vld [vmem:[%s1762_s1 + $0x78] sm:$0xff]   ;;  %v1010_v1 = vld [vmem:[%s1764_s0 + $0x3] sm:$0x1] }
  0x12   :  { %v1360_v61 = vld [vmem:[%s1762_s1 + $0x30] sm:$0xff]   ;;  %v1362_v63 = vld [vmem:[%s1762_s1 + $0x38] sm:$0xff]   ;;  %v1363_v2 = vld [vmem:[%s1762_s1 + $0x80] sm:$0xff]  }
  0x13   :  { %1161 = vmatpush3.bf16.msra.mxu0 %v1323_v9  ;;  %1181 = vmatpush3.bf16.msra.mxu1 %v1324_v10  ;;  %v1364_v3 = vld [vmem:[%s1763_s3] sm:$0xff]   ;;  %v1365_v4 = vld [vmem:[%s1762_s1 + $0x88] sm:$0xff]   ;;  %v1367_v6 = vld [vmem:[%s1762_s1 + $0x90] sm:$0xff]  }
  0x14   :  { %1162 = vmatprep.subr.bf16.mxu0 %v1379_v0  ;;  %1182 = vmatprep.subr.bf16.mxu1 %v1379_v0  ;;  %v1366_v5 = vld [vmem:[%s1763_s3 + $0x8] sm:$0xff]   ;;  %v1368_v7 = vld [vmem:[%s1763_s3 + $0x10] sm:$0xff]   ;;  %v1369_v8 = vld [vmem:[%s1762_s1 + $0x98] sm:$0xff]  }
  0x15   :  { %v1370_v9 = vld [vmem:[%s1763_s3 + $0x18] sm:$0xff]   ;;  %v1371_v10 = vld [vmem:[%s1762_s1 + $0xa0] sm:$0xff]   ;;  %vm1720_vm3 = vmand %vm364_vm1, %vm365_vm2 }
  0x16   :  { %v360_v30 = vld [vmem:[%s1766_s2] sm:$0x1] }
  0x17   :  { %1163 = vmatpush3.bf16.msra.mxu0 %v1325_v11  ;;  %1183 = vmatpush3.bf16.msra.mxu1 %v1326_v12  ;;  %v1372_v11 = vld [vmem:[%s1763_s3 + $0x20] sm:$0xff]   ;;  %v1373_v12 = vld [vmem:[%s1762_s1 + $0xa8] sm:$0xff]  }
  0x18   :  { %1164 = vmatprep.subr.bf16.mxu0 %v1379_v0  ;;  %1184 = vmatprep.subr.bf16.mxu1 %v1379_v0 }
  0x1b   :  { %1165 = vmatpush3.bf16.msra.mxu0 %v1327_v13  ;;  %1185 = vmatpush3.bf16.msra.mxu1 %v1328_v14  ;;  %v1374_v13 = vld [vmem:[%s1763_s3 + $0x28] sm:$0xff]   ;;  %v1375_v14 = vld [vmem:[%s1762_s1 + $0xb0] sm:$0xff]  }
  0x1c   :  { %1166 = vmatprep.subr.bf16.mxu0 %v1379_v0  ;;  %1186 = vmatprep.subr.bf16.mxu1 %v1379_v0 }
  0x1f   :  { %1167 = vmatpush3.bf16.msra.mxu0 %v1329_v15  ;;  %1187 = vmatpush3.bf16.msra.mxu1 %v1330_v16  ;;  %v1376_v15 = vld [vmem:[%s1763_s3 + $0x30] sm:$0xff]   ;;  %v1377_v16 = vld [vmem:[%s1762_s1 + $0xb8] sm:$0xff]  }
  0x20   :  { %1192 = vmatprep.subr.bf16.mxu0 %v1379_v0  ;;  %1212 = vmatprep.subr.bf16.mxu1 %v1379_v0 }
  0x22   :  { %1169 = vmatmul.mubr.bf16.vlgmr.msra.gmra.mrb[0].mxu0 %v943_v17  ;;  %1189 = vmatmul.mubr.bf16.vlgmr.msra.gmra.mrb[0].mxu1 %v23_v18  ;;  %v1378_v17 = vld [vmem:[%s1763_s3 + $0x38] sm:$0xff]   ;;  %v724_v18 = vshrl.u32 %v1549_v39, 16  ;;  %v477_v39 = vld [vmem:[%s1767_s6] sm:$0x1] }
  0x23   :  { %1193 = vmatpush3.bf16.msra.mxu0 %v1331_v19  ;;  %1213 = vmatpush3.bf16.msra.mxu1 %v1332_v20  ;;  %v1069_v19 = vld [vmem:[%s1764_s0 + $0x3] sm:$0x1] }
  0x24   :  { %1194 = vmatprep.subr.bf16.mxu0 %v1379_v0  ;;  %1214 = vmatprep.subr.bf16.mxu1 %v1379_v0 }
  0x25   :  { %1208 = vmatprep.mubr.msk.bf16.mxu0 %vm1380_vm0, %v1379_v0  ;;  %1228 = vmatprep.mubr.msk.bf16.mxu1 %vm1380_vm0, %v1379_v0 }
  0x27   :  { %1195 = vmatpush3.bf16.msra.mxu0 %v1333_v21  ;;  %1215 = vmatpush3.bf16.msra.mxu1 %v1334_v22 }
  0x28   :  { %1196 = vmatprep.subr.bf16.mxu0 %v1379_v0  ;;  %1216 = vmatprep.subr.bf16.mxu1 %v1379_v0 }
  0x2b   :  { %1197 = vmatpush3.bf16.msra.mxu0 %v1335_v23  ;;  %1217 = vmatpush3.bf16.msra.mxu1 %v1336_v24 }
  0x2c   :  { %1198 = vmatprep.subr.bf16.mxu0 %v1379_v0  ;;  %1218 = vmatprep.subr.bf16.mxu1 %v1379_v0 }
  0x2f   :  { %1199 = vmatpush3.bf16.msra.mxu0 %v1337_v28  ;;  %1219 = vmatpush3.bf16.msra.mxu1 %v1338_v29 }
  0x30   :  { %1200 = vmatprep.subr.bf16.mxu0 %v1379_v0  ;;  %1220 = vmatprep.subr.bf16.mxu1 %v1379_v0 }
  0x33   :  { %1201 = vmatpush3.bf16.msra.mxu0 %v1339_v32  ;;  %1221 = vmatpush3.bf16.msra.mxu1 %v1340_v33 }
  0x34   :  { %1202 = vmatprep.subr.bf16.mxu0 %v1379_v0  ;;  %1222 = vmatprep.subr.bf16.mxu1 %v1379_v0 }
  0x37   :  { %1203 = vmatpush3.bf16.msra.mxu0 %v1341_v36  ;;  %1223 = vmatpush3.bf16.msra.mxu1 %v1342_v38 }
  0x38   :  { %1204 = vmatprep.subr.bf16.mxu0 %v1379_v0  ;;  %1224 = vmatprep.subr.bf16.mxu1 %v1379_v0 }
  0x3b   :  { %1205 = vmatpush3.bf16.msra.mxu0 %v1343_v41  ;;  %1225 = vmatpush3.bf16.msra.mxu1 %v1344_v42 }
  0x3c   :  { %1206 = vmatprep.subr.bf16.mxu0 %v1379_v0  ;;  %1226 = vmatprep.subr.bf16.mxu1 %v1379_v0 }
  0x3f   :  { %1207 = vmatpush3.bf16.msra.mxu0 %v1345_v44  ;;  %1227 = vmatpush3.bf16.msra.mxu1 %v1346_v45  ;;  %v367_v45 = vld [vmem:[%s1768_s5] sm:$0x1] }
  0x40   :  { %1232 = vmatprep.subr.bf16.mxu0 %v1379_v0  ;;  %1252 = vmatprep.subr.bf16.mxu1 %v1379_v0 }
  0x42   :  { %1209 = vmatmul.mubr.bf16.vlgmr.msra.gmra.mrb[4].mxu0 %v268_v46  ;;  %1229 = vmatmul.mubr.bf16.vlgmr.msra.gmra.mrb[4].mxu1 %v1000_v48 }
  0x43   :  { %1233 = vmatpush3.bf16.msra.mxu0 %v1347_v47  ;;  %1253 = vmatpush3.bf16.msra.mxu1 %v1348_v49 }
  0x44   :  { %1234 = vmatprep.subr.bf16.mxu0 %v1379_v0  ;;  %1254 = vmatprep.subr.bf16.mxu1 %v1379_v0 }
  0x45   :  { %1248 = vmatprep.mubr.msk.bf16.mxu0 %vm1380_vm0, %v1379_v0  ;;  %1268 = vmatprep.mubr.msk.bf16.mxu1 %vm1380_vm0, %v1379_v0 }
  0x47   :  { %1235 = vmatpush3.bf16.msra.mxu0 %v1349_v50  ;;  %1255 = vmatpush3.bf16.msra.mxu1 %v1350_v51 }
  0x48   :  { %1236 = vmatprep.subr.bf16.mxu0 %v1379_v0  ;;  %1256 = vmatprep.subr.bf16.mxu1 %v1379_v0 }
  0x4b   :  { %1237 = vmatpush3.bf16.msra.mxu0 %v1351_v52  ;;  %1257 = vmatpush3.bf16.msra.mxu1 %v1352_v53 }
  0x4c   :  { %1238 = vmatprep.subr.bf16.mxu0 %v1379_v0  ;;  %1258 = vmatprep.subr.bf16.mxu1 %v1379_v0 }
  0x4f   :  { %1239 = vmatpush3.bf16.msra.mxu0 %v1353_v54  ;;  %1259 = vmatpush3.bf16.msra.mxu1 %v1354_v55 }
  0x50   :  { %1240 = vmatprep.subr.bf16.mxu0 %v1379_v0  ;;  %1260 = vmatprep.subr.bf16.mxu1 %v1379_v0 }
  0x53   :  { %1241 = vmatpush3.bf16.msra.mxu0 %v1355_v56  ;;  %1261 = vmatpush3.bf16.msra.mxu1 %v1356_v57 }
  0x54   :  { %1242 = vmatprep.subr.bf16.mxu0 %v1379_v0  ;;  %1262 = vmatprep.subr.bf16.mxu1 %v1379_v0 }
  0x57   :  { %1243 = vmatpush3.bf16.msra.mxu0 %v1357_v58  ;;  %1263 = vmatpush3.bf16.msra.mxu1 %v1358_v59  ;;  %v841_v58 = vld [vmem:[%s1765_s4] sm:$0x1] }
  0x58   :  { %1244 = vmatprep.subr.bf16.mxu0 %v1379_v0  ;;  %1264 = vmatprep.subr.bf16.mxu1 %v1379_v0 }
  0x5b   :  { %1245 = vmatpush3.bf16.msra.mxu0 %v1359_v60  ;;  %1265 = vmatpush3.bf16.msra.mxu1 %v1360_v61  ;;  %v816_v60 = vld [vmem:[%s1766_s2] sm:$0x1] }
  0x5c   :  { %1246 = vmatprep.subr.bf16.mxu0 %v1379_v0  ;;  %1266 = vmatprep.subr.bf16.mxu1 %v1379_v0 }
  0x5f   :  { %1247 = vmatpush3.bf16.msra.mxu0 %v1361_v62  ;;  %1267 = vmatpush3.bf16.msra.mxu1 %v1362_v63 }
  0x60   :  { %1272 = vmatprep.subr.bf16.mxu0 %v1379_v0  ;;  %1292 = vmatprep.subr.bf16.mxu1 %v1379_v0 }
  0x62   :  { %1249 = vmatmul.mubr.bf16.vlgmr.msra.gmra.mrb[8].mxu0 %v1010_v1  ;;  %1269 = vmatmul.mubr.bf16.vlgmr.msra.gmra.mrb[8].mxu1 %v1538_v35 }
  0x63   :  { %1273 = vmatpush3.bf16.msra.mxu0 %v1363_v2  ;;  %1293 = vmatpush3.bf16.msra.mxu1 %v1364_v3 }
  0x64   :  { %1274 = vmatprep.subr.bf16.mxu0 %v1379_v0  ;;  %1294 = vmatprep.subr.bf16.mxu1 %v1379_v0 }
  0x65   :  { %1288 = vmatprep.mubr.msk.bf16.mxu0 %vm1380_vm0, %v1379_v0  ;;  %1308 = vmatprep.mubr.msk.bf16.mxu1 %vm1380_vm0, %v1379_v0 }
  0x67   :  { %1275 = vmatpush3.bf16.msra.mxu0 %v1365_v4  ;;  %1295 = vmatpush3.bf16.msra.mxu1 %v1366_v5  ;;  %v1078_v5 = vld [vmem:[%s1767_s6 + $0x1] sm:$0x1] }
  0x68   :  { %1276 = vmatprep.subr.bf16.mxu0 %v1379_v0  ;;  %1296 = vmatprep.subr.bf16.mxu1 %v1379_v0 }
  0x6b   :  { %1277 = vmatpush3.bf16.msra.mxu0 %v1367_v6  ;;  %1297 = vmatpush3.bf16.msra.mxu1 %v1368_v7 }
  0x6c   :  { %1278 = vmatprep.subr.bf16.mxu0 %v1379_v0  ;;  %1298 = vmatprep.subr.bf16.mxu1 %v1379_v0 }
  0x6f   :  { %1279 = vmatpush3.bf16.msra.mxu0 %v1369_v8  ;;  %1299 = vmatpush3.bf16.msra.mxu1 %v1370_v9 }
  0x70   :  { %1280 = vmatprep.subr.bf16.mxu0 %v1379_v0  ;;  %1300 = vmatprep.subr.bf16.mxu1 %v1379_v0 }
  0x73   :  { %1281 = vmatpush3.bf16.msra.mxu0 %v1371_v10  ;;  %1301 = vmatpush3.bf16.msra.mxu1 %v1372_v11  ;;  %v1067_v11 = vld [vmem:[%s1768_s5 + $0x1] sm:$0x1] }
  0x74   :  { %1282 = vmatprep.subr.bf16.mxu0 %v1379_v0  ;;  %1302 = vmatprep.subr.bf16.mxu1 %v1379_v0 }
  0x77   :  { %1283 = vmatpush3.bf16.msra.mxu0 %v1373_v12  ;;  %1303 = vmatpush3.bf16.msra.mxu1 %v1374_v13 }
  0x78   :  { %1284 = vmatprep.subr.bf16.mxu0 %v1379_v0  ;;  %1304 = vmatprep.subr.bf16.mxu1 %v1379_v0 }
  0x7b   :  { %1285 = vmatpush3.bf16.msra.mxu0 %v1375_v14  ;;  %1305 = vmatpush3.bf16.msra.mxu1 %v1376_v15 }
  0x7c   :  { %1286 = vmatprep.subr.bf16.mxu0 %v1379_v0  ;;  %1306 = vmatprep.subr.bf16.mxu1 %v1379_v0  ;;  %v387_v0 = vld [vmem:[%s1765_s4] sm:$0x1] }
  0x7f   :  { %1287 = vmatpush3.bf16.msra.mxu0 %v1377_v16  ;;  %1307 = vmatpush3.bf16.msra.mxu1 %v1378_v17 }
  0x82   :  { %1289 = vmatmul.mubr.bf16.vlgmr.msra.gmra.mrb[12].mxu0 %v724_v18  ;;  %1309 = vmatmul.mubr.bf16.vlgmr.msra.gmra.mrb[12].mxu1 %v1069_v19 }
  0xf5   :  { %v141_v20 = vpop.f32.mrb[0].mxu0  ;;  %v229_v22 = vpop.f32.mrb[0].mxu1 }
  0xf6   :  { %v1170_v21 = vpop.f32.mrb[1].mxu0  ;;  %v230_v23 = vadd.f32 %v229_v22, %v141_v20  ;;  %v1190_v25 = vpop.f32.mrb[1].mxu1 }
  0xf7   :  { %v144_v24 = vpop.f32.mrb[2].mxu0  ;;  %v232_v27 = vpop.f32.mrb[2].mxu1 }
  0xf8   :  { %v1171_v26 = vpop.f32.mrb[3].mxu0  ;;  %v1191_v28 = vpop.f32.mrb[3].mxu1 }
 0x115   :  { %v353_v29 = vpop.f32.mrb[4].mxu0  ;;  %v470_v33 = vpop.f32.mrb[4].mxu1 }
 0x116   :  { %v359_v31 = vadd.f32 %v353_v29, %v230_v23  ;;  %v1210_v32 = vpop.f32.mrb[5].mxu0  ;;  %v471_v35 = vadd.f32 %v470_v33, %v387_v0  ;;  %v1230_v36 = vpop.f32.mrb[5].mxu1 }
 0x117   :  { %v356_v34 = vpop.f32.mrb[6].mxu0  ;;  %v473_v41 = vpop.f32.mrb[6].mxu1 }
 0x118   :  { %v361_v37 = vadd.f32 %v360_v30, %v359_v31  ;;  %v1211_v40 = vpop.f32.mrb[7].mxu0  ;;  %v476_v42 = vpack.c.bf16 %v471_v35, %v471_v35  ;;  %v1231_v43 = vpop.f32.mrb[7].mxu1 }
 0x11a   :  { %v362_v44 = vmax.f32 %v361_v37, 0.0  ;;  %v478_v46 = vsel %vm1720_vm3, %v476_v42, %v477_v39 }
 0x11b   :  { %479 = vst [vmem:[%s1767_s6] sm:$0x1] %v478_v46 }
 0x11c   :  { %v363_v47 = vpack.c.bf16 %v362_v44, %v362_v44 }
 0x11e   :  { %v368_v48 = vsel %vm1720_vm3, %v363_v47, %v367_v45 }
 0x11f   :  { %369 = vst [vmem:[%s1768_s5] sm:$0x1] %v368_v48 }
 0x135   :  { %v598_v49 = vpop.f32.mrb[8].mxu0  ;;  %v686_v51 = vpop.f32.mrb[8].mxu1 }
 0x136   :  { %v1250_v50 = vpop.f32.mrb[9].mxu0  ;;  %v687_v52 = vadd.f32 %v686_v51, %v598_v49  ;;  %v1270_v54 = vpop.f32.mrb[9].mxu1 }
 0x137   :  { %v601_v53 = vpop.f32.mrb[10].mxu0  ;;  %v689_v56 = vpop.f32.mrb[10].mxu1 }
 0x138   :  { %v1251_v55 = vpop.f32.mrb[11].mxu0  ;;  %v1271_v57 = vpop.f32.mrb[11].mxu1 }
 0x155   :  { %v809_v59 = vpop.f32.mrb[12].mxu0  ;;  %v924_v63 = vpop.f32.mrb[12].mxu1 }
 0x156   :  { %v815_v61 = vadd.f32 %v809_v59, %v687_v52  ;;  %v1290_v62 = vpop.f32.mrb[13].mxu0  ;;  %v925_v1 = vadd.f32 %v924_v63, %v841_v58  ;;  %v1310_v3 = vpop.f32.mrb[13].mxu1 }
 0x157   :  { %v812_v2 = vpop.f32.mrb[14].mxu0  ;;  %v927_v7 = vpop.f32.mrb[14].mxu1 }
 0x158   :  { %v817_v4 = vadd.f32 %v816_v60, %v815_v61  ;;  %v1291_v6 = vpop.f32.mrb[15].mxu0  ;;  %v930_v8 = vpack.c.bf16 %v925_v1, %v925_v1  ;;  %v1311_v9 = vpop.f32.mrb[15].mxu1 }
 0x15a   :  { %v818_v10 = vmax.f32 %v817_v4, 0.0  ;;  %v933_v12 = vsel %vm1720_vm3, %v930_v8, %v1078_v5 }
 0x15b   :  { %1079 = vst [vmem:[%s1767_s6 + $0x1] sm:$0x1] %v933_v12 }
 0x15c   :  { %v819_v13 = vpack.c.bf16 %v818_v10, %v818_v10 }
 0x15e   :  { %v822_v14 = vsel %vm1720_vm3, %v819_v13, %v1067_v11 }
 0x15f   :  { %1068 = vst [vmem:[%s1768_s5 + $0x1] sm:$0x1] %v822_v14 }

// kernel: _lambda_.19
= control target key start
LH: loop header
LB: loop body
LE: loop exit
PB: predicated region body
PF: predicated region fallthrough
CT: control target
= control target key end

     0   :  { %v1203_v0 = vmov 0   ;;  %vm156_vm0 = vcmask 523264   ;;  %vm476_vm1 = vcmask 516096   ;;  %vm477_vm2 = vsmask.f32 256  ;;  %s1587_s1 = inlined_call_operand.vmem [shape: bf16[3,192,64], index: 1, kind: input, shape index: {}]   ;;  %s1588_s0 = inlined_call_operand.vmem [shape: bf16[1,2,3,192], index: 0, kind: input, shape index: {}]   ;;  %s1589_s3 = inlined_call_operand.vmem [shape: bf16[2,1,64], index: 3, kind: input, shape index: {}]   ;;  %s1590_s2 = inlined_call_operand.vmem [shape: f32[1,64], index: 2, kind: input, shape index: {}]   ;;  %s1591_s4 = inlined_call_operand.vmem [shape: bf16[2,1,64], index: 4, kind: output, shape index: {}]  }
   0x1   :  { %160 = vmatprep.subr.bf16.mxu0 %v1203_v0  ;;  %275 = vmatprep.subr.bf16.mxu1 %v1203_v0  ;;  %v1131_v1 = vld [vmem:[%s1587_s1 + $0x60] sm:$0xff]   ;;  %v1133_v3 = vld [vmem:[%s1587_s1 + $0x68] sm:$0xff]   ;;  %v1135_v5 = vld [vmem:[%s1587_s1 + $0x70] sm:$0xff]  }
   0x2   :  { %v1132_v2 = vld [vmem:[%s1587_s1] sm:$0xff]   ;;  %161 = vmatpush1.bf16.msra.mxu0 %v1131_v1  ;;  %v1134_v4 = vld [vmem:[%s1587_s1 + $0x8] sm:$0xff]   ;;  %v1136_v6 = vld [vmem:[%s1587_s1 + $0x10] sm:$0xff]  }
   0x3   :  { %276 = vmatpush1.bf16.msra.mxu1 %v1132_v2  ;;  %162 = vmatprep.subr.bf16.mxu0 %v1203_v0  ;;  %v1137_v7 = vld [vmem:[%s1587_s1 + $0x78] sm:$0xff]   ;;  %v1139_v9 = vld [vmem:[%s1587_s1 + $0x80] sm:$0xff]   ;;  %v1141_v11 = vld [vmem:[%s1587_s1 + $0x88] sm:$0xff]  }
   0x4   :  { %277 = vmatprep.subr.bf16.mxu1 %v1203_v0  ;;  %v1138_v8 = vld [vmem:[%s1587_s1 + $0x18] sm:$0xff]   ;;  %v1140_v10 = vld [vmem:[%s1587_s1 + $0x20] sm:$0xff]   ;;  %v1142_v12 = vld [vmem:[%s1587_s1 + $0x28] sm:$0xff]  }
   0x5   :  { %v1143_v13 = vld [vmem:[%s1587_s1 + $0x90] sm:$0xff]   ;;  %v971_v15 = vld.sshfl [vmem:[%s1588_s0] sm:$0x11 pattern:$0x76325410]  ;;  %v1145_v17 = vld [vmem:[%s1587_s1 + $0x98] sm:$0xff]  }
   0x6   :  { %163 = vmatpush1.bf16.msra.mxu0 %v1133_v3  ;;  %v1144_v14 = vld [vmem:[%s1587_s1 + $0x30] sm:$0xff]   ;;  %v76_v16 = vcombine.high %v971_v15, %v971_v15  ;;  %v1146_v18 = vld [vmem:[%s1587_s1 + $0x38] sm:$0xff]   ;;  %v1147_v20 = vld [vmem:[%s1587_s1 + $0xa0] sm:$0xff]   ;;  %v78_v28 = vshrl.u32 %v971_v15, 16 }
   0x7   :  { %278 = vmatpush1.bf16.msra.mxu1 %v1134_v4  ;;  %164 = vmatprep.subr.bf16.mxu0 %v1203_v0  ;;  %v1148_v21 = vld [vmem:[%s1587_s1 + $0x40] sm:$0xff]   ;;  %v1149_v22 = vld [vmem:[%s1587_s1 + $0xa8] sm:$0xff]   ;;  %v1151_v24 = vld [vmem:[%s1587_s1 + $0xb0] sm:$0xff]  }
   0x8   :  { %279 = vmatprep.subr.bf16.mxu1 %v1203_v0  ;;  %v81_v19 = vshrl.u32 %v76_v16, 16  ;;  %997 = vmatprep.mubr.msk.bf16.mxu1 %vm156_vm0, %v76_v16  ;;  %v1150_v23 = vld [vmem:[%s1587_s1 + $0x48] sm:$0xff]   ;;  %v1152_v25 = vld [vmem:[%s1587_s1 + $0x50] sm:$0xff]   ;;  %v1153_v26 = vld [vmem:[%s1587_s1 + $0xb8] sm:$0xff]  }
   0x9   :  { %v1154_v27 = vld [vmem:[%s1587_s1 + $0x58] sm:$0xff]   ;;  %v1155_v29 = vld [vmem:[%s1587_s1 + $0xc0] sm:$0xff]   ;;  %v1157_v32 = vld [vmem:[%s1587_s1 + $0xc8] sm:$0xff]  }
   0xa   :  { %165 = vmatpush1.bf16.msra.mxu0 %v1135_v5  ;;  %984 = vmatprep.mubr.msk.bf16.mxu0 %vm156_vm0, %v81_v19  ;;  %v1156_v30 = vld [vmem:[%s1587_s1 + $0x60] sm:$0xff]   ;;  %v1158_v35 = vld [vmem:[%s1587_s1 + $0x68] sm:$0xff]   ;;  %v1159_v39 = vld [vmem:[%s1587_s1 + $0xd0] sm:$0xff]  }
   0xb   :  { %280 = vmatpush1.bf16.msra.mxu1 %v1136_v6  ;;  %166 = vmatprep.subr.bf16.mxu0 %v1203_v0  ;;  %v1341_v31 = vld.sshfl [vmem:[%s1588_s0] sm:$0x22 pattern:$0x76325410]  ;;  %v1160_v40 = vld [vmem:[%s1587_s1 + $0x70] sm:$0xff]   ;;  %v1161_v41 = vld [vmem:[%s1587_s1 + $0xd8] sm:$0xff]  }
   0xc   :  { %281 = vmatprep.subr.bf16.mxu1 %v1203_v0  ;;  %v349_v33 = vcombine.high %v1341_v31, %v1341_v31  ;;  %v1351_v34 = vld.sshfl [vmem:[%s1588_s0 + $0x4] sm:$0x11 pattern:$0x76325410]  ;;  %v1162_v42 = vld [vmem:[%s1587_s1 + $0x78] sm:$0xff]   ;;  %v1165_v45 = vld [vmem:[%s1587_s1 + $0xe8] sm:$0xff]  }
   0xd   :  { %v1359_v36 = vcombine.high %v1351_v34, %v1351_v34  ;;  %v1163_v43 = vld [vmem:[%s1587_s1 + $0xe0] sm:$0xff]   ;;  %v1166_v46 = vld [vmem:[%s1587_s1 + $0x88] sm:$0xff]   ;;  %v1167_v47 = vld [vmem:[%s1587_s1 + $0xf0] sm:$0xff]   ;;  %v350_v60 = vrot.slane %v1341_v31, 1  ;;  %v542_v62 = vshrl.u32 %v1351_v34, 16 }
   0xe   :  { %167 = vmatpush1.bf16.msra.mxu0 %v1137_v7  ;;  %v351_v37 = vrot.slane %v349_v33, 1  ;;  %v1164_v44 = vld [vmem:[%s1587_s1 + $0x80] sm:$0xff]   ;;  %v1168_v48 = vld [vmem:[%s1587_s1 + $0x90] sm:$0xff]   ;;  %v1169_v49 = vld [vmem:[%s1587_s1 + $0xf8] sm:$0xff]  }
   0xf   :  { %282 = vmatpush1.bf16.msra.mxu1 %v1138_v8  ;;  %168 = vmatprep.subr.bf16.mxu0 %v1203_v0  ;;  %v545_v38 = vshrl.u32 %v1359_v36, 16  ;;  %v1170_v50 = vld [vmem:[%s1587_s1 + $0x98] sm:$0xff]   ;;  %v1171_v51 = vld [vmem:[%s1587_s1 + $0x100] sm:$0xff]   ;;  %v1173_v53 = vld [vmem:[%s1587_s1 + $0x108] sm:$0xff]  }
  0x10   :  { %283 = vmatprep.subr.bf16.mxu1 %v1203_v0  ;;  %v1172_v52 = vld [vmem:[%s1587_s1 + $0xa0] sm:$0xff]   ;;  %v1174_v54 = vld [vmem:[%s1587_s1 + $0xa8] sm:$0xff]   ;;  %v1175_v55 = vld [vmem:[%s1587_s1 + $0x110] sm:$0xff]  }
  0x11   :  { %v1176_v56 = vld [vmem:[%s1587_s1 + $0xb0] sm:$0xff]   ;;  %v1177_v57 = vld [vmem:[%s1587_s1 + $0x118] sm:$0xff]   ;;  %v1443_v58 = vld.sshfl [vmem:[%s1588_s0 + $0x4] sm:$0x22 pattern:$0x76325410] }
  0x12   :  { %169 = vmatpush1.bf16.msra.mxu0 %v1139_v9  ;;  %v1178_v59 = vld [vmem:[%s1587_s1 + $0xb8] sm:$0xff]   ;;  %v811_v61 = vcombine.high %v1443_v58, %v1443_v58  ;;  %v1179_v63 = vld [vmem:[%s1587_s1] sm:$0xff]   ;;  %v1181_v3 = vld [vmem:[%s1587_s1 + $0x8] sm:$0xff]  }
  0x13   :  { %284 = vmatpush1.bf16.msra.mxu1 %v1140_v10  ;;  %170 = vmatprep.subr.bf16.mxu0 %v1203_v0  ;;  %v1180_v1 = vld [vmem:[%s1587_s1 + $0xc0] sm:$0xff]   ;;  %v1182_v4 = vld [vmem:[%s1587_s1 + $0xc8] sm:$0xff]   ;;  %v1183_v5 = vld [vmem:[%s1587_s1 + $0x10] sm:$0xff]  }
  0x14   :  { %285 = vmatprep.subr.bf16.mxu1 %v1203_v0  ;;  %v813_v2 = vrot.slane %v811_v61, 1  ;;  %v1184_v6 = vld [vmem:[%s1587_s1 + $0xd0] sm:$0xff]   ;;  %v1185_v7 = vld [vmem:[%s1587_s1 + $0x18] sm:$0xff]   ;;  %v1187_v9 = vld [vmem:[%s1587_s1 + $0x20] sm:$0xff]  }
  0x15   :  { %v1186_v8 = vld [vmem:[%s1587_s1 + $0xd8] sm:$0xff]   ;;  %v1188_v10 = vld [vmem:[%s1587_s1 + $0xe0] sm:$0xff]   ;;  %v1197_v19 = vld [vmem:[%s1587_s1 + $0x48] sm:$0xff]  }
  0x16   :  { %171 = vmatpush1.bf16.msra.mxu0 %v1141_v11  ;;  %v1189_v11 = vld [vmem:[%s1587_s1 + $0x28] sm:$0xff]   ;;  %v1194_v16 = vld [vmem:[%s1587_s1 + $0xf8] sm:$0xff]   ;;  %vm1561_vm3 = vmand %vm476_vm1, %vm477_vm2 }
  0x17   :  { %286 = vmatpush1.bf16.msra.mxu1 %v1142_v12  ;;  %172 = vmatprep.subr.bf16.mxu0 %v1203_v0  ;;  %v1190_v12 = vld [vmem:[%s1587_s1 + $0xe8] sm:$0xff]  }
  0x18   :  { %287 = vmatprep.subr.bf16.mxu1 %v1203_v0 }
  0x1a   :  { %173 = vmatpush1.bf16.msra.mxu0 %v1143_v13  ;;  %v1191_v13 = vld [vmem:[%s1587_s1 + $0x30] sm:$0xff]  }
  0x1b   :  { %288 = vmatpush1.bf16.msra.mxu1 %v1144_v14  ;;  %174 = vmatprep.subr.bf16.mxu0 %v1203_v0  ;;  %v1192_v14 = vld [vmem:[%s1587_s1 + $0xf0] sm:$0xff]  }
  0x1c   :  { %289 = vmatprep.subr.bf16.mxu1 %v1203_v0 }
  0x1e   :  { %175 = vmatpush1.bf16.msra.mxu0 %v1145_v17  ;;  %v1195_v17 = vld [vmem:[%s1587_s1 + $0x40] sm:$0xff]  }
  0x1f   :  { %290 = vmatpush1.bf16.msra.mxu1 %v1146_v18  ;;  %176 = vmatprep.subr.bf16.mxu0 %v1203_v0  ;;  %v1196_v18 = vld [vmem:[%s1587_s1 + $0x100] sm:$0xff]  }
  0x20   :  { %291 = vmatprep.subr.bf16.mxu1 %v1203_v0 }
  0x22   :  { %177 = vmatpush1.bf16.msra.mxu0 %v1147_v20  ;;  %v1198_v20 = vld [vmem:[%s1587_s1 + $0x108] sm:$0xff]  }
  0x23   :  { %292 = vmatpush1.bf16.msra.mxu1 %v1148_v21  ;;  %178 = vmatprep.subr.bf16.mxu0 %v1203_v0  ;;  %v1199_v21 = vld [vmem:[%s1587_s1 + $0x50] sm:$0xff]  }
  0x24   :  { %293 = vmatprep.subr.bf16.mxu1 %v1203_v0 }
  0x26   :  { %179 = vmatpush1.bf16.msra.mxu0 %v1149_v22  ;;  %v1200_v22 = vld [vmem:[%s1587_s1 + $0x110] sm:$0xff]  }
  0x27   :  { %294 = vmatpush1.bf16.msra.mxu1 %v1150_v23  ;;  %180 = vmatprep.subr.bf16.mxu0 %v1203_v0  ;;  %v1201_v23 = vld [vmem:[%s1587_s1 + $0x58] sm:$0xff]  }
  0x28   :  { %295 = vmatprep.subr.bf16.mxu1 %v1203_v0 }
  0x2a   :  { %181 = vmatpush1.bf16.msra.mxu0 %v1151_v24  ;;  %v1202_v24 = vld [vmem:[%s1587_s1 + $0x118] sm:$0xff]  }
  0x2b   :  { %296 = vmatpush1.bf16.msra.mxu1 %v1152_v25  ;;  %182 = vmatprep.subr.bf16.mxu0 %v1203_v0  ;;  %v812_v25 = vrot.slane %v1443_v58, 1  ;;  %v931_v58 = vld [vmem:[%s1590_s2] sm:$0x1] }
  0x2c   :  { %297 = vmatprep.subr.bf16.mxu1 %v1203_v0 }
  0x2e   :  { %183 = vmatpush1.bf16.msra.mxu0 %v1153_v26 }
  0x2f   :  { %298 = vmatpush1.bf16.msra.mxu1 %v1154_v27  ;;  %428 = vmatprep.subr.bf16.mxu0 %v1203_v0 }
  0x30   :  { %623 = vmatprep.subr.bf16.mxu1 %v1203_v0 }
  0x31   :  { %193 = vmatmul.mubr.bf16.vlgmr.msra.gmra.mrb[0].mxu0 %v78_v28 }
  0x32   :  { %308 = vmatmul.mubr.bf16.vlgmr.msra.gmra.mrb[0].mxu1 %v971_v15  ;;  %429 = vmatpush1.bf16.msra.mxu0 %v1155_v29  ;;  %v1193_v15 = vld [vmem:[%s1587_s1 + $0x38] sm:$0xff]  }
  0x33   :  { %624 = vmatpush1.bf16.msra.mxu1 %v1156_v30  ;;  %430 = vmatprep.subr.bf16.mxu0 %v1203_v0 }
  0x34   :  { %625 = vmatprep.subr.bf16.mxu1 %v1203_v0  ;;  %1035 = vmatprep.mubr.msk.bf16.mxu0 %vm156_vm0, %v351_v37  ;;  %v469_v37 = vld [vmem:[%s1590_s2] sm:$0x1] }
  0x35   :  { %1074 = vmatprep.mubr.msk.bf16.mxu1 %vm156_vm0, %v545_v38 }
  0x36   :  { %431 = vmatpush1.bf16.msra.mxu0 %v1157_v32 }
  0x37   :  { %626 = vmatpush1.bf16.msra.mxu1 %v1158_v35  ;;  %432 = vmatprep.subr.bf16.mxu0 %v1203_v0 }
  0x38   :  { %627 = vmatprep.subr.bf16.mxu1 %v1203_v0 }
  0x3a   :  { %433 = vmatpush1.bf16.msra.mxu0 %v1159_v39 }
  0x3b   :  { %628 = vmatpush1.bf16.msra.mxu1 %v1160_v40  ;;  %434 = vmatprep.subr.bf16.mxu0 %v1203_v0 }
  0x3c   :  { %629 = vmatprep.subr.bf16.mxu1 %v1203_v0 }
  0x3e   :  { %435 = vmatpush1.bf16.msra.mxu0 %v1161_v41 }
  0x3f   :  { %630 = vmatpush1.bf16.msra.mxu1 %v1162_v42  ;;  %436 = vmatprep.subr.bf16.mxu0 %v1203_v0 }
  0x40   :  { %631 = vmatprep.subr.bf16.mxu1 %v1203_v0 }
  0x42   :  { %437 = vmatpush1.bf16.msra.mxu0 %v1163_v43 }
  0x43   :  { %632 = vmatpush1.bf16.msra.mxu1 %v1164_v44  ;;  %438 = vmatprep.subr.bf16.mxu0 %v1203_v0 }
  0x44   :  { %633 = vmatprep.subr.bf16.mxu1 %v1203_v0 }
  0x46   :  { %439 = vmatpush1.bf16.msra.mxu0 %v1165_v45 }
  0x47   :  { %634 = vmatpush1.bf16.msra.mxu1 %v1166_v46  ;;  %440 = vmatprep.subr.bf16.mxu0 %v1203_v0 }
  0x48   :  { %635 = vmatprep.subr.bf16.mxu1 %v1203_v0 }
  0x4a   :  { %441 = vmatpush1.bf16.msra.mxu0 %v1167_v47 }
  0x4b   :  { %636 = vmatpush1.bf16.msra.mxu1 %v1168_v48  ;;  %442 = vmatprep.subr.bf16.mxu0 %v1203_v0 }
  0x4c   :  { %637 = vmatprep.subr.bf16.mxu1 %v1203_v0 }
  0x4e   :  { %443 = vmatpush1.bf16.msra.mxu0 %v1169_v49 }
  0x4f   :  { %638 = vmatpush1.bf16.msra.mxu1 %v1170_v50  ;;  %444 = vmatprep.subr.bf16.mxu0 %v1203_v0  ;;  %v479_v50 = vld [vmem:[%s1591_s4] sm:$0x1] }
  0x50   :  { %639 = vmatprep.subr.bf16.mxu1 %v1203_v0 }
  0x52   :  { %445 = vmatpush1.bf16.msra.mxu0 %v1171_v51 }
  0x53   :  { %640 = vmatpush1.bf16.msra.mxu1 %v1172_v52  ;;  %446 = vmatprep.subr.bf16.mxu0 %v1203_v0 }
  0x54   :  { %641 = vmatprep.subr.bf16.mxu1 %v1203_v0 }
  0x56   :  { %447 = vmatpush1.bf16.msra.mxu0 %v1173_v53 }
  0x57   :  { %642 = vmatpush1.bf16.msra.mxu1 %v1174_v54  ;;  %448 = vmatprep.subr.bf16.mxu0 %v1203_v0  ;;  %v1127_v54 = vld [vmem:[%s1589_s3 + $0x1] sm:$0x1] }
  0x58   :  { %643 = vmatprep.subr.bf16.mxu1 %v1203_v0 }
  0x5a   :  { %449 = vmatpush1.bf16.msra.mxu0 %v1175_v55 }
  0x5b   :  { %644 = vmatpush1.bf16.msra.mxu1 %v1176_v56  ;;  %450 = vmatprep.subr.bf16.mxu0 %v1203_v0 }
  0x5c   :  { %645 = vmatprep.subr.bf16.mxu1 %v1203_v0 }
  0x5e   :  { %451 = vmatpush1.bf16.msra.mxu0 %v1177_v57 }
  0x5f   :  { %646 = vmatpush1.bf16.msra.mxu1 %v1178_v59  ;;  %738 = vmatprep.subr.bf16.mxu0 %v1203_v0 }
  0x60   :  { %890 = vmatprep.subr.bf16.mxu1 %v1203_v0 }
  0x61   :  { %461 = vmatmul.mubr.bf16.vlgmr.msra.gmra.mrb[4].mxu0 %v350_v60 }
  0x62   :  { %656 = vmatmul.mubr.bf16.vlgmr.msra.gmra.mrb[4].mxu1 %v542_v62  ;;  %739 = vmatpush1.bf16.msra.mxu0 %v1179_v63  ;;  %v935_v62 = vunpack.c.l.bf16 %v1127_v54 }
  0x63   :  { %891 = vmatpush1.bf16.msra.mxu1 %v1180_v1  ;;  %740 = vmatprep.subr.bf16.mxu0 %v1203_v0 }
  0x64   :  { %892 = vmatprep.subr.bf16.mxu1 %v1203_v0  ;;  %1087 = vmatprep.mubr.msk.bf16.mxu0 %vm156_vm0, %v1359_v36 }
  0x65   :  { %1126 = vmatprep.mubr.msk.bf16.mxu1 %vm156_vm0, %v813_v2 }
  0x66   :  { %741 = vmatpush1.bf16.msra.mxu0 %v1181_v3 }
  0x67   :  { %893 = vmatpush1.bf16.msra.mxu1 %v1182_v4  ;;  %742 = vmatprep.subr.bf16.mxu0 %v1203_v0 }
  0x68   :  { %894 = vmatprep.subr.bf16.mxu1 %v1203_v0 }
  0x6a   :  { %743 = vmatpush1.bf16.msra.mxu0 %v1183_v5 }
  0x6b   :  { %895 = vmatpush1.bf16.msra.mxu1 %v1184_v6  ;;  %744 = vmatprep.subr.bf16.mxu0 %v1203_v0  ;;  %v1128_v6 = vld [vmem:[%s1591_s4 + $0x1] sm:$0x1] }
  0x6c   :  { %896 = vmatprep.subr.bf16.mxu1 %v1203_v0 }
  0x6e   :  { %745 = vmatpush1.bf16.msra.mxu0 %v1185_v7 }
  0x6f   :  { %897 = vmatpush1.bf16.msra.mxu1 %v1186_v8  ;;  %746 = vmatprep.subr.bf16.mxu0 %v1203_v0 }
  0x70   :  { %898 = vmatprep.subr.bf16.mxu1 %v1203_v0 }
  0x72   :  { %747 = vmatpush1.bf16.msra.mxu0 %v1187_v9 }
  0x73   :  { %899 = vmatpush1.bf16.msra.mxu1 %v1188_v10  ;;  %748 = vmatprep.subr.bf16.mxu0 %v1203_v0 }
  0x74   :  { %900 = vmatprep.subr.bf16.mxu1 %v1203_v0 }
  0x76   :  { %749 = vmatpush1.bf16.msra.mxu0 %v1189_v11 }
  0x77   :  { %901 = vmatpush1.bf16.msra.mxu1 %v1190_v12  ;;  %750 = vmatprep.subr.bf16.mxu0 %v1203_v0 }
  0x78   :  { %902 = vmatprep.subr.bf16.mxu1 %v1203_v0 }
  0x7a   :  { %751 = vmatpush1.bf16.msra.mxu0 %v1191_v13 }
  0x7b   :  { %903 = vmatpush1.bf16.msra.mxu1 %v1192_v14  ;;  %752 = vmatprep.subr.bf16.mxu0 %v1203_v0 }
  0x7c   :  { %904 = vmatprep.subr.bf16.mxu1 %v1203_v0 }
  0x7e   :  { %753 = vmatpush1.bf16.msra.mxu0 %v1193_v15 }
  0x7f   :  { %905 = vmatpush1.bf16.msra.mxu1 %v1194_v16  ;;  %754 = vmatprep.subr.bf16.mxu0 %v1203_v0 }
  0x80   :  { %906 = vmatprep.subr.bf16.mxu1 %v1203_v0 }
  0x82   :  { %755 = vmatpush1.bf16.msra.mxu0 %v1195_v17 }
  0x83   :  { %907 = vmatpush1.bf16.msra.mxu1 %v1196_v18  ;;  %756 = vmatprep.subr.bf16.mxu0 %v1203_v0 }
  0x84   :  { %908 = vmatprep.subr.bf16.mxu1 %v1203_v0 }
  0x86   :  { %757 = vmatpush1.bf16.msra.mxu0 %v1197_v19 }
  0x87   :  { %909 = vmatpush1.bf16.msra.mxu1 %v1198_v20  ;;  %758 = vmatprep.subr.bf16.mxu0 %v1203_v0 }
  0x88   :  { %910 = vmatprep.subr.bf16.mxu1 %v1203_v0 }
  0x8a   :  { %759 = vmatpush1.bf16.msra.mxu0 %v1199_v21 }
  0x8b   :  { %911 = vmatpush1.bf16.msra.mxu1 %v1200_v22  ;;  %760 = vmatprep.subr.bf16.mxu0 %v1203_v0 }
  0x8c   :  { %912 = vmatprep.subr.bf16.mxu1 %v1203_v0  ;;  %v471_v0 = vld [vmem:[%s1589_s3] sm:$0x1] }
  0x8d   :  { %v472_v38 = vunpack.c.l.bf16 %v471_v0 }
  0x8e   :  { %761 = vmatpush1.bf16.msra.mxu0 %v1201_v23 }
  0x8f   :  { %913 = vmatpush1.bf16.msra.mxu1 %v1202_v24 }
  0x91   :  { %771 = vmatmul.mubr.bf16.vlgmr.msra.gmra.mrb[8].mxu0 %v1351_v34 }
  0x92   :  { %923 = vmatmul.mubr.bf16.vlgmr.msra.gmra.mrb[8].mxu1 %v812_v25 }
 0x104   :  { %v194_v26 = vpop.f32.mrb[0].mxu0 }
 0x105   :  { %v309_v27 = vpop.f32.mrb[0].mxu1  ;;  %v196_v28 = vpop.f32.mrb[1].mxu0 }
 0x106   :  { %v310_v29 = vadd.f32 %v309_v27, %v194_v26  ;;  %v311_v30 = vpop.f32.mrb[1].mxu1  ;;  %v197_v31 = vpop.f32.mrb[2].mxu0 }
 0x107   :  { %v312_v32 = vpop.f32.mrb[2].mxu1  ;;  %v198_v33 = vpop.f32.mrb[3].mxu0 }
 0x108   :  { %v313_v35 = vpop.f32.mrb[3].mxu1 }
 0x134   :  { %v462_v36 = vpop.f32.mrb[4].mxu0 }
 0x135   :  { %v468_v34 = vadd.f32 %v462_v36, %v310_v29  ;;  %v657_v39 = vpop.f32.mrb[4].mxu1  ;;  %v464_v40 = vpop.f32.mrb[5].mxu0 }
 0x136   :  { %v659_v41 = vpop.f32.mrb[5].mxu1  ;;  %v465_v42 = vpop.f32.mrb[6].mxu0 }
 0x137   :  { %v470_v43 = vadd.f32 %v469_v37, %v468_v34  ;;  %v660_v44 = vpop.f32.mrb[6].mxu1  ;;  %v466_v45 = vpop.f32.mrb[7].mxu0 }
 0x138   :  { %v661_v46 = vpop.f32.mrb[7].mxu1 }
 0x139   :  { %v473_v47 = vadd.f32 %v472_v38, %v470_v43 }
 0x13b   :  { %v474_v48 = vmax.f32 %v473_v47, 0.0 }
 0x13d   :  { %v475_v51 = vpack.c.bf16 %v474_v48, %v474_v48 }
 0x13f   :  { %v480_v52 = vsel %vm1561_vm3, %v475_v51, %v479_v50 }
 0x140   :  { %481 = vst [vmem:[%s1591_s4] sm:$0x1] %v480_v52 }
 0x164   :  { %v772_v53 = vpop.f32.mrb[8].mxu0 }
 0x165   :  { %v773_v55 = vadd.f32 %v772_v53, %v657_v39  ;;  %v924_v56 = vpop.f32.mrb[8].mxu1  ;;  %v774_v57 = vpop.f32.mrb[9].mxu0 }
 0x166   :  { %v926_v59 = vpop.f32.mrb[9].mxu1  ;;  %v775_v60 = vpop.f32.mrb[10].mxu0 }
 0x167   :  { %v930_v61 = vadd.f32 %v924_v56, %v773_v55  ;;  %v927_v63 = vpop.f32.mrb[10].mxu1  ;;  %v776_v1 = vpop.f32.mrb[11].mxu0 }
 0x168   :  { %v928_v2 = vpop.f32.mrb[11].mxu1 }
 0x169   :  { %v932_v3 = vadd.f32 %v931_v58, %v930_v61 }
 0x16b   :  { %v936_v4 = vadd.f32 %v935_v62, %v932_v3 }
 0x16d   :  { %v937_v5 = vmax.f32 %v936_v4, 0.0 }
 0x16f   :  { %v938_v7 = vpack.c.bf16 %v937_v5, %v937_v5 }
 0x171   :  { %v941_v8 = vsel %vm1561_vm3, %v938_v7, %v1128_v6 }
 0x172   :  { %1129 = vst [vmem:[%s1591_s4 + $0x1] sm:$0x1] %v941_v8 }

</bundles_post_ra>
